<compile_context>
chip_gen: v7x
topology: tpu7x:2x2x1
jax: 0.10.0
libtpu: 0.0.40
codegen_flags: <defaults>
</compile_context>

<pallas_src>
import math
import functools

import jax
import jax.numpy as jnp
from jax.experimental import pallas as pl
from jax.experimental.pallas import tpu as pltpu


# ----------------------------------------------------------------------------
# Fused Pallas kernel: conv1x1 (low-res) -> bilinear x2 -> InstanceNorm -> + skip
# ----------------------------------------------------------------------------

def _fused_kernel(x_ref, w_ref, uh_ref, uwt_ref, skip_ref, o_ref, zt_ref, *, eps):
    # x_ref:    (Cin, H, W)    one image, all input channels (low resolution)
    # w_ref:    (G, Cin)       1x1-conv weight block (G output channels)
    # uh_ref:   (sH, H)        row    interpolation matrix
    # uwt_ref:  (W, sW)        column interpolation matrix (transposed)
    # skip_ref: (G, sH, sW)    residual input
    # o_ref:    (G, sH, sW)    result
    # zt_ref:   (G, H, sW)     VMEM scratch: conv + width-upsampled activation
    Cin, H, W = x_ref.shape
    G, sH, sW = o_ref.shape

    w = w_ref[...]
    uh = uh_ref[...]
    uwt = uwt_ref[...]

    # Stage 1: 1x1 conv (channel mix) fused with the width upsample, one input row at a
    # time.  Both matmuls keep the fast axis (W / sW) on lanes; no reshapes needed.
    for h in range(H):                                   # static unroll (H known)
        zrow = jnp.dot(w, x_ref[:, h, :],                # (G, Cin) @ (Cin, W) -> (G, W)
                       preferred_element_type=jnp.float32)
        zt_ref[:, h, :] = jnp.dot(zrow, uwt,             # (G, W) @ (W, sW)   -> (G, sW)
                                  preferred_element_type=jnp.float32)

    # Stage 2: height upsample + InstanceNorm2d(affine=False) + residual add, per
    # output channel of this group.
    for g in range(G):                                   # static unroll (G small)
        up = jnp.dot(uh, zt_ref[g],                      # (sH, H) @ (H, sW) -> (sH, sW)
                     preferred_element_type=jnp.float32)
        mean = jnp.mean(up, axis=(0, 1), keepdims=True)          # (1, 1)
        cent = up - mean
        var = jnp.mean(cent * cent, axis=(0, 1), keepdims=True)  # (1, 1)  (biased var)
        o_ref[g] = cent * jax.lax.rsqrt(var + eps) + skip_ref[g]


# ----------------------------------------------------------------------------
# Host-side helpers
# ----------------------------------------------------------------------------

def _bilinear_matrix(in_size, scale):
    """(scale*in_size, in_size) matrix M so that  out = M @ in  matches PyTorch
    nn.Upsample(scale_factor=scale, mode='bilinear', align_corners=False) along 1D."""
    out_size = in_size * scale
    out_idx = jnp.arange(out_size, dtype=jnp.float32)
    src = (out_idx + 0.5) / float(scale) - 0.5
    src = jnp.clip(src, 0.0, float(in_size - 1))
    i0 = jnp.clip(jnp.floor(src).astype(jnp.int32), 0, in_size - 1)
    i1 = jnp.minimum(i0 + 1, in_size - 1)
    lam = src - i0.astype(jnp.float32)
    m = (jax.nn.one_hot(i0, in_size, dtype=jnp.float32) * (1.0 - lam)[:, None]
         + jax.nn.one_hot(i1, in_size, dtype=jnp.float32) * lam[:, None])
    return m


def _pick_channel_group(cout, cap=8):
    """Channels per grid step.  Must be the full channel dim or a multiple of 8 so the
    (G, Cin) weight block keeps a legal sublane tiling."""
    if cout <= cap:
        return cout
    if cout % cap == 0:
        return cap
    return cout  # fall back: whole channel dim in one block (always legal)


# ----------------------------------------------------------------------------
# UpsamplingAdd forward
# ----------------------------------------------------------------------------

def upsampling_add(x, x_skip, conv_w, scale=2, eps=1e-5):
    """x: (N, Cin, H, W), x_skip: (N, Cout, scale*H, scale*W),
    conv_w: (Cout, Cin, 1, 1) or (Cout, Cin).  Returns (N, Cout, scale*H, scale*W)."""
    N, Cin, H, W = x.shape
    Cout = conv_w.shape[0]
    sH, sW = scale * H, scale * W
    assert x_skip.shape == (N, Cout, sH, sW), x_skip.shape

    w2d = conv_w.reshape(Cout, Cin).astype(jnp.float32)
    uh = _bilinear_matrix(H, scale)            # (sH, H)
    uwt = _bilinear_matrix(W, scale).T         # (W, sW)
    G = _pick_channel_group(Cout)              # channels per grid step

    out = pl.pallas_call(
        functools.partial(_fused_kernel, eps=eps),
        out_shape=jax.ShapeDtypeStruct((N, Cout, sH, sW), jnp.float32),
        grid=(N, Cout // G),
        in_specs=[
            pl.BlockSpec((None, Cin, H, W), lambda n, c: (n, 0, 0, 0)),
            pl.BlockSpec((G, Cin), lambda n, c: (c, 0)),
            pl.BlockSpec((sH, H), lambda n, c: (0, 0)),
            pl.BlockSpec((W, sW), lambda n, c: (0, 0)),
            pl.BlockSpec((None, G, sH, sW), lambda n, c: (n, c, 0, 0)),
        ],
        out_specs=pl.BlockSpec((None, G, sH, sW), lambda n, c: (n, c, 0, 0)),
        scratch_shapes=[pltpu.VMEM((G, H, sW), jnp.float32)],
        compiler_params=pltpu.CompilerParams(
            dimension_semantics=("parallel", "parallel")),
    )(x.astype(jnp.float32), w2d, uh, uwt, x_skip.astype(jnp.float32))
    return out


# ----------------------------------------------------------------------------
# Pure-JAX reference (PyTorch op order: upsample -> conv -> instnorm -> add)
# ----------------------------------------------------------------------------

def _reference(x, x_skip, conv_w, scale=2, eps=1e-5):
    N, Cin, H, W = x.shape
    Cout = conv_w.shape[0]
    uh = _bilinear_matrix(H, scale)
    uw = _bilinear_matrix(W, scale)
    up = jnp.einsum('ph,nchw->ncpw', uh, x)
    up = jnp.einsum('qw,ncpw->ncpq', uw, up)
    y = jnp.einsum('oc,ncpq->nopq', conv_w.reshape(Cout, Cin), up)
    mean = y.mean(axis=(2, 3), keepdims=True)
    var = ((y - mean) ** 2).mean(axis=(2, 3), keepdims=True)
    y = (y - mean) * jax.lax.rsqrt(var + eps)
    return y + x_skip


# ----------------------------------------------------------------------------
# Main
# ----------------------------------------------------------------------------

if __name__ == "__main__":
    key = jax.random.PRNGKey(0)
    kx, ks, kw = jax.random.split(key, 3)

    N, Cin, Cout, H, W, scale = 2, 16, 8, 16, 16, 2
    x = jax.random.normal(kx, (N, Cin, H, W), jnp.float32)
    x_skip = jax.random.normal(ks, (N, Cout, scale * H, scale * W), jnp.float32)
    conv_w = jax.random.normal(kw, (Cout, Cin, 1, 1), jnp.float32) / math.sqrt(Cin)

    fwd = jax.jit(upsampling_add)          # scale=2, eps=1e-5 defaults (static)
    out = jax.block_until_ready(fwd(x, x_skip, conv_w))

    assert out.shape == (N, Cout, scale * H, scale * W), out.shape
    assert bool(jnp.all(jnp.isfinite(out)))

    ref = jax.block_until_ready(_reference(x, x_skip, conv_w, scale))
    max_err = float(jnp.max(jnp.abs(out - ref)))
    assert max_err < 1e-3, f"max abs err vs reference: {max_err}"

    print("KERNEL_OK")
</pallas_src>

<mosaic_0001>
module attributes {stable_mosaic.version = 11 : i64} {
  func.func @_fused_kernel(%arg0: i32, %arg1: i32, %arg2: memref<1x16x16x16xf32, #tpu.memory_space<vmem>>, %arg3: memref<8x16xf32, #tpu.memory_space<vmem>>, %arg4: memref<32x16xf32, #tpu.memory_space<vmem>>, %arg5: memref<16x32xf32, #tpu.memory_space<vmem>>, %arg6: memref<1x8x32x32xf32, #tpu.memory_space<vmem>>, %arg7: memref<1x8x32x32xf32, #tpu.memory_space<vmem>>, %arg8: memref<8x16x32xf32, #tpu.memory_space<vmem>>) attributes {dimension_semantics = [#tpu.dimension_semantics<parallel>, #tpu.dimension_semantics<parallel>], iteration_bounds = array<i64: 2, 1>, scalar_prefetch = 0 : i64, scratch_operands = 1 : i64, tpu.core_type = #tpu.core_type<tc>, window_params = [{transform_indices = @transform_0, window_bounds = array<i64: 1, 16, 16, 16>}, {transform_indices = @transform_1, window_bounds = array<i64: 8, 16>}, {pipeline_mode = #tpu.pipeline_mode<synchronous>, transform_indices = @transform_2, window_bounds = array<i64: 32, 16>}, {pipeline_mode = #tpu.pipeline_mode<synchronous>, transform_indices = @transform_3, window_bounds = array<i64: 16, 32>}, {transform_indices = @transform_4, window_bounds = array<i64: 1, 8, 32, 32>}, {transform_indices = @transform_5, window_bounds = array<i64: 1, 8, 32, 32>}]} {
    %c0 = arith.constant 0 : index
    %c0_0 = arith.constant 0 : index
    %0 = vector.load %arg3[%c0, %c0_0] : memref<8x16xf32, #tpu.memory_space<vmem>>, vector<8x16xf32>
    %c0_1 = arith.constant 0 : index
    %c0_2 = arith.constant 0 : index
    %1 = vector.load %arg4[%c0_1, %c0_2] : memref<32x16xf32, #tpu.memory_space<vmem>>, vector<32x16xf32>
    %c0_3 = arith.constant 0 : index
    %c0_4 = arith.constant 0 : index
    %2 = vector.load %arg5[%c0_3, %c0_4] : memref<16x32xf32, #tpu.memory_space<vmem>>, vector<16x32xf32>
    %c0_5 = arith.constant 0 : index
    %c0_6 = arith.constant 0 : index
    %c0_7 = arith.constant 0 : index
    %c0_8 = arith.constant 0 : index
    %3 = vector.load %arg2[%c0_5, %c0_6, %c0_7, %c0_8] : memref<1x16x16x16xf32, #tpu.memory_space<vmem>>, vector<1x16x1x16xf32>
    %4 = vector.shape_cast %3 : vector<1x16x1x16xf32> to vector<16x16xf32>
    %cst = arith.constant dense<0.000000e+00> : vector<8x16xf32>
    %5 = tpu.matmul %0, %4, %cst {dimension_numbers = #tpu.dot_dimension_numbers<[1], [0], [0], [1], [0, 0, 1, 1], [], []>} : vector<8x16xf32>, vector<16x16xf32>, vector<8x16xf32> -> vector<8x16xf32>
    %cst_9 = arith.constant dense<0.000000e+00> : vector<8x32xf32>
    %6 = tpu.matmul %5, %2, %cst_9 {dimension_numbers = #tpu.dot_dimension_numbers<[1], [0], [0], [1], [0, 0, 1, 1], [], []>} : vector<8x16xf32>, vector<16x32xf32>, vector<8x32xf32> -> vector<8x32xf32>
    %c0_10 = arith.constant 0 : index
    %c0_11 = arith.constant 0 : index
    %c0_12 = arith.constant 0 : index
    %7 = vector.load %arg8[%c0_10, %c0_11, %c0_12] : memref<8x16x32xf32, #tpu.memory_space<vmem>>, vector<8x1x32xf32>
    %8 = vector.shape_cast %7 : vector<8x1x32xf32> to vector<8x32xf32>
    %9 = vector.shape_cast %6 : vector<8x32xf32> to vector<8x1x32xf32>
    tpu.vector_store %arg8[%c0_10, %c0_11, %c0_12], %9 {strides = array<i32>} : memref<8x16x32xf32, #tpu.memory_space<vmem>>, vector<8x1x32xf32>,
    %c0_13 = arith.constant 0 : index
    %c0_14 = arith.constant 0 : index
    %c1 = arith.constant 1 : index
    %c0_15 = arith.constant 0 : index
    %10 = vector.load %arg2[%c0_13, %c0_14, %c1, %c0_15] : memref<1x16x16x16xf32, #tpu.memory_space<vmem>>, vector<1x16x1x16xf32>
    %11 = vector.shape_cast %10 : vector<1x16x1x16xf32> to vector<16x16xf32>
    %cst_16 = arith.constant dense<0.000000e+00> : vector<8x16xf32>
    %12 = tpu.matmul %0, %11, %cst_16 {dimension_numbers = #tpu.dot_dimension_numbers<[1], [0], [0], [1], [0, 0, 1, 1], [], []>} : vector<8x16xf32>, vector<16x16xf32>, vector<8x16xf32> -> vector<8x16xf32>
    %cst_17 = arith.constant dense<0.000000e+00> : vector<8x32xf32>
    %13 = tpu.matmul %12, %2, %cst_17 {dimension_numbers = #tpu.dot_dimension_numbers<[1], [0], [0], [1], [0, 0, 1, 1], [], []>} : vector<8x16xf32>, vector<16x32xf32>, vector<8x32xf32> -> vector<8x32xf32>
    %c0_18 = arith.constant 0 : index
    %c1_19 = arith.constant 1 : index
    %c0_20 = arith.constant 0 : index
    %14 = vector.load %arg8[%c0_18, %c1_19, %c0_20] : memref<8x16x32xf32, #tpu.memory_space<vmem>>, vector<8x1x32xf32>
    %15 = vector.shape_cast %14 : vector<8x1x32xf32> to vector<8x32xf32>
    %16 = vector.shape_cast %13 : vector<8x32xf32> to vector<8x1x32xf32>
    tpu.vector_store %arg8[%c0_18, %c1_19, %c0_20], %16 {strides = array<i32>} : memref<8x16x32xf32, #tpu.memory_space<vmem>>, vector<8x1x32xf32>,
    %c0_21 = arith.constant 0 : index
    %c0_22 = arith.constant 0 : index
    %c2 = arith.constant 2 : index
    %c0_23 = arith.constant 0 : index
    %17 = vector.load %arg2[%c0_21, %c0_22, %c2, %c0_23] : memref<1x16x16x16xf32, #tpu.memory_space<vmem>>, vector<1x16x1x16xf32>
    %18 = vector.shape_cast %17 : vector<1x16x1x16xf32> to vector<16x16xf32>
    %cst_24 = arith.constant dense<0.000000e+00> : vector<8x16xf32>
    %19 = tpu.matmul %0, %18, %cst_24 {dimension_numbers = #tpu.dot_dimension_numbers<[1], [0], [0], [1], [0, 0, 1, 1], [], []>} : vector<8x16xf32>, vector<16x16xf32>, vector<8x16xf32> -> vector<8x16xf32>
    %cst_25 = arith.constant dense<0.000000e+00> : vector<8x32xf32>
    %20 = tpu.matmul %19, %2, %cst_25 {dimension_numbers = #tpu.dot_dimension_numbers<[1], [0], [0], [1], [0, 0, 1, 1], [], []>} : vector<8x16xf32>, vector<16x32xf32>, vector<8x32xf32> -> vector<8x32xf32>
    %c0_26 = arith.constant 0 : index
    %c2_27 = arith.constant 2 : index
    %c0_28 = arith.constant 0 : index
    %21 = vector.load %arg8[%c0_26, %c2_27, %c0_28] : memref<8x16x32xf32, #tpu.memory_space<vmem>>, vector<8x1x32xf32>
    %22 = vector.shape_cast %21 : vector<8x1x32xf32> to vector<8x32xf32>
    %23 = vector.shape_cast %20 : vector<8x32xf32> to vector<8x1x32xf32>
    tpu.vector_store %arg8[%c0_26, %c2_27, %c0_28], %23 {strides = array<i32>} : memref<8x16x32xf32, #tpu.memory_space<vmem>>, vector<8x1x32xf32>,
    %c0_29 = arith.constant 0 : index
    %c0_30 = arith.constant 0 : index
    %c3 = arith.constant 3 : index
    %c0_31 = arith.constant 0 : index
    %24 = vector.load %arg2[%c0_29, %c0_30, %c3, %c0_31] : memref<1x16x16x16xf32, #tpu.memory_space<vmem>>, vector<1x16x1x16xf32>
    %25 = vector.shape_cast %24 : vector<1x16x1x16xf32> to vector<16x16xf32>
    %cst_32 = arith.constant dense<0.000000e+00> : vector<8x16xf32>
    %26 = tpu.matmul %0, %25, %cst_32 {dimension_numbers = #tpu.dot_dimension_numbers<[1], [0], [0], [1], [0, 0, 1, 1], [], []>} : vector<8x16xf32>, vector<16x16xf32>, vector<8x16xf32> -> vector<8x16xf32>
    %cst_33 = arith.constant dense<0.000000e+00> : vector<8x32xf32>
    %27 = tpu.matmul %26, %2, %cst_33 {dimension_numbers = #tpu.dot_dimension_numbers<[1], [0], [0], [1], [0, 0, 1, 1], [], []>} : vector<8x16xf32>, vector<16x32xf32>, vector<8x32xf32> -> vector<8x32xf32>
    %c0_34 = arith.constant 0 : index
    %c3_35 = arith.constant 3 : index
    %c0_36 = arith.constant 0 : index
    %28 = vector.load %arg8[%c0_34, %c3_35, %c0_36] : memref<8x16x32xf32, #tpu.memory_space<vmem>>, vector<8x1x32xf32>
    %29 = vector.shape_cast %28 : vector<8x1x32xf32> to vector<8x32xf32>
    %30 = vector.shape_cast %27 : vector<8x32xf32> to vector<8x1x32xf32>
    tpu.vector_store %arg8[%c0_34, %c3_35, %c0_36], %30 {strides = array<i32>} : memref<8x16x32xf32, #tpu.memory_space<vmem>>, vector<8x1x32xf32>,
    %c0_37 = arith.constant 0 : index
    %c0_38 = arith.constant 0 : index
    %c4 = arith.constant 4 : index
    %c0_39 = arith.constant 0 : index
    %31 = vector.load %arg2[%c0_37, %c0_38, %c4, %c0_39] : memref<1x16x16x16xf32, #tpu.memory_space<vmem>>, vector<1x16x1x16xf32>
    %32 = vector.shape_cast %31 : vector<1x16x1x16xf32> to vector<16x16xf32>
    %cst_40 = arith.constant dense<0.000000e+00> : vector<8x16xf32>
    %33 = tpu.matmul %0, %32, %cst_40 {dimension_numbers = #tpu.dot_dimension_numbers<[1], [0], [0], [1], [0, 0, 1, 1], [], []>} : vector<8x16xf32>, vector<16x16xf32>, vector<8x16xf32> -> vector<8x16xf32>
    %cst_41 = arith.constant dense<0.000000e+00> : vector<8x32xf32>
    %34 = tpu.matmul %33, %2, %cst_41 {dimension_numbers = #tpu.dot_dimension_numbers<[1], [0], [0], [1], [0, 0, 1, 1], [], []>} : vector<8x16xf32>, vector<16x32xf32>, vector<8x32xf32> -> vector<8x32xf32>
    %c0_42 = arith.constant 0 : index
    %c4_43 = arith.constant 4 : index
    %c0_44 = arith.constant 0 : index
    %35 = vector.load %arg8[%c0_42, %c4_43, %c0_44] : memref<8x16x32xf32, #tpu.memory_space<vmem>>, vector<8x1x32xf32>
    %36 = vector.shape_cast %35 : vector<8x1x32xf32> to vector<8x32xf32>
    %37 = vector.shape_cast %34 : vector<8x32xf32> to vector<8x1x32xf32>
    tpu.vector_store %arg8[%c0_42, %c4_43, %c0_44], %37 {strides = array<i32>} : memref<8x16x32xf32, #tpu.memory_space<vmem>>, vector<8x1x32xf32>,
    %c0_45 = arith.constant 0 : index
    %c0_46 = arith.constant 0 : index
    %c5 = arith.constant 5 : index
    %c0_47 = arith.constant 0 : index
    %38 = vector.load %arg2[%c0_45, %c0_46, %c5, %c0_47] : memref<1x16x16x16xf32, #tpu.memory_space<vmem>>, vector<1x16x1x16xf32>
    %39 = vector.shape_cast %38 : vector<1x16x1x16xf32> to vector<16x16xf32>
    %cst_48 = arith.constant dense<0.000000e+00> : vector<8x16xf32>
    %40 = tpu.matmul %0, %39, %cst_48 {dimension_numbers = #tpu.dot_dimension_numbers<[1], [0], [0], [1], [0, 0, 1, 1], [], []>} : vector<8x16xf32>, vector<16x16xf32>, vector<8x16xf32> -> vector<8x16xf32>
    %cst_49 = arith.constant dense<0.000000e+00> : vector<8x32xf32>
    %41 = tpu.matmul %40, %2, %cst_49 {dimension_numbers = #tpu.dot_dimension_numbers<[1], [0], [0], [1], [0, 0, 1, 1], [], []>} : vector<8x16xf32>, vector<16x32xf32>, vector<8x32xf32> -> vector<8x32xf32>
    %c0_50 = arith.constant 0 : index
    %c5_51 = arith.constant 5 : index
    %c0_52 = arith.constant 0 : index
    %42 = vector.load %arg8[%c0_50, %c5_51, %c0_52] : memref<8x16x32xf32, #tpu.memory_space<vmem>>, vector<8x1x32xf32>
    %43 = vector.shape_cast %42 : vector<8x1x32xf32> to vector<8x32xf32>
    %44 = vector.shape_cast %41 : vector<8x32xf32> to vector<8x1x32xf32>
    tpu.vector_store %arg8[%c0_50, %c5_51, %c0_52], %44 {strides = array<i32>} : memref<8x16x32xf32, #tpu.memory_space<vmem>>, vector<8x1x32xf32>,
    %c0_53 = arith.constant 0 : index
    %c0_54 = arith.constant 0 : index
    %c6 = arith.constant 6 : index
    %c0_55 = arith.constant 0 : index
    %45 = vector.load %arg2[%c0_53, %c0_54, %c6, %c0_55] : memref<1x16x16x16xf32, #tpu.memory_space<vmem>>, vector<1x16x1x16xf32>
    %46 = vector.shape_cast %45 : vector<1x16x1x16xf32> to vector<16x16xf32>
    %cst_56 = arith.constant dense<0.000000e+00> : vector<8x16xf32>
    %47 = tpu.matmul %0, %46, %cst_56 {dimension_numbers = #tpu.dot_dimension_numbers<[1], [0], [0], [1], [0, 0, 1, 1], [], []>} : vector<8x16xf32>, vector<16x16xf32>, vector<8x16xf32> -> vector<8x16xf32>
    %cst_57 = arith.constant dense<0.000000e+00> : vector<8x32xf32>
    %48 = tpu.matmul %47, %2, %cst_57 {dimension_numbers = #tpu.dot_dimension_numbers<[1], [0], [0], [1], [0, 0, 1, 1], [], []>} : vector<8x16xf32>, vector<16x32xf32>, vector<8x32xf32> -> vector<8x32xf32>
    %c0_58 = arith.constant 0 : index
    %c6_59 = arith.constant 6 : index
    %c0_60 = arith.constant 0 : index
    %49 = vector.load %arg8[%c0_58, %c6_59, %c0_60] : memref<8x16x32xf32, #tpu.memory_space<vmem>>, vector<8x1x32xf32>
    %50 = vector.shape_cast %49 : vector<8x1x32xf32> to vector<8x32xf32>
    %51 = vector.shape_cast %48 : vector<8x32xf32> to vector<8x1x32xf32>
    tpu.vector_store %arg8[%c0_58, %c6_59, %c0_60], %51 {strides = array<i32>} : memref<8x16x32xf32, #tpu.memory_space<vmem>>, vector<8x1x32xf32>,
    %c0_61 = arith.constant 0 : index
    %c0_62 = arith.constant 0 : index
    %c7 = arith.constant 7 : index
    %c0_63 = arith.constant 0 : index
    %52 = vector.load %arg2[%c0_61, %c0_62, %c7, %c0_63] : memref<1x16x16x16xf32, #tpu.memory_space<vmem>>, vector<1x16x1x16xf32>
    %53 = vector.shape_cast %52 : vector<1x16x1x16xf32> to vector<16x16xf32>
    %cst_64 = arith.constant dense<0.000000e+00> : vector<8x16xf32>
    %54 = tpu.matmul %0, %53, %cst_64 {dimension_numbers = #tpu.dot_dimension_numbers<[1], [0], [0], [1], [0, 0, 1, 1], [], []>} : vector<8x16xf32>, vector<16x16xf32>, vector<8x16xf32> -> vector<8x16xf32>
    %cst_65 = arith.constant dense<0.000000e+00> : vector<8x32xf32>
    %55 = tpu.matmul %54, %2, %cst_65 {dimension_numbers = #tpu.dot_dimension_numbers<[1], [0], [0], [1], [0, 0, 1, 1], [], []>} : vector<8x16xf32>, vector<16x32xf32>, vector<8x32xf32> -> vector<8x32xf32>
    %c0_66 = arith.constant 0 : index
    %c7_67 = arith.constant 7 : index
    %c0_68 = arith.constant 0 : index
    %56 = vector.load %arg8[%c0_66, %c7_67, %c0_68] : memref<8x16x32xf32, #tpu.memory_space<vmem>>, vector<8x1x32xf32>
    %57 = vector.shape_cast %56 : vector<8x1x32xf32> to vector<8x32xf32>
    %58 = vector.shape_cast %55 : vector<8x32xf32> to vector<8x1x32xf32>
    tpu.vector_store %arg8[%c0_66, %c7_67, %c0_68], %58 {strides = array<i32>} : memref<8x16x32xf32, #tpu.memory_space<vmem>>, vector<8x1x32xf32>,
    %c0_69 = arith.constant 0 : index
    %c0_70 = arith.constant 0 : index
    %c8 = arith.constant 8 : index
    %c0_71 = arith.constant 0 : index
    %59 = vector.load %arg2[%c0_69, %c0_70, %c8, %c0_71] : memref<1x16x16x16xf32, #tpu.memory_space<vmem>>, vector<1x16x1x16xf32>
    %60 = vector.shape_cast %59 : vector<1x16x1x16xf32> to vector<16x16xf32>
    %cst_72 = arith.constant dense<0.000000e+00> : vector<8x16xf32>
    %61 = tpu.matmul %0, %60, %cst_72 {dimension_numbers = #tpu.dot_dimension_numbers<[1], [0], [0], [1], [0, 0, 1, 1], [], []>} : vector<8x16xf32>, vector<16x16xf32>, vector<8x16xf32> -> vector<8x16xf32>
    %cst_73 = arith.constant dense<0.000000e+00> : vector<8x32xf32>
    %62 = tpu.matmul %61, %2, %cst_73 {dimension_numbers = #tpu.dot_dimension_numbers<[1], [0], [0], [1], [0, 0, 1, 1], [], []>} : vector<8x16xf32>, vector<16x32xf32>, vector<8x32xf32> -> vector<8x32xf32>
    %c0_74 = arith.constant 0 : index
    %c8_75 = arith.constant 8 : index
    %c0_76 = arith.constant 0 : index
    %63 = vector.load %arg8[%c0_74, %c8_75, %c0_76] : memref<8x16x32xf32, #tpu.memory_space<vmem>>, vector<8x1x32xf32>
    %64 = vector.shape_cast %63 : vector<8x1x32xf32> to vector<8x32xf32>
    %65 = vector.shape_cast %62 : vector<8x32xf32> to vector<8x1x32xf32>
    tpu.vector_store %arg8[%c0_74, %c8_75, %c0_76], %65 {strides = array<i32>} : memref<8x16x32xf32, #tpu.memory_space<vmem>>, vector<8x1x32xf32>,
    %c0_77 = arith.constant 0 : index
    %c0_78 = arith.constant 0 : index
    %c9 = arith.constant 9 : index
    %c0_79 = arith.constant 0 : index
    %66 = vector.load %arg2[%c0_77, %c0_78, %c9, %c0_79] : memref<1x16x16x16xf32, #tpu.memory_space<vmem>>, vector<1x16x1x16xf32>
    %67 = vector.shape_cast %66 : vector<1x16x1x16xf32> to vector<16x16xf32>
    %cst_80 = arith.constant dense<0.000000e+00> : vector<8x16xf32>
    %68 = tpu.matmul %0, %67, %cst_80 {dimension_numbers = #tpu.dot_dimension_numbers<[1], [0], [0], [1], [0, 0, 1, 1], [], []>} : vector<8x16xf32>, vector<16x16xf32>, vector<8x16xf32> -> vector<8x16xf32>
    %cst_81 = arith.constant dense<0.000000e+00> : vector<8x32xf32>
    %69 = tpu.matmul %68, %2, %cst_81 {dimension_numbers = #tpu.dot_dimension_numbers<[1], [0], [0], [1], [0, 0, 1, 1], [], []>} : vector<8x16xf32>, vector<16x32xf32>, vector<8x32xf32> -> vector<8x32xf32>
    %c0_82 = arith.constant 0 : index
    %c9_83 = arith.constant 9 : index
    %c0_84 = arith.constant 0 : index
    %70 = vector.load %arg8[%c0_82, %c9_83, %c0_84] : memref<8x16x32xf32, #tpu.memory_space<vmem>>, vector<8x1x32xf32>
    %71 = vector.shape_cast %70 : vector<8x1x32xf32> to vector<8x32xf32>
    %72 = vector.shape_cast %69 : vector<8x32xf32> to vector<8x1x32xf32>
    tpu.vector_store %arg8[%c0_82, %c9_83, %c0_84], %72 {strides = array<i32>} : memref<8x16x32xf32, #tpu.memory_space<vmem>>, vector<8x1x32xf32>,
    %c0_85 = arith.constant 0 : index
    %c0_86 = arith.constant 0 : index
    %c10 = arith.constant 10 : index
    %c0_87 = arith.constant 0 : index
    %73 = vector.load %arg2[%c0_85, %c0_86, %c10, %c0_87] : memref<1x16x16x16xf32, #tpu.memory_space<vmem>>, vector<1x16x1x16xf32>
    %74 = vector.shape_cast %73 : vector<1x16x1x16xf32> to vector<16x16xf32>
    %cst_88 = arith.constant dense<0.000000e+00> : vector<8x16xf32>
    %75 = tpu.matmul %0, %74, %cst_88 {dimension_numbers = #tpu.dot_dimension_numbers<[1], [0], [0], [1], [0, 0, 1, 1], [], []>} : vector<8x16xf32>, vector<16x16xf32>, vector<8x16xf32> -> vector<8x16xf32>
    %cst_89 = arith.constant dense<0.000000e+00> : vector<8x32xf32>
    %76 = tpu.matmul %75, %2, %cst_89 {dimension_numbers = #tpu.dot_dimension_numbers<[1], [0], [0], [1], [0, 0, 1, 1], [], []>} : vector<8x16xf32>, vector<16x32xf32>, vector<8x32xf32> -> vector<8x32xf32>
    %c0_90 = arith.constant 0 : index
    %c10_91 = arith.constant 10 : index
    %c0_92 = arith.constant 0 : index
    %77 = vector.load %arg8[%c0_90, %c10_91, %c0_92] : memref<8x16x32xf32, #tpu.memory_space<vmem>>, vector<8x1x32xf32>
    %78 = vector.shape_cast %77 : vector<8x1x32xf32> to vector<8x32xf32>
    %79 = vector.shape_cast %76 : vector<8x32xf32> to vector<8x1x32xf32>
    tpu.vector_store %arg8[%c0_90, %c10_91, %c0_92], %79 {strides = array<i32>} : memref<8x16x32xf32, #tpu.memory_space<vmem>>, vector<8x1x32xf32>,
    %c0_93 = arith.constant 0 : index
    %c0_94 = arith.constant 0 : index
    %c11 = arith.constant 11 : index
    %c0_95 = arith.constant 0 : index
    %80 = vector.load %arg2[%c0_93, %c0_94, %c11, %c0_95] : memref<1x16x16x16xf32, #tpu.memory_space<vmem>>, vector<1x16x1x16xf32>
    %81 = vector.shape_cast %80 : vector<1x16x1x16xf32> to vector<16x16xf32>
    %cst_96 = arith.constant dense<0.000000e+00> : vector<8x16xf32>
    %82 = tpu.matmul %0, %81, %cst_96 {dimension_numbers = #tpu.dot_dimension_numbers<[1], [0], [0], [1], [0, 0, 1, 1], [], []>} : vector<8x16xf32>, vector<16x16xf32>, vector<8x16xf32> -> vector<8x16xf32>
    %cst_97 = arith.constant dense<0.000000e+00> : vector<8x32xf32>
    %83 = tpu.matmul %82, %2, %cst_97 {dimension_numbers = #tpu.dot_dimension_numbers<[1], [0], [0], [1], [0, 0, 1, 1], [], []>} : vector<8x16xf32>, vector<16x32xf32>, vector<8x32xf32> -> vector<8x32xf32>
    %c0_98 = arith.constant 0 : index
    %c11_99 = arith.constant 11 : index
    %c0_100 = arith.constant 0 : index
    %84 = vector.load %arg8[%c0_98, %c11_99, %c0_100] : memref<8x16x32xf32, #tpu.memory_space<vmem>>, vector<8x1x32xf32>
    %85 = vector.shape_cast %84 : vector<8x1x32xf32> to vector<8x32xf32>
    %86 = vector.shape_cast %83 : vector<8x32xf32> to vector<8x1x32xf32>
    tpu.vector_store %arg8[%c0_98, %c11_99, %c0_100], %86 {strides = array<i32>} : memref<8x16x32xf32, #tpu.memory_space<vmem>>, vector<8x1x32xf32>,
    %c0_101 = arith.constant 0 : index
    %c0_102 = arith.constant 0 : index
    %c12 = arith.constant 12 : index
    %c0_103 = arith.constant 0 : index
    %87 = vector.load %arg2[%c0_101, %c0_102, %c12, %c0_103] : memref<1x16x16x16xf32, #tpu.memory_space<vmem>>, vector<1x16x1x16xf32>
    %88 = vector.shape_cast %87 : vector<1x16x1x16xf32> to vector<16x16xf32>
    %cst_104 = arith.constant dense<0.000000e+00> : vector<8x16xf32>
    %89 = tpu.matmul %0, %88, %cst_104 {dimension_numbers = #tpu.dot_dimension_numbers<[1], [0], [0], [1], [0, 0, 1, 1], [], []>} : vector<8x16xf32>, vector<16x16xf32>, vector<8x16xf32> -> vector<8x16xf32>
    %cst_105 = arith.constant dense<0.000000e+00> : vector<8x32xf32>
    %90 = tpu.matmul %89, %2, %cst_105 {dimension_numbers = #tpu.dot_dimension_numbers<[1], [0], [0], [1], [0, 0, 1, 1], [], []>} : vector<8x16xf32>, vector<16x32xf32>, vector<8x32xf32> -> vector<8x32xf32>
    %c0_106 = arith.constant 0 : index
    %c12_107 = arith.constant 12 : index
    %c0_108 = arith.constant 0 : index
    %91 = vector.load %arg8[%c0_106, %c12_107, %c0_108] : memref<8x16x32xf32, #tpu.memory_space<vmem>>, vector<8x1x32xf32>
    %92 = vector.shape_cast %91 : vector<8x1x32xf32> to vector<8x32xf32>
    %93 = vector.shape_cast %90 : vector<8x32xf32> to vector<8x1x32xf32>
    tpu.vector_store %arg8[%c0_106, %c12_107, %c0_108], %93 {strides = array<i32>} : memref<8x16x32xf32, #tpu.memory_space<vmem>>, vector<8x1x32xf32>,
    %c0_109 = arith.constant 0 : index
    %c0_110 = arith.constant 0 : index
    %c13 = arith.constant 13 : index
    %c0_111 = arith.constant 0 : index
    %94 = vector.load %arg2[%c0_109, %c0_110, %c13, %c0_111] : memref<1x16x16x16xf32, #tpu.memory_space<vmem>>, vector<1x16x1x16xf32>
    %95 = vector.shape_cast %94 : vector<1x16x1x16xf32> to vector<16x16xf32>
    %cst_112 = arith.constant dense<0.000000e+00> : vector<8x16xf32>
    %96 = tpu.matmul %0, %95, %cst_112 {dimension_numbers = #tpu.dot_dimension_numbers<[1], [0], [0], [1], [0, 0, 1, 1], [], []>} : vector<8x16xf32>, vector<16x16xf32>, vector<8x16xf32> -> vector<8x16xf32>
    %cst_113 = arith.constant dense<0.000000e+00> : vector<8x32xf32>
    %97 = tpu.matmul %96, %2, %cst_113 {dimension_numbers = #tpu.dot_dimension_numbers<[1], [0], [0], [1], [0, 0, 1, 1], [], []>} : vector<8x16xf32>, vector<16x32xf32>, vector<8x32xf32> -> vector<8x32xf32>
    %c0_114 = arith.constant 0 : index
    %c13_115 = arith.constant 13 : index
    %c0_116 = arith.constant 0 : index
    %98 = vector.load %arg8[%c0_114, %c13_115, %c0_116] : memref<8x16x32xf32, #tpu.memory_space<vmem>>, vector<8x1x32xf32>
    %99 = vector.shape_cast %98 : vector<8x1x32xf32> to vector<8x32xf32>
    %100 = vector.shape_cast %97 : vector<8x32xf32> to vector<8x1x32xf32>
    tpu.vector_store %arg8[%c0_114, %c13_115, %c0_116], %100 {strides = array<i32>} : memref<8x16x32xf32, #tpu.memory_space<vmem>>, vector<8x1x32xf32>,
    %c0_117 = arith.constant 0 : index
    %c0_118 = arith.constant 0 : index
    %c14 = arith.constant 14 : index
    %c0_119 = arith.constant 0 : index
    %101 = vector.load %arg2[%c0_117, %c0_118, %c14, %c0_119] : memref<1x16x16x16xf32, #tpu.memory_space<vmem>>, vector<1x16x1x16xf32>
    %102 = vector.shape_cast %101 : vector<1x16x1x16xf32> to vector<16x16xf32>
    %cst_120 = arith.constant dense<0.000000e+00> : vector<8x16xf32>
    %103 = tpu.matmul %0, %102, %cst_120 {dimension_numbers = #tpu.dot_dimension_numbers<[1], [0], [0], [1], [0, 0, 1, 1], [], []>} : vector<8x16xf32>, vector<16x16xf32>, vector<8x16xf32> -> vector<8x16xf32>
    %cst_121 = arith.constant dense<0.000000e+00> : vector<8x32xf32>
    %104 = tpu.matmul %103, %2, %cst_121 {dimension_numbers = #tpu.dot_dimension_numbers<[1], [0], [0], [1], [0, 0, 1, 1], [], []>} : vector<8x16xf32>, vector<16x32xf32>, vector<8x32xf32> -> vector<8x32xf32>
    %c0_122 = arith.constant 0 : index
    %c14_123 = arith.constant 14 : index
    %c0_124 = arith.constant 0 : index
    %105 = vector.load %arg8[%c0_122, %c14_123, %c0_124] : memref<8x16x32xf32, #tpu.memory_space<vmem>>, vector<8x1x32xf32>
    %106 = vector.shape_cast %105 : vector<8x1x32xf32> to vector<8x32xf32>
    %107 = vector.shape_cast %104 : vector<8x32xf32> to vector<8x1x32xf32>
    tpu.vector_store %arg8[%c0_122, %c14_123, %c0_124], %107 {strides = array<i32>} : memref<8x16x32xf32, #tpu.memory_space<vmem>>, vector<8x1x32xf32>,
    %c0_125 = arith.constant 0 : index
    %c0_126 = arith.constant 0 : index
    %c15 = arith.constant 15 : index
    %c0_127 = arith.constant 0 : index
    %108 = vector.load %arg2[%c0_125, %c0_126, %c15, %c0_127] : memref<1x16x16x16xf32, #tpu.memory_space<vmem>>, vector<1x16x1x16xf32>
    %109 = vector.shape_cast %108 : vector<1x16x1x16xf32> to vector<16x16xf32>
    %cst_128 = arith.constant dense<0.000000e+00> : vector<8x16xf32>
    %110 = tpu.matmul %0, %109, %cst_128 {dimension_numbers = #tpu.dot_dimension_numbers<[1], [0], [0], [1], [0, 0, 1, 1], [], []>} : vector<8x16xf32>, vector<16x16xf32>, vector<8x16xf32> -> vector<8x16xf32>
    %cst_129 = arith.constant dense<0.000000e+00> : vector<8x32xf32>
    %111 = tpu.matmul %110, %2, %cst_129 {dimension_numbers = #tpu.dot_dimension_numbers<[1], [0], [0], [1], [0, 0, 1, 1], [], []>} : vector<8x16xf32>, vector<16x32xf32>, vector<8x32xf32> -> vector<8x32xf32>
    %c0_130 = arith.constant 0 : index
    %c15_131 = arith.constant 15 : index
    %c0_132 = arith.constant 0 : index
    %112 = vector.load %arg8[%c0_130, %c15_131, %c0_132] : memref<8x16x32xf32, #tpu.memory_space<vmem>>, vector<8x1x32xf32>
    %113 = vector.shape_cast %112 : vector<8x1x32xf32> to vector<8x32xf32>
    %114 = vector.shape_cast %111 : vector<8x32xf32> to vector<8x1x32xf32>
    tpu.vector_store %arg8[%c0_130, %c15_131, %c0_132], %114 {strides = array<i32>} : memref<8x16x32xf32, #tpu.memory_space<vmem>>, vector<8x1x32xf32>,
    %c0_133 = arith.constant 0 : index
    %c0_134 = arith.constant 0 : index
    %c0_135 = arith.constant 0 : index
    %115 = vector.load %arg8[%c0_133, %c0_134, %c0_135] : memref<8x16x32xf32, #tpu.memory_space<vmem>>, vector<1x16x32xf32>
    %116 = vector.shape_cast %115 : vector<1x16x32xf32> to vector<16x32xf32>
    %cst_136 = arith.constant dense<0.000000e+00> : vector<32x32xf32>
    %117 = tpu.matmul %1, %116, %cst_136 {dimension_numbers = #tpu.dot_dimension_numbers<[1], [0], [0], [1], [0, 0, 1, 1], [], []>} : vector<32x16xf32>, vector<16x32xf32>, vector<32x32xf32> -> vector<32x32xf32>
    %118 = vector.shape_cast %117 : vector<32x32xf32> to vector<1x32x32xf32>
    %cst_137 = arith.constant dense<0.000000e+00> : vector<1xf32>
    %119 = vector.multi_reduction <add>, %118, %cst_137 [1, 2] : vector<1x32x32xf32> to vector<1xf32>
    %120 = vector.shape_cast %119 : vector<1xf32> to vector<1x1x1xf32>
    %121 = vector.extract %120[0, 0, 0] : f32 from vector<1x1x1xf32>
    %122 = vector.broadcast %121 : f32 to vector<1x1xf32>
    %cst_138 = arith.constant 1.024000e+03 : f32
    %123 = vector.broadcast %cst_138 : f32 to vector<1x1xf32>
    %124 = arith.divf %122, %123 : vector<1x1xf32>
    %125 = vector.broadcast %124 : vector<1x1xf32> to vector<32x32xf32>
    %126 = arith.subf %117, %125 : vector<32x32xf32>
    %127 = arith.mulf %126, %126 : vector<32x32xf32>
    %128 = vector.shape_cast %127 : vector<32x32xf32> to vector<1x32x32xf32>
    %cst_139 = arith.constant dense<0.000000e+00> : vector<1xf32>
    %129 = vector.multi_reduction <add>, %128, %cst_139 [1, 2] : vector<1x32x32xf32> to vector<1xf32>
    %130 = vector.shape_cast %129 : vector<1xf32> to vector<1x1x1xf32>
    %131 = vector.extract %130[0, 0, 0] : f32 from vector<1x1x1xf32>
    %132 = vector.broadcast %131 : f32 to vector<1x1xf32>
    %cst_140 = arith.constant 1.024000e+03 : f32
    %133 = vector.broadcast %cst_140 : f32 to vector<1x1xf32>
    %134 = arith.divf %132, %133 : vector<1x1xf32>
    %cst_141 = arith.constant 9.99999974E-6 : f32
    %135 = vector.broadcast %cst_141 : f32 to vector<1x1xf32>
    %136 = arith.addf %134, %135 : vector<1x1xf32>
    %137 = math.rsqrt %136 : vector<1x1xf32>
    %138 = vector.broadcast %137 : vector<1x1xf32> to vector<32x32xf32>
    %139 = arith.mulf %126, %138 : vector<32x32xf32>
    %c0_142 = arith.constant 0 : index
    %c0_143 = arith.constant 0 : index
    %c0_144 = arith.constant 0 : index
    %c0_145 = arith.constant 0 : index
    %140 = vector.load %arg6[%c0_142, %c0_143, %c0_144, %c0_145] : memref<1x8x32x32xf32, #tpu.memory_space<vmem>>, vector<1x1x32x32xf32>
    %141 = vector.shape_cast %140 : vector<1x1x32x32xf32> to vector<32x32xf32>
    %142 = arith.addf %139, %141 : vector<32x32xf32>
    %c0_146 = arith.constant 0 : index
    %c0_147 = arith.constant 0 : index
    %c0_148 = arith.constant 0 : index
    %c0_149 = arith.constant 0 : index
    %143 = vector.load %arg7[%c0_146, %c0_147, %c0_148, %c0_149] : memref<1x8x32x32xf32, #tpu.memory_space<vmem>>, vector<1x1x32x32xf32>
    %144 = vector.shape_cast %143 : vector<1x1x32x32xf32> to vector<32x32xf32>
    %145 = vector.shape_cast %142 : vector<32x32xf32> to vector<1x1x32x32xf32>
    tpu.vector_store %arg7[%c0_146, %c0_147, %c0_148, %c0_149], %145 {strides = array<i32>} : memref<1x8x32x32xf32, #tpu.memory_space<vmem>>, vector<1x1x32x32xf32>,
    %c1_150 = arith.constant 1 : index
    %c0_151 = arith.constant 0 : index
    %c0_152 = arith.constant 0 : index
    %146 = vector.load %arg8[%c1_150, %c0_151, %c0_152] : memref<8x16x32xf32, #tpu.memory_space<vmem>>, vector<1x16x32xf32>
    %147 = vector.shape_cast %146 : vector<1x16x32xf32> to vector<16x32xf32>
    %cst_153 = arith.constant dense<0.000000e+00> : vector<32x32xf32>
    %148 = tpu.matmul %1, %147, %cst_153 {dimension_numbers = #tpu.dot_dimension_numbers<[1], [0], [0], [1], [0, 0, 1, 1], [], []>} : vector<32x16xf32>, vector<16x32xf32>, vector<32x32xf32> -> vector<32x32xf32>
    %149 = vector.shape_cast %148 : vector<32x32xf32> to vector<1x32x32xf32>
    %cst_154 = arith.constant dense<0.000000e+00> : vector<1xf32>
    %150 = vector.multi_reduction <add>, %149, %cst_154 [1, 2] : vector<1x32x32xf32> to vector<1xf32>
    %151 = vector.shape_cast %150 : vector<1xf32> to vector<1x1x1xf32>
    %152 = vector.extract %151[0, 0, 0] : f32 from vector<1x1x1xf32>
    %153 = vector.broadcast %152 : f32 to vector<1x1xf32>
    %cst_155 = arith.constant 1.024000e+03 : f32
    %154 = vector.broadcast %cst_155 : f32 to vector<1x1xf32>
    %155 = arith.divf %153, %154 : vector<1x1xf32>
    %156 = vector.broadcast %155 : vector<1x1xf32> to vector<32x32xf32>
    %157 = arith.subf %148, %156 : vector<32x32xf32>
    %158 = arith.mulf %157, %157 : vector<32x32xf32>
    %159 = vector.shape_cast %158 : vector<32x32xf32> to vector<1x32x32xf32>
    %cst_156 = arith.constant dense<0.000000e+00> : vector<1xf32>
    %160 = vector.multi_reduction <add>, %159, %cst_156 [1, 2] : vector<1x32x32xf32> to vector<1xf32>
    %161 = vector.shape_cast %160 : vector<1xf32> to vector<1x1x1xf32>
    %162 = vector.extract %161[0, 0, 0] : f32 from vector<1x1x1xf32>
    %163 = vector.broadcast %162 : f32 to vector<1x1xf32>
    %cst_157 = arith.constant 1.024000e+03 : f32
    %164 = vector.broadcast %cst_157 : f32 to vector<1x1xf32>
    %165 = arith.divf %163, %164 : vector<1x1xf32>
    %cst_158 = arith.constant 9.99999974E-6 : f32
    %166 = vector.broadcast %cst_158 : f32 to vector<1x1xf32>
    %167 = arith.addf %165, %166 : vector<1x1xf32>
    %168 = math.rsqrt %167 : vector<1x1xf32>
    %169 = vector.broadcast %168 : vector<1x1xf32> to vector<32x32xf32>
    %170 = arith.mulf %157, %169 : vector<32x32xf32>
    %c0_159 = arith.constant 0 : index
    %c1_160 = arith.constant 1 : index
    %c0_161 = arith.constant 0 : index
    %c0_162 = arith.constant 0 : index
    %171 = vector.load %arg6[%c0_159, %c1_160, %c0_161, %c0_162] : memref<1x8x32x32xf32, #tpu.memory_space<vmem>>, vector<1x1x32x32xf32>
    %172 = vector.shape_cast %171 : vector<1x1x32x32xf32> to vector<32x32xf32>
    %173 = arith.addf %170, %172 : vector<32x32xf32>
    %c0_163 = arith.constant 0 : index
    %c1_164 = arith.constant 1 : index
    %c0_165 = arith.constant 0 : index
    %c0_166 = arith.constant 0 : index
    %174 = vector.load %arg7[%c0_163, %c1_164, %c0_165, %c0_166] : memref<1x8x32x32xf32, #tpu.memory_space<vmem>>, vector<1x1x32x32xf32>
    %175 = vector.shape_cast %174 : vector<1x1x32x32xf32> to vector<32x32xf32>
    %176 = vector.shape_cast %173 : vector<32x32xf32> to vector<1x1x32x32xf32>
    tpu.vector_store %arg7[%c0_163, %c1_164, %c0_165, %c0_166], %176 {strides = array<i32>} : memref<1x8x32x32xf32, #tpu.memory_space<vmem>>, vector<1x1x32x32xf32>,
    %c2_167 = arith.constant 2 : index
    %c0_168 = arith.constant 0 : index
    %c0_169 = arith.constant 0 : index
    %177 = vector.load %arg8[%c2_167, %c0_168, %c0_169] : memref<8x16x32xf32, #tpu.memory_space<vmem>>, vector<1x16x32xf32>
    %178 = vector.shape_cast %177 : vector<1x16x32xf32> to vector<16x32xf32>
    %cst_170 = arith.constant dense<0.000000e+00> : vector<32x32xf32>
    %179 = tpu.matmul %1, %178, %cst_170 {dimension_numbers = #tpu.dot_dimension_numbers<[1], [0], [0], [1], [0, 0, 1, 1], [], []>} : vector<32x16xf32>, vector<16x32xf32>, vector<32x32xf32> -> vector<32x32xf32>
    %180 = vector.shape_cast %179 : vector<32x32xf32> to vector<1x32x32xf32>
    %cst_171 = arith.constant dense<0.000000e+00> : vector<1xf32>
    %181 = vector.multi_reduction <add>, %180, %cst_171 [1, 2] : vector<1x32x32xf32> to vector<1xf32>
    %182 = vector.shape_cast %181 : vector<1xf32> to vector<1x1x1xf32>
    %183 = vector.extract %182[0, 0, 0] : f32 from vector<1x1x1xf32>
    %184 = vector.broadcast %183 : f32 to vector<1x1xf32>
    %cst_172 = arith.constant 1.024000e+03 : f32
    %185 = vector.broadcast %cst_172 : f32 to vector<1x1xf32>
    %186 = arith.divf %184, %185 : vector<1x1xf32>
    %187 = vector.broadcast %186 : vector<1x1xf32> to vector<32x32xf32>
    %188 = arith.subf %179, %187 : vector<32x32xf32>
    %189 = arith.mulf %188, %188 : vector<32x32xf32>
    %190 = vector.shape_cast %189 : vector<32x32xf32> to vector<1x32x32xf32>
    %cst_173 = arith.constant dense<0.000000e+00> : vector<1xf32>
    %191 = vector.multi_reduction <add>, %190, %cst_173 [1, 2] : vector<1x32x32xf32> to vector<1xf32>
    %192 = vector.shape_cast %191 : vector<1xf32> to vector<1x1x1xf32>
    %193 = vector.extract %192[0, 0, 0] : f32 from vector<1x1x1xf32>
    %194 = vector.broadcast %193 : f32 to vector<1x1xf32>
    %cst_174 = arith.constant 1.024000e+03 : f32
    %195 = vector.broadcast %cst_174 : f32 to vector<1x1xf32>
    %196 = arith.divf %194, %195 : vector<1x1xf32>
    %cst_175 = arith.constant 9.99999974E-6 : f32
    %197 = vector.broadcast %cst_175 : f32 to vector<1x1xf32>
    %198 = arith.addf %196, %197 : vector<1x1xf32>
    %199 = math.rsqrt %198 : vector<1x1xf32>
    %200 = vector.broadcast %199 : vector<1x1xf32> to vector<32x32xf32>
    %201 = arith.mulf %188, %200 : vector<32x32xf32>
    %c0_176 = arith.constant 0 : index
    %c2_177 = arith.constant 2 : index
    %c0_178 = arith.constant 0 : index
    %c0_179 = arith.constant 0 : index
    %202 = vector.load %arg6[%c0_176, %c2_177, %c0_178, %c0_179] : memref<1x8x32x32xf32, #tpu.memory_space<vmem>>, vector<1x1x32x32xf32>
    %203 = vector.shape_cast %202 : vector<1x1x32x32xf32> to vector<32x32xf32>
    %204 = arith.addf %201, %203 : vector<32x32xf32>
    %c0_180 = arith.constant 0 : index
    %c2_181 = arith.constant 2 : index
    %c0_182 = arith.constant 0 : index
    %c0_183 = arith.constant 0 : index
    %205 = vector.load %arg7[%c0_180, %c2_181, %c0_182, %c0_183] : memref<1x8x32x32xf32, #tpu.memory_space<vmem>>, vector<1x1x32x32xf32>
    %206 = vector.shape_cast %205 : vector<1x1x32x32xf32> to vector<32x32xf32>
    %207 = vector.shape_cast %204 : vector<32x32xf32> to vector<1x1x32x32xf32>
    tpu.vector_store %arg7[%c0_180, %c2_181, %c0_182, %c0_183], %207 {strides = array<i32>} : memref<1x8x32x32xf32, #tpu.memory_space<vmem>>, vector<1x1x32x32xf32>,
    %c3_184 = arith.constant 3 : index
    %c0_185 = arith.constant 0 : index
    %c0_186 = arith.constant 0 : index
    %208 = vector.load %arg8[%c3_184, %c0_185, %c0_186] : memref<8x16x32xf32, #tpu.memory_space<vmem>>, vector<1x16x32xf32>
    %209 = vector.shape_cast %208 : vector<1x16x32xf32> to vector<16x32xf32>
    %cst_187 = arith.constant dense<0.000000e+00> : vector<32x32xf32>
    %210 = tpu.matmul %1, %209, %cst_187 {dimension_numbers = #tpu.dot_dimension_numbers<[1], [0], [0], [1], [0, 0, 1, 1], [], []>} : vector<32x16xf32>, vector<16x32xf32>, vector<32x32xf32> -> vector<32x32xf32>
    %211 = vector.shape_cast %210 : vector<32x32xf32> to vector<1x32x32xf32>
    %cst_188 = arith.constant dense<0.000000e+00> : vector<1xf32>
    %212 = vector.multi_reduction <add>, %211, %cst_188 [1, 2] : vector<1x32x32xf32> to vector<1xf32>
    %213 = vector.shape_cast %212 : vector<1xf32> to vector<1x1x1xf32>
    %214 = vector.extract %213[0, 0, 0] : f32 from vector<1x1x1xf32>
    %215 = vector.broadcast %214 : f32 to vector<1x1xf32>
    %cst_189 = arith.constant 1.024000e+03 : f32
    %216 = vector.broadcast %cst_189 : f32 to vector<1x1xf32>
    %217 = arith.divf %215, %216 : vector<1x1xf32>
    %218 = vector.broadcast %217 : vector<1x1xf32> to vector<32x32xf32>
    %219 = arith.subf %210, %218 : vector<32x32xf32>
    %220 = arith.mulf %219, %219 : vector<32x32xf32>
    %221 = vector.shape_cast %220 : vector<32x32xf32> to vector<1x32x32xf32>
    %cst_190 = arith.constant dense<0.000000e+00> : vector<1xf32>
    %222 = vector.multi_reduction <add>, %221, %cst_190 [1, 2] : vector<1x32x32xf32> to vector<1xf32>
    %223 = vector.shape_cast %222 : vector<1xf32> to vector<1x1x1xf32>
    %224 = vector.extract %223[0, 0, 0] : f32 from vector<1x1x1xf32>
    %225 = vector.broadcast %224 : f32 to vector<1x1xf32>
    %cst_191 = arith.constant 1.024000e+03 : f32
    %226 = vector.broadcast %cst_191 : f32 to vector<1x1xf32>
    %227 = arith.divf %225, %226 : vector<1x1xf32>
    %cst_192 = arith.constant 9.99999974E-6 : f32
    %228 = vector.broadcast %cst_192 : f32 to vector<1x1xf32>
    %229 = arith.addf %227, %228 : vector<1x1xf32>
    %230 = math.rsqrt %229 : vector<1x1xf32>
    %231 = vector.broadcast %230 : vector<1x1xf32> to vector<32x32xf32>
    %232 = arith.mulf %219, %231 : vector<32x32xf32>
    %c0_193 = arith.constant 0 : index
    %c3_194 = arith.constant 3 : index
    %c0_195 = arith.constant 0 : index
    %c0_196 = arith.constant 0 : index
    %233 = vector.load %arg6[%c0_193, %c3_194, %c0_195, %c0_196] : memref<1x8x32x32xf32, #tpu.memory_space<vmem>>, vector<1x1x32x32xf32>
    %234 = vector.shape_cast %233 : vector<1x1x32x32xf32> to vector<32x32xf32>
    %235 = arith.addf %232, %234 : vector<32x32xf32>
    %c0_197 = arith.constant 0 : index
    %c3_198 = arith.constant 3 : index
    %c0_199 = arith.constant 0 : index
    %c0_200 = arith.constant 0 : index
    %236 = vector.load %arg7[%c0_197, %c3_198, %c0_199, %c0_200] : memref<1x8x32x32xf32, #tpu.memory_space<vmem>>, vector<1x1x32x32xf32>
    %237 = vector.shape_cast %236 : vector<1x1x32x32xf32> to vector<32x32xf32>
    %238 = vector.shape_cast %235 : vector<32x32xf32> to vector<1x1x32x32xf32>
    tpu.vector_store %arg7[%c0_197, %c3_198, %c0_199, %c0_200], %238 {strides = array<i32>} : memref<1x8x32x32xf32, #tpu.memory_space<vmem>>, vector<1x1x32x32xf32>,
    %c4_201 = arith.constant 4 : index
    %c0_202 = arith.constant 0 : index
    %c0_203 = arith.constant 0 : index
    %239 = vector.load %arg8[%c4_201, %c0_202, %c0_203] : memref<8x16x32xf32, #tpu.memory_space<vmem>>, vector<1x16x32xf32>
    %240 = vector.shape_cast %239 : vector<1x16x32xf32> to vector<16x32xf32>
    %cst_204 = arith.constant dense<0.000000e+00> : vector<32x32xf32>
    %241 = tpu.matmul %1, %240, %cst_204 {dimension_numbers = #tpu.dot_dimension_numbers<[1], [0], [0], [1], [0, 0, 1, 1], [], []>} : vector<32x16xf32>, vector<16x32xf32>, vector<32x32xf32> -> vector<32x32xf32>
    %242 = vector.shape_cast %241 : vector<32x32xf32> to vector<1x32x32xf32>
    %cst_205 = arith.constant dense<0.000000e+00> : vector<1xf32>
    %243 = vector.multi_reduction <add>, %242, %cst_205 [1, 2] : vector<1x32x32xf32> to vector<1xf32>
    %244 = vector.shape_cast %243 : vector<1xf32> to vector<1x1x1xf32>
    %245 = vector.extract %244[0, 0, 0] : f32 from vector<1x1x1xf32>
    %246 = vector.broadcast %245 : f32 to vector<1x1xf32>
    %cst_206 = arith.constant 1.024000e+03 : f32
    %247 = vector.broadcast %cst_206 : f32 to vector<1x1xf32>
    %248 = arith.divf %246, %247 : vector<1x1xf32>
    %249 = vector.broadcast %248 : vector<1x1xf32> to vector<32x32xf32>
    %250 = arith.subf %241, %249 : vector<32x32xf32>
    %251 = arith.mulf %250, %250 : vector<32x32xf32>
    %252 = vector.shape_cast %251 : vector<32x32xf32> to vector<1x32x32xf32>
    %cst_207 = arith.constant dense<0.000000e+00> : vector<1xf32>
    %253 = vector.multi_reduction <add>, %252, %cst_207 [1, 2] : vector<1x32x32xf32> to vector<1xf32>
    %254 = vector.shape_cast %253 : vector<1xf32> to vector<1x1x1xf32>
    %255 = vector.extract %254[0, 0, 0] : f32 from vector<1x1x1xf32>
    %256 = vector.broadcast %255 : f32 to vector<1x1xf32>
    %cst_208 = arith.constant 1.024000e+03 : f32
    %257 = vector.broadcast %cst_208 : f32 to vector<1x1xf32>
    %258 = arith.divf %256, %257 : vector<1x1xf32>
    %cst_209 = arith.constant 9.99999974E-6 : f32
    %259 = vector.broadcast %cst_209 : f32 to vector<1x1xf32>
    %260 = arith.addf %258, %259 : vector<1x1xf32>
    %261 = math.rsqrt %260 : vector<1x1xf32>
    %262 = vector.broadcast %261 : vector<1x1xf32> to vector<32x32xf32>
    %263 = arith.mulf %250, %262 : vector<32x32xf32>
    %c0_210 = arith.constant 0 : index
    %c4_211 = arith.constant 4 : index
    %c0_212 = arith.constant 0 : index
    %c0_213 = arith.constant 0 : index
    %264 = vector.load %arg6[%c0_210, %c4_211, %c0_212, %c0_213] : memref<1x8x32x32xf32, #tpu.memory_space<vmem>>, vector<1x1x32x32xf32>
    %265 = vector.shape_cast %264 : vector<1x1x32x32xf32> to vector<32x32xf32>
    %266 = arith.addf %263, %265 : vector<32x32xf32>
    %c0_214 = arith.constant 0 : index
    %c4_215 = arith.constant 4 : index
    %c0_216 = arith.constant 0 : index
    %c0_217 = arith.constant 0 : index
    %267 = vector.load %arg7[%c0_214, %c4_215, %c0_216, %c0_217] : memref<1x8x32x32xf32, #tpu.memory_space<vmem>>, vector<1x1x32x32xf32>
    %268 = vector.shape_cast %267 : vector<1x1x32x32xf32> to vector<32x32xf32>
    %269 = vector.shape_cast %266 : vector<32x32xf32> to vector<1x1x32x32xf32>
    tpu.vector_store %arg7[%c0_214, %c4_215, %c0_216, %c0_217], %269 {strides = array<i32>} : memref<1x8x32x32xf32, #tpu.memory_space<vmem>>, vector<1x1x32x32xf32>,
    %c5_218 = arith.constant 5 : index
    %c0_219 = arith.constant 0 : index
    %c0_220 = arith.constant 0 : index
    %270 = vector.load %arg8[%c5_218, %c0_219, %c0_220] : memref<8x16x32xf32, #tpu.memory_space<vmem>>, vector<1x16x32xf32>
    %271 = vector.shape_cast %270 : vector<1x16x32xf32> to vector<16x32xf32>
    %cst_221 = arith.constant dense<0.000000e+00> : vector<32x32xf32>
    %272 = tpu.matmul %1, %271, %cst_221 {dimension_numbers = #tpu.dot_dimension_numbers<[1], [0], [0], [1], [0, 0, 1, 1], [], []>} : vector<32x16xf32>, vector<16x32xf32>, vector<32x32xf32> -> vector<32x32xf32>
    %273 = vector.shape_cast %272 : vector<32x32xf32> to vector<1x32x32xf32>
    %cst_222 = arith.constant dense<0.000000e+00> : vector<1xf32>
    %274 = vector.multi_reduction <add>, %273, %cst_222 [1, 2] : vector<1x32x32xf32> to vector<1xf32>
    %275 = vector.shape_cast %274 : vector<1xf32> to vector<1x1x1xf32>
    %276 = vector.extract %275[0, 0, 0] : f32 from vector<1x1x1xf32>
    %277 = vector.broadcast %276 : f32 to vector<1x1xf32>
    %cst_223 = arith.constant 1.024000e+03 : f32
    %278 = vector.broadcast %cst_223 : f32 to vector<1x1xf32>
    %279 = arith.divf %277, %278 : vector<1x1xf32>
    %280 = vector.broadcast %279 : vector<1x1xf32> to vector<32x32xf32>
    %281 = arith.subf %272, %280 : vector<32x32xf32>
    %282 = arith.mulf %281, %281 : vector<32x32xf32>
    %283 = vector.shape_cast %282 : vector<32x32xf32> to vector<1x32x32xf32>
    %cst_224 = arith.constant dense<0.000000e+00> : vector<1xf32>
    %284 = vector.multi_reduction <add>, %283, %cst_224 [1, 2] : vector<1x32x32xf32> to vector<1xf32>
    %285 = vector.shape_cast %284 : vector<1xf32> to vector<1x1x1xf32>
    %286 = vector.extract %285[0, 0, 0] : f32 from vector<1x1x1xf32>
    %287 = vector.broadcast %286 : f32 to vector<1x1xf32>
    %cst_225 = arith.constant 1.024000e+03 : f32
    %288 = vector.broadcast %cst_225 : f32 to vector<1x1xf32>
    %289 = arith.divf %287, %288 : vector<1x1xf32>
    %cst_226 = arith.constant 9.99999974E-6 : f32
    %290 = vector.broadcast %cst_226 : f32 to vector<1x1xf32>
    %291 = arith.addf %289, %290 : vector<1x1xf32>
    %292 = math.rsqrt %291 : vector<1x1xf32>
    %293 = vector.broadcast %292 : vector<1x1xf32> to vector<32x32xf32>
    %294 = arith.mulf %281, %293 : vector<32x32xf32>
    %c0_227 = arith.constant 0 : index
    %c5_228 = arith.constant 5 : index
    %c0_229 = arith.constant 0 : index
    %c0_230 = arith.constant 0 : index
    %295 = vector.load %arg6[%c0_227, %c5_228, %c0_229, %c0_230] : memref<1x8x32x32xf32, #tpu.memory_space<vmem>>, vector<1x1x32x32xf32>
    %296 = vector.shape_cast %295 : vector<1x1x32x32xf32> to vector<32x32xf32>
    %297 = arith.addf %294, %296 : vector<32x32xf32>
    %c0_231 = arith.constant 0 : index
    %c5_232 = arith.constant 5 : index
    %c0_233 = arith.constant 0 : index
    %c0_234 = arith.constant 0 : index
    %298 = vector.load %arg7[%c0_231, %c5_232, %c0_233, %c0_234] : memref<1x8x32x32xf32, #tpu.memory_space<vmem>>, vector<1x1x32x32xf32>
    %299 = vector.shape_cast %298 : vector<1x1x32x32xf32> to vector<32x32xf32>
    %300 = vector.shape_cast %297 : vector<32x32xf32> to vector<1x1x32x32xf32>
    tpu.vector_store %arg7[%c0_231, %c5_232, %c0_233, %c0_234], %300 {strides = array<i32>} : memref<1x8x32x32xf32, #tpu.memory_space<vmem>>, vector<1x1x32x32xf32>,
    %c6_235 = arith.constant 6 : index
    %c0_236 = arith.constant 0 : index
    %c0_237 = arith.constant 0 : index
    %301 = vector.load %arg8[%c6_235, %c0_236, %c0_237] : memref<8x16x32xf32, #tpu.memory_space<vmem>>, vector<1x16x32xf32>
    %302 = vector.shape_cast %301 : vector<1x16x32xf32> to vector<16x32xf32>
    %cst_238 = arith.constant dense<0.000000e+00> : vector<32x32xf32>
    %303 = tpu.matmul %1, %302, %cst_238 {dimension_numbers = #tpu.dot_dimension_numbers<[1], [0], [0], [1], [0, 0, 1, 1], [], []>} : vector<32x16xf32>, vector<16x32xf32>, vector<32x32xf32> -> vector<32x32xf32>
    %304 = vector.shape_cast %303 : vector<32x32xf32> to vector<1x32x32xf32>
    %cst_239 = arith.constant dense<0.000000e+00> : vector<1xf32>
    %305 = vector.multi_reduction <add>, %304, %cst_239 [1, 2] : vector<1x32x32xf32> to vector<1xf32>
    %306 = vector.shape_cast %305 : vector<1xf32> to vector<1x1x1xf32>
    %307 = vector.extract %306[0, 0, 0] : f32 from vector<1x1x1xf32>
    %308 = vector.broadcast %307 : f32 to vector<1x1xf32>
    %cst_240 = arith.constant 1.024000e+03 : f32
    %309 = vector.broadcast %cst_240 : f32 to vector<1x1xf32>
    %310 = arith.divf %308, %309 : vector<1x1xf32>
    %311 = vector.broadcast %310 : vector<1x1xf32> to vector<32x32xf32>
    %312 = arith.subf %303, %311 : vector<32x32xf32>
    %313 = arith.mulf %312, %312 : vector<32x32xf32>
    %314 = vector.shape_cast %313 : vector<32x32xf32> to vector<1x32x32xf32>
    %cst_241 = arith.constant dense<0.000000e+00> : vector<1xf32>
    %315 = vector.multi_reduction <add>, %314, %cst_241 [1, 2] : vector<1x32x32xf32> to vector<1xf32>
    %316 = vector.shape_cast %315 : vector<1xf32> to vector<1x1x1xf32>
    %317 = vector.extract %316[0, 0, 0] : f32 from vector<1x1x1xf32>
    %318 = vector.broadcast %317 : f32 to vector<1x1xf32>
    %cst_242 = arith.constant 1.024000e+03 : f32
    %319 = vector.broadcast %cst_242 : f32 to vector<1x1xf32>
    %320 = arith.divf %318, %319 : vector<1x1xf32>
    %cst_243 = arith.constant 9.99999974E-6 : f32
    %321 = vector.broadcast %cst_243 : f32 to vector<1x1xf32>
    %322 = arith.addf %320, %321 : vector<1x1xf32>
    %323 = math.rsqrt %322 : vector<1x1xf32>
    %324 = vector.broadcast %323 : vector<1x1xf32> to vector<32x32xf32>
    %325 = arith.mulf %312, %324 : vector<32x32xf32>
    %c0_244 = arith.constant 0 : index
    %c6_245 = arith.constant 6 : index
    %c0_246 = arith.constant 0 : index
    %c0_247 = arith.constant 0 : index
    %326 = vector.load %arg6[%c0_244, %c6_245, %c0_246, %c0_247] : memref<1x8x32x32xf32, #tpu.memory_space<vmem>>, vector<1x1x32x32xf32>
    %327 = vector.shape_cast %326 : vector<1x1x32x32xf32> to vector<32x32xf32>
    %328 = arith.addf %325, %327 : vector<32x32xf32>
    %c0_248 = arith.constant 0 : index
    %c6_249 = arith.constant 6 : index
    %c0_250 = arith.constant 0 : index
    %c0_251 = arith.constant 0 : index
    %329 = vector.load %arg7[%c0_248, %c6_249, %c0_250, %c0_251] : memref<1x8x32x32xf32, #tpu.memory_space<vmem>>, vector<1x1x32x32xf32>
    %330 = vector.shape_cast %329 : vector<1x1x32x32xf32> to vector<32x32xf32>
    %331 = vector.shape_cast %328 : vector<32x32xf32> to vector<1x1x32x32xf32>
    tpu.vector_store %arg7[%c0_248, %c6_249, %c0_250, %c0_251], %331 {strides = array<i32>} : memref<1x8x32x32xf32, #tpu.memory_space<vmem>>, vector<1x1x32x32xf32>,
    %c7_252 = arith.constant 7 : index
    %c0_253 = arith.constant 0 : index
    %c0_254 = arith.constant 0 : index
    %332 = vector.load %arg8[%c7_252, %c0_253, %c0_254] : memref<8x16x32xf32, #tpu.memory_space<vmem>>, vector<1x16x32xf32>
    %333 = vector.shape_cast %332 : vector<1x16x32xf32> to vector<16x32xf32>
    %cst_255 = arith.constant dense<0.000000e+00> : vector<32x32xf32>
    %334 = tpu.matmul %1, %333, %cst_255 {dimension_numbers = #tpu.dot_dimension_numbers<[1], [0], [0], [1], [0, 0, 1, 1], [], []>} : vector<32x16xf32>, vector<16x32xf32>, vector<32x32xf32> -> vector<32x32xf32>
    %335 = vector.shape_cast %334 : vector<32x32xf32> to vector<1x32x32xf32>
    %cst_256 = arith.constant dense<0.000000e+00> : vector<1xf32>
    %336 = vector.multi_reduction <add>, %335, %cst_256 [1, 2] : vector<1x32x32xf32> to vector<1xf32>
    %337 = vector.shape_cast %336 : vector<1xf32> to vector<1x1x1xf32>
    %338 = vector.extract %337[0, 0, 0] : f32 from vector<1x1x1xf32>
    %339 = vector.broadcast %338 : f32 to vector<1x1xf32>
    %cst_257 = arith.constant 1.024000e+03 : f32
    %340 = vector.broadcast %cst_257 : f32 to vector<1x1xf32>
    %341 = arith.divf %339, %340 : vector<1x1xf32>
    %342 = vector.broadcast %341 : vector<1x1xf32> to vector<32x32xf32>
    %343 = arith.subf %334, %342 : vector<32x32xf32>
    %344 = arith.mulf %343, %343 : vector<32x32xf32>
    %345 = vector.shape_cast %344 : vector<32x32xf32> to vector<1x32x32xf32>
    %cst_258 = arith.constant dense<0.000000e+00> : vector<1xf32>
    %346 = vector.multi_reduction <add>, %345, %cst_258 [1, 2] : vector<1x32x32xf32> to vector<1xf32>
    %347 = vector.shape_cast %346 : vector<1xf32> to vector<1x1x1xf32>
    %348 = vector.extract %347[0, 0, 0] : f32 from vector<1x1x1xf32>
    %349 = vector.broadcast %348 : f32 to vector<1x1xf32>
    %cst_259 = arith.constant 1.024000e+03 : f32
    %350 = vector.broadcast %cst_259 : f32 to vector<1x1xf32>
    %351 = arith.divf %349, %350 : vector<1x1xf32>
    %cst_260 = arith.constant 9.99999974E-6 : f32
    %352 = vector.broadcast %cst_260 : f32 to vector<1x1xf32>
    %353 = arith.addf %351, %352 : vector<1x1xf32>
    %354 = math.rsqrt %353 : vector<1x1xf32>
    %355 = vector.broadcast %354 : vector<1x1xf32> to vector<32x32xf32>
    %356 = arith.mulf %343, %355 : vector<32x32xf32>
    %c0_261 = arith.constant 0 : index
    %c7_262 = arith.constant 7 : index
    %c0_263 = arith.constant 0 : index
    %c0_264 = arith.constant 0 : index
    %357 = vector.load %arg6[%c0_261, %c7_262, %c0_263, %c0_264] : memref<1x8x32x32xf32, #tpu.memory_space<vmem>>, vector<1x1x32x32xf32>
    %358 = vector.shape_cast %357 : vector<1x1x32x32xf32> to vector<32x32xf32>
    %359 = arith.addf %356, %358 : vector<32x32xf32>
    %c0_265 = arith.constant 0 : index
    %c7_266 = arith.constant 7 : index
    %c0_267 = arith.constant 0 : index
    %c0_268 = arith.constant 0 : index
    %360 = vector.load %arg7[%c0_265, %c7_266, %c0_267, %c0_268] : memref<1x8x32x32xf32, #tpu.memory_space<vmem>>, vector<1x1x32x32xf32>
    %361 = vector.shape_cast %360 : vector<1x1x32x32xf32> to vector<32x32xf32>
    %362 = vector.shape_cast %359 : vector<32x32xf32> to vector<1x1x32x32xf32>
    tpu.vector_store %arg7[%c0_265, %c7_266, %c0_267, %c0_268], %362 {strides = array<i32>} : memref<1x8x32x32xf32, #tpu.memory_space<vmem>>, vector<1x1x32x32xf32>,
    return
  }
  func.func @transform_0(%arg0: i32, %arg1: i32) -> (i32, i32, i32, i32) {
    %c0_i32 = arith.constant 0 : i32
    %c0_i32_0 = arith.constant 0 : i32
    %c0_i32_1 = arith.constant 0 : i32
    %c0_i32_2 = arith.constant 0 : i32
    return %arg0, %c0_i32, %c0_i32_0, %c0_i32_1 : i32, i32, i32, i32
  }
  func.func @transform_1(%arg0: i32, %arg1: i32) -> (i32, i32) {
    %c0_i32 = arith.constant 0 : i32
    %c0_i32_0 = arith.constant 0 : i32
    return %arg1, %c0_i32 : i32, i32
  }
  func.func @transform_2(%arg0: i32, %arg1: i32) -> (i32, i32) {
    %c0_i32 = arith.constant 0 : i32
    %c0_i32_0 = arith.constant 0 : i32
    %c0_i32_1 = arith.constant 0 : i32
    return %c0_i32, %c0_i32_0 : i32, i32
  }
  func.func @transform_3(%arg0: i32, %arg1: i32) -> (i32, i32) {
    %c0_i32 = arith.constant 0 : i32
    %c0_i32_0 = arith.constant 0 : i32
    %c0_i32_1 = arith.constant 0 : i32
    return %c0_i32, %c0_i32_0 : i32, i32
  }
  func.func @transform_4(%arg0: i32, %arg1: i32) -> (i32, i32, i32, i32) {
    %c0_i32 = arith.constant 0 : i32
    %c0_i32_0 = arith.constant 0 : i32
    %c0_i32_1 = arith.constant 0 : i32
    return %arg0, %arg1, %c0_i32, %c0_i32_0 : i32, i32, i32, i32
  }
  func.func @transform_5(%arg0: i32, %arg1: i32) -> (i32, i32, i32, i32) {
    %c0_i32 = arith.constant 0 : i32
    %c0_i32_0 = arith.constant 0 : i32
    %c0_i32_1 = arith.constant 0 : i32
    return %arg0, %arg1, %c0_i32, %c0_i32_0 : i32, i32, i32, i32
  }
}

</mosaic_0001>

<bundles_post_ra>
// kernel: upsampling_add.1
= control target key start
LH: loop header
LB: loop body
LE: loop exit
PB: predicated region body
PF: predicated region fallthrough
CT: control target
= control target key end

     0   :  { %s8675_s0 = inlined_call_operand.hbm [shape: f32[2,16,16,16], index: 0, kind: input, shape index: {}]   ;;  %s8676_s1 = inlined_call_operand.vmem [shape: f32[8,16], index: 1, kind: input, shape index: {}]   ;;  %s8677_s2 = inlined_call_operand.vmem [shape: f32[32,16], index: 2, kind: input, shape index: {}]   ;;  %s8678_s3 = inlined_call_operand.vmem [shape: f32[16,32], index: 3, kind: input, shape index: {}]   ;;  %s8679_s4 = inlined_call_operand.hbm [shape: f32[2,8,32,32], index: 4, kind: input, shape index: {}]   ;;  %s8680_s5 = inlined_call_operand.hbm [shape: f32[2,8,32,32], index: 5, kind: output, shape index: {}]  }
   0x1   :  { %8684 = sst [smem:[#allocation12_spill]] %s8675_s0 }
   0x2   :  { %10 = vsyncpa [#allocation4], 0 }
   0x3   :  { %12 = vsyncpa [#allocation4 + $0x1], 0 }
   0x4   :  { %13 = vsyncpa [#allocation7], 0 }
   0x5   :  { %15 = vsyncpa [#allocation7 + $0x1], 0 }
   0x6   :  { %16 = vsyncpa [#allocation5], 0 }
   0x7   :  { %18 = vsyncpa [#allocation5 + $0x1], 0  ;;  %s7077_s18 = smov 0   ;;  %s7079_s19 = smov 0  }
   0x8   :  { %s7081_s20 = smov 0   ;;  %s7083_s21 = smov 0  }
   0x9   :  { %s7085_s22 = smov 0   ;;  %s7087_s23 = smov 0  }
   0xa LB: > { %s6045_s24 = sadd.s32 4294967295, %s7034_s23   ;;  %s6046_s25 = sadd.s32 4294967294, %s7034_s23   ;;  %s7034_s23 = sphi %s7087_s23, %s24_s23   ;;  %s7030_s22 = sphi %s7085_s22, %s8702_s22   ;;  %s7026_s21 = sphi %s7083_s21, %s8701_s21   ;;  %s7022_s20 = sphi %s7081_s20, %s8700_s20   ;;  %s7018_s19 = sphi %s7079_s19, %s8699_s19   ;;  %s7014_s18 = sphi %s7077_s18, %s8698_s18  }
   0xb   : > { %s36_s26 = sadd.s32 1, %s7030_s22  ;;  %s43_s27 = sadd.s32 1, %s7022_s20 }
   0xc   : > { %p38_p0 = scmp.ge.s32.totalorder %s36_s26, 2  ;;  %p50_p1 = scmp.ne.s32.totalorder %s7022_s20, %s7018_s19 }
   0xd   : > { %p51_p2 = scmp.eq.s32.totalorder %s7034_s23, 0  ;;  %p56_p3 = scmp.ne.s32.totalorder %s7018_s19, %s7014_s18 }
   0xe   : > { %s8704_s26 = smov (%p38_p0, %s36_s26), 0  ;;  %p57_p5 = scmp.eq.s32.totalorder %s6045_s24, 0 }
   0xf   : > { %p7118_p4 = por %p51_p2, %p50_p1  ;;  %s40_s29 = ssub.s32 %s7030_s22, %s8704_s26 }
  0x10   : > { %p178_p6 = scmp.eq.s32.totalorder %s6045_s24, 1  ;;  %p41_p7 = scmp.eq.s32.totalorder %s40_s29, 0 }
  0x11   : > { %p7124_p8 = por %p57_p5, %p56_p3  ;;  %p184_p10 = scmp.eq.s32.totalorder %s6046_s25, 1 }
  0x12   : > { %p7128_p9 = por %p178_p6, %p50_p1  ;;  %p6813_p13 = scmp.lt.s32.totalorder %s7034_s23, 2 }
  0x13   : > { %s8686_s30 = scalar_select %p7124_p8, 1, 0 }
  0x14   : > { %s8687_s6 = scalar_select %p7128_p9, 1, 0 }
  0x15   : > { %s7133_s7 = scalar_select %p41_p7, %s7022_s20, %s43_s27  }
  0x16   : > { %p7135_p11 = por %p184_p10, %p56_p3  ;;  %s7142_s9 = sand.u32 1, %s7022_s20  }
  0x17   : > { %s6050_s10 = sshll.u32 %s7142_s9, 8  ;;  %s6185_s11 = sshll.u32 %s7030_s22, 12 }
  0x18   : > { %s8688_s8 = scalar_select %p7135_p11, 1, 0 }
  0x19   : > { %s8689_s0 = sld [smem:[#allocation12_spill]]  ;;  %s221_s15 = scalar_lea.vmem [#allocation3], %s6050_s10 }
  0x1a   : > { %s228_s16 = sshll.u32 %s221_s15, 4  ;;  %p7159_p0 = pnand %p6813_p13, %p7118_p4  ;;  %s7155_s16 = int_to_ptr.vmem [resolvable:$true] %s228_s16 }
  0x1b   : > { %s218_s24 = scalar_lea.sflag [#allocation4], %s7142_s9 }
  0x1c   : > { %p6890_p3 = pneg %p7159_p0 }
  0x1f   : > { %s7151_s14 = scalar_lea.hbm %s8689_s0, %s6185_s11  ;;  %s6893_s28 = scalar_lea.hbm %s8689_s0, 8192 }
  0x20   : > { %s6888_s25 = scalar_lea.hbm %s7151_s14, 4096  ;;  %p6894_p4 = scmp.lt.u32.totalorder %s7151_s14, %s8689_s0 }
  0x21   : > { %p6889_p2 = scmp.ne.s32.totalorder %s7151_s14, %s6888_s25  ;;  %p6895_p7 = scmp.lt.u32.totalorder %s6893_s28, %s6888_s25 }
  0x22   : > { %p6897_p13 = scmp.lt.u32.totalorder %s6888_s25, %s7151_s14 }
  0x23   : > { %p6891_p5 = pnand %p6890_p3, %p6889_p2  ;;  %p6896_p10 = por %p6895_p7, %p6894_p4 }
  0x25   : > { %p6892_p6 = pneg %p6891_p5  ;;  %p6898_p12 = por %p6897_p13, %p6896_p10 }
  0x27   : > { %p6899_p1 = pnand %p6898_p12, %p6892_p6 }
  0x29   : > { %6902 = shalt.err (!%p6899_p1)
}
  0x2a   : > { %s6903_s15 = scalar_lea.vmem %s7155_s16, 4096  ;;  %s7036_s27 = smov [#allocation3]  }
  0x2b   : > { %p6904_p2 = scmp.ne.s32.totalorder %s7155_s16, %s6903_s15  ;;  %s6908_s29 = sshll.u32 %s7036_s27, 4  ;;  %s6909_s29 = int_to_ptr.vmem [resolvable:$false] %s6908_s29 }
  0x2c   : > { %s6910_s12 = scalar_lea.vmem %s6909_s29, 8192  ;;  %p6911_p9 = scmp.lt.s32.totalorder %s7155_s16, %s6909_s29 }
  0x2d   : > { %p6906_p5 = pnand %p6904_p2, %p6890_p3  ;;  %p6912_p4 = scmp.lt.s32.totalorder %s6910_s12, %s6903_s15 }
  0x2f   : > { %p6907_p11 = pneg %p6906_p5  ;;  %p6913_p7 = por %p6912_p4, %p6911_p9 }
  0x31   : > { %p6914_p10 = pnand %p6913_p7, %p6907_p11 }
  0x33   : > { %6917 = shalt.err (!%p6914_p10)
}
  0x34   : > { %s8682_s25 = smov 128   ;;  %s7038_s28 = smov 8  }
  0x35   : > { %6805 = dma.hbm_to_vmem [thread:$0]  (!%p7159_p0), %s7151_s14, 4096, %s7155_s16, %s218_s24, %s8682_s25, %s8682_s25, %s7038_s28  }
  0x36   : > { %p260_p9 = scmp.lt.s32.totalorder %s7034_s23, 3  ;;  %s7201_s27 = scalar_lea.hbm %s8679_s4, %s6185_s11 }
  0x37   : > { %p8691_p11 = scmp.ge.s32.totalorder %s7034_s23, 1  ;;  %s242_s12 = scalar_lea.vmem [#allocation6], %s6050_s10 }
  0x38   : > { %s252_s0 = sshll.u32 %s242_s12, 4  ;;  %s239_s14 = scalar_lea.sflag [#allocation7], %s7142_s9  ;;  %s7211_s0 = int_to_ptr.vmem [resolvable:$true] %s252_s0 }
  0x39   : > { %p7205_p12 = pnand %p8691_p11, %p260_p9  ;;  %s6918_s16 = scalar_lea.hbm %s7201_s27, 4096 }
  0x3a   : > { %p6919_p1 = scmp.ne.s32.totalorder %s7201_s27, %s6918_s16  ;;  %s6923_s13 = scalar_lea.hbm %s8679_s4, 8192 }
  0x3b   : > { %p6924_p2 = scmp.lt.u32.totalorder %s7201_s27, %s8679_s4  ;;  %p6925_p5 = scmp.lt.u32.totalorder %s6923_s13, %s6918_s16 }
  0x3c   : > { %p6921_p6 = pnand %p6919_p1, %p6890_p3  ;;  %p6927_p7 = scmp.lt.u32.totalorder %s6918_s16, %s7201_s27 }
  0x3d   : > { %p6926_p4 = por %p6925_p5, %p6924_p2 }
  0x3e   : > { %p6922_p13 = pneg %p6921_p6 }
  0x3f   : > { %p6928_p10 = por %p6927_p7, %p6926_p4 }
  0x41   : > { %p6929_p9 = pnand %p6928_p10, %p6922_p13 }
  0x43   : > { %6932 = shalt.err (!%p6929_p9)
}
  0x44   : > { %s6933_s10 = scalar_lea.vmem %s7211_s0, 4096  ;;  %s7039_s12 = smov [#allocation6]  }
  0x45   : > { %p6934_p11 = scmp.ne.s32.totalorder %s7211_s0, %s6933_s10  ;;  %s6938_s11 = sshll.u32 %s7039_s12, 4  ;;  %s6939_s11 = int_to_ptr.vmem [resolvable:$false] %s6938_s11 }
  0x46   : > { %s6940_s25 = scalar_lea.vmem %s6939_s11, 8192  ;;  %p6941_p8 = scmp.lt.s32.totalorder %s7211_s0, %s6939_s11 }
  0x47   : > { %p6936_p1 = pnand %p6934_p11, %p6890_p3  ;;  %p6942_p2 = scmp.lt.s32.totalorder %s6940_s25, %s6933_s10 }
  0x49   : > { %p6937_p6 = pneg %p6936_p1  ;;  %p6943_p5 = por %p6942_p2, %p6941_p8 }
  0x4b   : > { %p6944_p4 = pnand %p6943_p5, %p6937_p6 }
  0x4d   : > { %6947 = shalt.err (!%p6944_p4)
}
  0x4e   : > { %s8693_s16 = smov 128   ;;  %264 = sbr.rel (%p7205_p12) target bundleno = 2880 (0xb40), region = 40 }
  0x4f   : > { %6808 = dma.hbm_to_vmem [thread:$0]  (!%p7159_p0), %s7201_s27, 4096, %s7211_s0, %s239_s14, %s8693_s16, %s8693_s16, %s7038_s28  }
  0x50   : > { %s7245_s24 = sand.u32 (!%p7205_p12), 1, %s7018_s19   ;;  %p8694_p8 = scmp.ne.s32.totalorder (!%p7205_p12), %s8686_s30, 0 }
  0x51   : > { %s7248_s13 = sshll.u32 (!%p7205_p12), %s7245_s24, 8  ;;  %s267_s17 = scalar_lea.sflag (!%p7205_p12), [#allocation4], %s7245_s24 }
  0x52   : > { %s7252_s15 = scalar_lea.vmem (!%p7205_p12), [#allocation3], %s7248_s13 }
  0x55   : > { %7001 = dma.done.wait (%p8694_p8), %s267_s17, 4096  }
  0x56   : > { %7003 = vsyncadd (%p8694_p8), %s267_s17, 4294963200  ;;  %s276_s0 = scalar_lea.sflag [#allocation7], %s7245_s24  ;;  %s7260_s9 = scalar_lea.vmem [#allocation6], %s7248_s13 }
  0x57   : > { %7005 = dma.done.wait (%p8694_p8), %s276_s0, 4096  }
  0x58   : > { %7007 = vsyncadd (%p8694_p8), %s276_s0, 4294963200  ;;  %v7040_v0 = vmov 0.0|0.0   ;;  %vm7041_vm0 = vmmov 0   ;;  %v7042_v1 = vmov 0.0   ;;  %vm361_vm1 = vcmask 1041409   ;;  %s8293_s12 = scalar_lea.vmem [#allocation8], %s7248_s13 }
  0x59   : > { %6636 = vmatprep.subr.bf16.mxu0 %v7040_v0  ;;  %6639 = vmatprep.subr.bf16.mxu1 %v7040_v0  ;;  %vm364_vm2 = vcmask 1042434   ;;  %vm367_vm3 = vcmask 1043459   ;;  %vm370_vm4 = vcmask 1044484   ;;  %vm373_vm5 = vcmask 1045509   ;;  %v329_v2 = vld [vmem:[%s7252_s15 + $0x10] sm:$0x1] }
  0x5a   : > { %6336 = vmatprep.mubr.msk.f32.mxu0 %vm7041_vm0, %v7042_v1  ;;  %6343 = vmatprep.mubr.msk.f32.mxu1 %vm7041_vm0, %v7042_v1  ;;  %v330_v3 = vld [vmem:[%s7252_s15 + $0x20] sm:$0x1]  ;;  %v331_v4 = vld [vmem:[%s7252_s15 + $0x30] sm:$0x1]  ;;  %vm376_vm6 = vcmask 1046534   ;;  %v360_v16 = vrot.slane %v329_v2, 7 }
  0x5b   : > { %v328_v5 = vld [vmem:[%s7252_s15] sm:$0x1]  ;;  %v333_v7 = vld [vmem:[%s7252_s15 + $0x50] sm:$0x1]  ;;  %v363_v17 = vrot.slane %v330_v3, 6  ;;  %v366_v18 = vrot.slane %v331_v4, 5 }
  0x5c   : > { %v332_v6 = vld [vmem:[%s7252_s15 + $0x40] sm:$0x1]  ;;  %v335_v9 = vld [vmem:[%s7252_s15 + $0x70] sm:$0x1]  ;;  %vm379_vm7 = vcmask 1047559   ;;  %v372_v21 = vrot.slane %v333_v7, 3  ;;  %v362_v25 = vsel %vm361_vm1, %v360_v16, %v328_v5 }
  0x5d   : > { %v334_v8 = vld [vmem:[%s7252_s15 + $0x60] sm:$0x1]  ;;  %v337_v11 = vld [vmem:[%s7252_s15 + $0x90] sm:$0x1]  ;;  %v369_v20 = vrot.slane %v332_v6, 4  ;;  %v365_v29 = vsel %vm364_vm2, %v363_v17, %v362_v25  ;;  %v378_v30 = vrot.slane %v335_v9, 1 }
  0x5e   : > { %v336_v10 = vld [vmem:[%s7252_s15 + $0x80] sm:$0x1]  ;;  %v339_v13 = vld [vmem:[%s7252_s15 + $0xb0] sm:$0x1]  ;;  %v375_v22 = vrot.slane %v334_v8, 2  ;;  %v381_v23 = vrot.slane %v337_v11, 7  ;;  %v368_v34 = vsel %vm367_vm3, %v366_v18, %v365_v29 }
  0x5f   : > { %v338_v12 = vld [vmem:[%s7252_s15 + $0xa0] sm:$0x1]  ;;  %v341_v15 = vld [vmem:[%s7252_s15 + $0xd0] sm:$0x1]  ;;  %v385_v27 = vrot.slane %v339_v13, 5  ;;  %v371_v39 = vsel %vm370_vm4, %v369_v20, %v368_v34  ;;  %vm397_vm8 = vcmask 130048  }
  0x60   : > { %v340_v14 = vld [vmem:[%s7252_s15 + $0xc0] sm:$0x1]  ;;  %v343_v24 = vld [vmem:[%s7252_s15 + $0xf0] sm:$0x1]  ;;  %v383_v26 = vrot.slane %v338_v12, 6  ;;  %v382_v31 = vsel %vm361_vm1, %v381_v23, %v336_v10  ;;  %v389_v32 = vrot.slane %v341_v15, 3  ;;  %v374_v44 = vsel %vm373_vm5, %v372_v21, %v371_v39 }
  0x61   : > { %v342_v19 = vld [vmem:[%s7252_s15 + $0xe0] sm:$0x1]  ;;  %v387_v28 = vrot.slane %v340_v14, 4  ;;  %v612_v33 = vld [vmem:[%s7252_s15 + $0x11] sm:$0x1]  ;;  %v393_v41 = vrot.slane %v343_v24, 1  ;;  %v377_v49 = vsel %vm376_vm6, %v375_v22, %v374_v44 }
  0x62   : > { %v384_v35 = vsel %vm364_vm2, %v383_v26, %v382_v31  ;;  %v391_v36 = vrot.slane %v342_v19, 2  ;;  %v611_v37 = vld [vmem:[%s7252_s15 + $0x1] sm:$0x1]  ;;  %v643_v38 = vrot.slane %v612_v33, 7  ;;  %v614_v43 = vld [vmem:[%s7252_s15 + $0x31] sm:$0x1]  ;;  %v380_v57 = vsel %vm379_vm7, %v378_v30, %v377_v49 }
  0x63   : > { %v386_v40 = vsel %vm367_vm3, %v385_v27, %v384_v35  ;;  %v613_v42 = vld [vmem:[%s7252_s15 + $0x21] sm:$0x1]  ;;  %v616_v47 = vld [vmem:[%s7252_s15 + $0x51] sm:$0x1]  ;;  %v647_v62 = vrot.slane %v614_v43, 5  ;;  %v327_v18 = vld [vmem:[%s8678_s3 + $0x8] sm:$0xff] }
  0x64   : > { %v388_v45 = vsel %vm370_vm4, %v387_v28, %v386_v40  ;;  %v615_v46 = vld [vmem:[%s7252_s15 + $0x41] sm:$0x1]  ;;  %v618_v51 = vld [vmem:[%s7252_s15 + $0x71] sm:$0x1]  ;;  %v644_v56 = vsel %vm361_vm1, %v643_v38, %v611_v37  ;;  %v645_v61 = vrot.slane %v613_v42, 6  ;;  %v651_v5 = vrot.slane %v616_v47, 3 }
  0x65   : > { %v617_v48 = vld [vmem:[%s7252_s15 + $0x61] sm:$0x1]  ;;  %v390_v50 = vsel %vm373_vm5, %v389_v32, %v388_v45  ;;  %v620_v53 = vld [vmem:[%s7252_s15 + $0x91] sm:$0x1]  ;;  %v649_v4 = vrot.slane %v615_v46, 4  ;;  %v655_v20 = vrot.slane %v618_v51, 1 }
  0x66   : > { %v619_v52 = vld [vmem:[%s7252_s15 + $0x81] sm:$0x1]  ;;  %v622_v55 = vld [vmem:[%s7252_s15 + $0xb1] sm:$0x1]  ;;  %v392_v58 = vsel %vm376_vm6, %v391_v36, %v390_v50  ;;  %v646_v7 = vsel %vm364_vm2, %v645_v61, %v644_v56  ;;  %v653_v8 = vrot.slane %v617_v48, 2  ;;  %v657_v9 = vrot.slane %v620_v53, 7 }
  0x67   : > { %v621_v54 = vld [vmem:[%s7252_s15 + $0xa1] sm:$0x1]  ;;  %v624_v60 = vld [vmem:[%s7252_s15 + $0xd1] sm:$0x1]  ;;  %v394_v63 = vsel %vm379_vm7, %v393_v41, %v392_v58  ;;  %v882_v10 = vld [vmem:[%s7252_s15 + $0x2] sm:$0x1]  ;;  %v648_v13 = vsel %vm367_vm3, %v647_v62, %v646_v7 }
  0x68   : > { %v623_v59 = vld [vmem:[%s7252_s15 + $0xc1] sm:$0x1]  ;;  %v626_v3 = vld [vmem:[%s7252_s15 + $0xf1] sm:$0x1]  ;;  %v6637_v6 = vpack.c.bf16 %v394_v63, %v380_v57  ;;  %v883_v11 = vld [vmem:[%s7252_s15 + $0x12] sm:$0x1]  ;;  %v650_v19 = vsel %vm370_vm4, %v649_v4, %v648_v13  ;;  %v658_v21 = vsel %vm361_vm1, %v657_v9, %v619_v52 }
  0x69   : > { %v625_v2 = vld [vmem:[%s7252_s15 + $0xe1] sm:$0x1]  ;;  %v659_v14 = vrot.slane %v621_v54, 6  ;;  %v661_v15 = vrot.slane %v622_v55, 5  ;;  %v663_v16 = vrot.slane %v623_v59, 4  ;;  %v665_v22 = vrot.slane %v624_v60, 3 }
  0x6a   : > { %v7325_v12 = vld [vmem:[%s8676_s1] sm:$0xff]  ;;  %6638 = vmatpush3.bf16.msra.mxu0 %v6637_v6  ;;  %v885_v24 = vld [vmem:[%s7252_s15 + $0x32] sm:$0x1]  ;;  %v652_v25 = vsel %vm373_vm5, %v651_v5, %v650_v19  ;;  %v667_v27 = vrot.slane %v625_v2, 2  ;;  %v914_v30 = vrot.slane %v883_v11, 7  ;;  %v669_v33 = vrot.slane %v626_v3, 1 }
  0x6b   : > { %v326_v17 = vld [vmem:[%s8678_s3] sm:$0xff]  ;;  %6642 = vmatprep.subr.bf16.mxu0 %v7040_v0  ;;  %v660_v26 = vsel %vm364_vm2, %v659_v14, %v658_v21  ;;  %v887_v29 = vld [vmem:[%s7252_s15 + $0x52] sm:$0x1]  ;;  %v654_v31 = vsel %vm376_vm6, %v653_v8, %v652_v25  ;;  %v918_v47 = vrot.slane %v885_v24, 5  ;;  %v1154_v63 = vld [vmem:[%s7252_s15 + $0x13] sm:$0x1] }
  0x6c   : > { %v884_v23 = vld [vmem:[%s7252_s15 + $0x22] sm:$0x1]  ;;  %v662_v32 = vsel %vm367_vm3, %v661_v15, %v660_v26  ;;  %v889_v35 = vld [vmem:[%s7252_s15 + $0x72] sm:$0x1]  ;;  %v7347_v36 = vpack.c.bf16 %v327_v18, %v326_v17  ;;  %v915_v41 = vsel %vm361_vm1, %v914_v30, %v882_v10  ;;  %v656_v42 = vsel %vm379_vm7, %v655_v20, %v654_v31  ;;  %v1155_v6 = vld [vmem:[%s7252_s15 + $0x23] sm:$0x1] }
  0x6d   : > { %v886_v28 = vld [vmem:[%s7252_s15 + $0x42] sm:$0x1]  ;;  %6337 = vmatmul.mubr.msk.f32.vlgmr.msra.gmra.mrb[0].mxu0 %vm397_vm8, %v7325_v12  ;;  %v664_v37 = vsel %vm370_vm4, %v663_v16, %v662_v32  ;;  %v891_v39 = vld [vmem:[%s7252_s15 + $0x92] sm:$0x1]  ;;  %v916_v46 = vrot.slane %v884_v23, 6  ;;  %v922_v51 = vrot.slane %v887_v29, 3 }
  0x6e   : > { %v888_v34 = vld [vmem:[%s7252_s15 + $0x62] sm:$0x1]  ;;  %v666_v43 = vsel %vm373_vm5, %v665_v22, %v664_v37  ;;  %6350 = vmatprep.mubr.msk.f32.mxu0 %vm7041_vm0, %v7042_v1  ;;  %v893_v44 = vld [vmem:[%s7252_s15 + $0xb2] sm:$0x1]  ;;  %6641 = vmatpush3.bf16.msra.mxu1 %v7347_v36  ;;  %v920_v50 = vrot.slane %v886_v28, 4  ;;  %v926_v56 = vrot.slane %v889_v35, 1 }
  0x6f   : > { %v890_v38 = vld [vmem:[%s7252_s15 + $0x82] sm:$0x1]  ;;  %v668_v48 = vsel %vm376_vm6, %v667_v27, %v666_v43  ;;  %v895_v49 = vld [vmem:[%s7252_s15 + $0xd2] sm:$0x1]  ;;  %v924_v52 = vrot.slane %v888_v34, 2  ;;  %6645 = vmatprep.subr.bf16.mxu1 %v7040_v0  ;;  %v917_v55 = vsel %vm364_vm2, %v916_v46, %v915_v41  ;;  %v928_v57 = vrot.slane %v891_v39, 7 }
  0x70   : > { %v892_v40 = vld [vmem:[%s7252_s15 + $0xa2] sm:$0x1]  ;;  %v670_v53 = vsel %vm379_vm7, %v669_v33, %v668_v48  ;;  %v897_v59 = vld [vmem:[%s7252_s15 + $0xf2] sm:$0x1]  ;;  %v919_v60 = vsel %vm367_vm3, %v918_v47, %v917_v55  ;;  %v932_v62 = vrot.slane %v893_v44, 5  ;;  %v936_v5 = vrot.slane %v895_v49, 3 }
  0x71   : > { %v894_v45 = vld [vmem:[%s7252_s15 + $0xc2] sm:$0x1]  ;;  %v6643_v58 = vpack.c.bf16 %v670_v53, %v656_v42  ;;  %v930_v61 = vrot.slane %v892_v40, 6  ;;  %v921_v2 = vsel %vm370_vm4, %v920_v50, %v919_v60  ;;  %v929_v3 = vsel %vm361_vm1, %v928_v57, %v890_v38  ;;  %v1156_v7 = vld [vmem:[%s7252_s15 + $0x33] sm:$0x1]  ;;  %p8695_p3 = scmp.ne.s32.totalorder %s8687_s6, 0 }
  0x72   : > { %v896_v54 = vld [vmem:[%s7252_s15 + $0xe2] sm:$0x1]  ;;  %v934_v4 = vrot.slane %v894_v45, 4  ;;  %v923_v8 = vsel %vm373_vm5, %v922_v51, %v921_v2  ;;  %v1153_v11 = vld [vmem:[%s7252_s15 + $0x3] sm:$0x1]  ;;  %v940_v17 = vrot.slane %v897_v59, 1 }
  0x73   : > { %6644 = vmatpush3.bf16.msra.mxu0 %v6643_v58  ;;  %v931_v9 = vsel %vm364_vm2, %v930_v61, %v929_v3  ;;  %v938_v10 = vrot.slane %v896_v54, 2  ;;  %v1157_v13 = vld [vmem:[%s7252_s15 + $0x43] sm:$0x1]  ;;  %v1158_v14 = vld [vmem:[%s7252_s15 + $0x53] sm:$0x1]  ;;  %v925_v15 = vsel %vm376_vm6, %v924_v52, %v923_v8  ;;  %v1185_v28 = vrot.slane %v1154_v63, 7 }
  0x74   : > { %6648 = vmatprep.subr.bf16.mxu0 %v7040_v0  ;;  %v933_v16 = vsel %vm367_vm3, %v932_v62, %v931_v9  ;;  %v1159_v18 = vld [vmem:[%s7252_s15 + $0x63] sm:$0x1]  ;;  %v1160_v19 = vld [vmem:[%s7252_s15 + $0x73] sm:$0x1]  ;;  %v927_v20 = vsel %vm379_vm7, %v926_v56, %v925_v15  ;;  %v1187_v29 = vrot.slane %v1155_v6, 6  ;;  %v1189_v30 = vrot.slane %v1156_v7, 5 }
  0x75   : > { %v935_v21 = vsel %vm370_vm4, %v934_v4, %v933_v16  ;;  %v1161_v22 = vld [vmem:[%s7252_s15 + $0x83] sm:$0x1]  ;;  %v1162_v23 = vld [vmem:[%s7252_s15 + $0x93] sm:$0x1]  ;;  %v1191_v33 = vrot.slane %v1157_v13, 4  ;;  %v1193_v34 = vrot.slane %v1158_v14, 3  ;;  %v1186_v39 = vsel %vm361_vm1, %v1185_v28, %v1153_v11 }
  0x76   : > { %v1163_v24 = vld [vmem:[%s7252_s15 + $0xa3] sm:$0x1]  ;;  %v1164_v25 = vld [vmem:[%s7252_s15 + $0xb3] sm:$0x1]  ;;  %6351 = vmatmul.mubr.msk.f32.vlgmr.msra.gmra.mrb[2].mxu0 %vm397_vm8, %v7325_v12  ;;  %v937_v26 = vsel %vm373_vm5, %v936_v5, %v935_v21  ;;  %v1195_v35 = vrot.slane %v1159_v18, 2  ;;  %v1197_v40 = vrot.slane %v1160_v19, 1  ;;  %v1188_v44 = vsel %vm364_vm2, %v1187_v29, %v1186_v39 }
  0x77   : > { %v1165_v27 = vld [vmem:[%s7252_s15 + $0xc3] sm:$0x1]  ;;  %v939_v31 = vsel %vm376_vm6, %v938_v10, %v937_v26  ;;  %6364 = vmatprep.mubr.msk.f32.mxu0 %vm7041_vm0, %v7042_v1  ;;  %v1166_v32 = vld [vmem:[%s7252_s15 + $0xd3] sm:$0x1]  ;;  %v1199_v41 = vrot.slane %v1162_v23, 7  ;;  %v1201_v45 = vrot.slane %v1163_v24, 6  ;;  %v1190_v47 = vsel %vm367_vm3, %v1189_v30, %v1188_v44 }
  0x78   : > { %v941_v37 = vsel %vm379_vm7, %v940_v17, %v939_v31  ;;  %v1167_v38 = vld [vmem:[%s7252_s15 + $0xe3] sm:$0x1]  ;;  %v1168_v43 = vld [vmem:[%s7252_s15 + $0xf3] sm:$0x1]  ;;  %v1203_v46 = vrot.slane %v1164_v25, 5  ;;  %v1205_v49 = vrot.slane %v1165_v27, 4  ;;  %v1192_v51 = vsel %vm370_vm4, %v1191_v33, %v1190_v47 }
  0x79   : > { %v6649_v42 = vpack.c.bf16 %v941_v37, %v927_v20  ;;  %v1200_v48 = vsel %vm361_vm1, %v1199_v41, %v1161_v22  ;;  %v1207_v50 = vrot.slane %v1166_v32, 3  ;;  %v1209_v53 = vrot.slane %v1167_v38, 2  ;;  %v1424_v54 = vld [vmem:[%s7252_s15 + $0x4] sm:$0x1]  ;;  %v1425_v55 = vld [vmem:[%s7252_s15 + $0x14] sm:$0x1] }
  0x7a   : > { %v1202_v52 = vsel %vm364_vm2, %v1201_v45, %v1200_v48  ;;  %v1426_v56 = vld [vmem:[%s7252_s15 + $0x24] sm:$0x1]  ;;  %v1194_v57 = vsel %vm373_vm5, %v1193_v34, %v1192_v51  ;;  %v1211_v59 = vrot.slane %v1168_v43, 1  ;;  %v1427_v60 = vld [vmem:[%s7252_s15 + $0x34] sm:$0x1]  ;;  %v1456_v10 = vrot.slane %v1425_v55, 7 }
  0x7b   : > { %6650 = vmatpush3.bf16.msra.mxu0 %v6649_v42  ;;  %v1204_v58 = vsel %vm367_vm3, %v1203_v46, %v1202_v52  ;;  %v1428_v61 = vld [vmem:[%s7252_s15 + $0x44] sm:$0x1]  ;;  %v1196_v62 = vsel %vm376_vm6, %v1195_v35, %v1194_v57  ;;  %v1429_v2 = vld [vmem:[%s7252_s15 + $0x54] sm:$0x1]  ;;  %v1458_v11 = vrot.slane %v1426_v56, 6  ;;  %v1460_v16 = vrot.slane %v1427_v60, 5 }
  0x7c   : > { %6654 = vmatprep.subr.bf16.mxu0 %v7040_v0  ;;  %v1206_v63 = vsel %vm370_vm4, %v1205_v49, %v1204_v58  ;;  %v1430_v3 = vld [vmem:[%s7252_s15 + $0x64] sm:$0x1]  ;;  %v1431_v4 = vld [vmem:[%s7252_s15 + $0x74] sm:$0x1]  ;;  %v1198_v5 = vsel %vm379_vm7, %v1197_v40, %v1196_v62  ;;  %v1462_v17 = vrot.slane %v1428_v61, 4  ;;  %v1457_v21 = vsel %vm361_vm1, %v1456_v10, %v1424_v54 }
  0x7d   : > { %v1208_v6 = vsel %vm373_vm5, %v1207_v50, %v1206_v63  ;;  %v1432_v7 = vld [vmem:[%s7252_s15 + $0x84] sm:$0x1]  ;;  %v1433_v8 = vld [vmem:[%s7252_s15 + $0x94] sm:$0x1]  ;;  %v1464_v22 = vrot.slane %v1429_v2, 3  ;;  %v1466_v23 = vrot.slane %v1430_v3, 2  ;;  %v1459_v26 = vsel %vm364_vm2, %v1458_v11, %v1457_v21 }
  0x7e   : > { %6365 = vmatmul.mubr.msk.f32.vlgmr.msra.gmra.mrb[4].mxu0 %vm397_vm8, %v7325_v12  ;;  %v1434_v9 = vld [vmem:[%s7252_s15 + $0xa4] sm:$0x1]  ;;  %v1210_v13 = vsel %vm376_vm6, %v1209_v53, %v1208_v6  ;;  %v1435_v14 = vld [vmem:[%s7252_s15 + $0xb4] sm:$0x1]  ;;  %v1470_v27 = vrot.slane %v1433_v8, 7  ;;  %v1461_v30 = vsel %vm367_vm3, %v1460_v16, %v1459_v26  ;;  %v1468_v31 = vrot.slane %v1431_v4, 1 }
  0x7f   : > { %6378 = vmatprep.mubr.msk.f32.mxu0 %vm7041_vm0, %v7042_v1  ;;  %v1436_v15 = vld [vmem:[%s7252_s15 + $0xc4] sm:$0x1]  ;;  %v1212_v18 = vsel %vm379_vm7, %v1211_v59, %v1210_v13  ;;  %v1437_v19 = vld [vmem:[%s7252_s15 + $0xd4] sm:$0x1]  ;;  %v1472_v28 = vrot.slane %v1434_v9, 6  ;;  %v1474_v32 = vrot.slane %v1435_v14, 5  ;;  %v1463_v35 = vsel %vm370_vm4, %v1462_v17, %v1461_v30 }
  0x80   : > { %v1438_v20 = vld [vmem:[%s7252_s15 + $0xe4] sm:$0x1]  ;;  %v6655_v24 = vpack.c.bf16 %v1212_v18, %v1198_v5  ;;  %v1439_v25 = vld [vmem:[%s7252_s15 + $0xf4] sm:$0x1]  ;;  %v1696_v29 = vld [vmem:[%s7252_s15 + $0x15] sm:$0x1]  ;;  %v1471_v37 = vsel %vm361_vm1, %v1470_v27, %v1432_v7  ;;  %v1465_v42 = vsel %vm373_vm5, %v1464_v22, %v1463_v35 }
  0x81   : > { %v1476_v33 = vrot.slane %v1436_v15, 4  ;;  %v1697_v34 = vld [vmem:[%s7252_s15 + $0x25] sm:$0x1]  ;;  %v1478_v38 = vrot.slane %v1437_v19, 3  ;;  %v1698_v40 = vld [vmem:[%s7252_s15 + $0x35] sm:$0x1]  ;;  %v1473_v43 = vsel %vm364_vm2, %v1472_v28, %v1471_v37  ;;  %v1467_v48 = vsel %vm376_vm6, %v1466_v23, %v1465_v42 }
  0x82   : > { %6656 = vmatpush3.bf16.msra.mxu0 %v6655_v24  ;;  %v1695_v39 = vld [vmem:[%s7252_s15 + $0x5] sm:$0x1]  ;;  %v1480_v44 = vrot.slane %v1438_v20, 2  ;;  %v1482_v45 = vrot.slane %v1439_v25, 1  ;;  %v1700_v46 = vld [vmem:[%s7252_s15 + $0x55] sm:$0x1]  ;;  %v1475_v49 = vsel %vm367_vm3, %v1474_v32, %v1473_v43  ;;  %v1469_v53 = vsel %vm379_vm7, %v1468_v31, %v1467_v48 }
  0x83   : > { %v1699_v41 = vld [vmem:[%s7252_s15 + $0x45] sm:$0x1]  ;;  %6660 = vmatprep.subr.bf16.mxu0 %v7040_v0  ;;  %v1702_v50 = vld [vmem:[%s7252_s15 + $0x75] sm:$0x1]  ;;  %v1477_v54 = vsel %vm370_vm4, %v1476_v33, %v1475_v49  ;;  %v1727_v58 = vrot.slane %v1696_v29, 7  ;;  %v1729_v59 = vrot.slane %v1697_v34, 6 }
  0x84   : > { %v1701_v47 = vld [vmem:[%s7252_s15 + $0x65] sm:$0x1]  ;;  %v1704_v51 = vld [vmem:[%s7252_s15 + $0x95] sm:$0x1]  ;;  %v1479_v60 = vsel %vm373_vm5, %v1478_v38, %v1477_v54  ;;  %v1731_v62 = vrot.slane %v1698_v40, 5  ;;  %v1733_v63 = vrot.slane %v1699_v41, 4 }
  0x85   : > { %v1705_v52 = vld [vmem:[%s7252_s15 + $0xa5] sm:$0x1]  ;;  %6379 = vmatmul.mubr.msk.f32.vlgmr.msra.gmra.mrb[6].mxu0 %vm397_vm8, %v7325_v12  ;;  %v1706_v56 = vld [vmem:[%s7252_s15 + $0xb5] sm:$0x1]  ;;  %v1735_v2 = vrot.slane %v1700_v46, 3  ;;  %v1481_v3 = vsel %vm376_vm6, %v1480_v44, %v1479_v60  ;;  %v1728_v6 = vsel %vm361_vm1, %v1727_v58, %v1695_v39  ;;  %v1737_v7 = vrot.slane %v1701_v47, 2 }
  0x86   : > { %v1703_v55 = vld [vmem:[%s7252_s15 + $0x85] sm:$0x1]  ;;  %6392 = vmatprep.mubr.msk.f32.mxu0 %vm7041_vm0, %v7042_v1  ;;  %v1708_v61 = vld [vmem:[%s7252_s15 + $0xd5] sm:$0x1]  ;;  %v1739_v8 = vrot.slane %v1702_v50, 1  ;;  %v1483_v9 = vsel %vm379_vm7, %v1482_v45, %v1481_v3  ;;  %v1730_v10 = vsel %vm364_vm2, %v1729_v59, %v1728_v6  ;;  %v1741_v11 = vrot.slane %v1704_v51, 7 }
  0x87   : > { %v1707_v57 = vld [vmem:[%s7252_s15 + $0xc5] sm:$0x1]  ;;  %v1710_v5 = vld [vmem:[%s7252_s15 + $0xf5] sm:$0x1]  ;;  %v1743_v13 = vrot.slane %v1705_v52, 6  ;;  %v6661_v16 = vpack.c.bf16 %v1483_v9, %v1469_v53  ;;  %v1732_v17 = vsel %vm367_vm3, %v1731_v62, %v1730_v10  ;;  %v1745_v18 = vrot.slane %v1706_v56, 5 }
  0x88   : > { %v1709_v4 = vld [vmem:[%s7252_s15 + $0xe5] sm:$0x1]  ;;  %v1966_v14 = vld [vmem:[%s7252_s15 + $0x6] sm:$0x1]  ;;  %v1967_v15 = vld [vmem:[%s7252_s15 + $0x16] sm:$0x1]  ;;  %v1734_v22 = vsel %vm370_vm4, %v1733_v63, %v1732_v17  ;;  %v1742_v23 = vsel %vm361_vm1, %v1741_v11, %v1703_v55 }
  0x89   : > { %v1747_v19 = vrot.slane %v1707_v57, 4  ;;  %v1968_v20 = vld [vmem:[%s7252_s15 + $0x26] sm:$0x1]  ;;  %v1969_v21 = vld [vmem:[%s7252_s15 + $0x36] sm:$0x1]  ;;  %v1749_v24 = vrot.slane %v1708_v61, 3  ;;  %6662 = vmatpush3.bf16.msra.mxu0 %v6661_v16  ;;  %v1736_v27 = vsel %vm373_vm5, %v1735_v2, %v1734_v22  ;;  %v1744_v28 = vsel %vm364_vm2, %v1743_v13, %v1742_v23 }
  0x8a   : > { %v1970_v25 = vld [vmem:[%s7252_s15 + $0x46] sm:$0x1]  ;;  %v1971_v26 = vld [vmem:[%s7252_s15 + $0x56] sm:$0x1]  ;;  %v1751_v29 = vrot.slane %v1709_v4, 2  ;;  %v1998_v32 = vrot.slane %v1967_v15, 7  ;;  %6666 = vmatprep.subr.bf16.mxu0 %v7040_v0  ;;  %v1738_v33 = vsel %vm376_vm6, %v1737_v7, %v1736_v27  ;;  %v1746_v34 = vsel %vm367_vm3, %v1745_v18, %v1744_v28 }
  0x8b   : > { %v1972_v30 = vld [vmem:[%s7252_s15 + $0x66] sm:$0x1]  ;;  %v1973_v31 = vld [vmem:[%s7252_s15 + $0x76] sm:$0x1]  ;;  %v1753_v35 = vrot.slane %v1710_v5, 1  ;;  %v1740_v39 = vsel %vm379_vm7, %v1739_v8, %v1738_v33  ;;  %v1748_v40 = vsel %vm370_vm4, %v1747_v19, %v1746_v34  ;;  %v2000_v45 = vrot.slane %v1968_v20, 6 }
  0x8c   : > { %v1975_v37 = vld [vmem:[%s7252_s15 + $0x96] sm:$0x1]  ;;  %v1976_v38 = vld [vmem:[%s7252_s15 + $0xa6] sm:$0x1]  ;;  %v1999_v44 = vsel %vm361_vm1, %v1998_v32, %v1966_v14  ;;  %6393 = vmatmul.mubr.msk.f32.vlgmr.msra.gmra.mrb[8].mxu0 %vm397_vm8, %v7325_v12  ;;  %v1750_v46 = vsel %vm373_vm5, %v1749_v24, %v1748_v40  ;;  %v2002_v48 = vrot.slane %v1969_v21, 5  ;;  %v2004_v49 = vrot.slane %v1970_v25, 4 }
  0x8d   : > { %v1974_v41 = vld [vmem:[%s7252_s15 + $0x86] sm:$0x1]  ;;  %v1977_v42 = vld [vmem:[%s7252_s15 + $0xb6] sm:$0x1]  ;;  %v2006_v50 = vrot.slane %v1971_v26, 3  ;;  %v1752_v51 = vsel %vm376_vm6, %v1751_v29, %v1750_v46  ;;  %6406 = vmatprep.mubr.msk.f32.mxu0 %vm7041_vm0, %v7042_v1  ;;  %v2001_v54 = vsel %vm364_vm2, %v2000_v45, %v1999_v44  ;;  %v2008_v55 = vrot.slane %v1972_v30, 2 }
  0x8e   : > { %v1978_v43 = vld [vmem:[%s7252_s15 + $0xc6] sm:$0x1]  ;;  %v1979_v47 = vld [vmem:[%s7252_s15 + $0xd6] sm:$0x1]  ;;  %v2010_v56 = vrot.slane %v1973_v31, 1  ;;  %v1754_v57 = vsel %vm379_vm7, %v1753_v35, %v1752_v51  ;;  %v2003_v58 = vsel %vm367_vm3, %v2002_v48, %v2001_v54  ;;  %v2012_v59 = vrot.slane %v1975_v37, 7 }
  0x8f   : > { %v1980_v52 = vld [vmem:[%s7252_s15 + $0xe6] sm:$0x1]  ;;  %v1981_v53 = vld [vmem:[%s7252_s15 + $0xf6] sm:$0x1]  ;;  %v2014_v60 = vrot.slane %v1976_v38, 6  ;;  %v6667_v63 = vpack.c.bf16 %v1754_v57, %v1740_v39  ;;  %v2005_v2 = vsel %vm370_vm4, %v2004_v49, %v2003_v58  ;;  %v2016_v3 = vrot.slane %v1977_v42, 5 }
  0x90   : > { %v2237_v61 = vld [vmem:[%s7252_s15 + $0x7] sm:$0x1]  ;;  %v2238_v62 = vld [vmem:[%s7252_s15 + $0x17] sm:$0x1]  ;;  %v2018_v4 = vrot.slane %v1978_v43, 4  ;;  %v2007_v7 = vsel %vm373_vm5, %v2006_v50, %v2005_v2  ;;  %v2013_v8 = vsel %vm361_vm1, %v2012_v59, %v1974_v41  ;;  %v2020_v9 = vrot.slane %v1979_v47, 3 }
  0x91   : > { %v2239_v5 = vld [vmem:[%s7252_s15 + $0x27] sm:$0x1]  ;;  %v2240_v6 = vld [vmem:[%s7252_s15 + $0x37] sm:$0x1]  ;;  %6668 = vmatpush3.bf16.msra.mxu0 %v6667_v63  ;;  %v2009_v13 = vsel %vm376_vm6, %v2008_v55, %v2007_v7  ;;  %v2015_v14 = vsel %vm364_vm2, %v2014_v60, %v2013_v8  ;;  %v2022_v15 = vrot.slane %v1980_v52, 2  ;;  %v2269_v18 = vrot.slane %v2238_v62, 7 }
  0x92   : > { %v2241_v10 = vld [vmem:[%s7252_s15 + $0x47] sm:$0x1]  ;;  %v2242_v11 = vld [vmem:[%s7252_s15 + $0x57] sm:$0x1]  ;;  %6672 = vmatprep.subr.bf16.mxu0 %v7040_v0  ;;  %v2011_v19 = vsel %vm379_vm7, %v2010_v56, %v2009_v13  ;;  %v2017_v20 = vsel %vm367_vm3, %v2016_v3, %v2015_v14  ;;  %v2024_v21 = vrot.slane %v1981_v53, 1  ;;  %v2271_v29 = vrot.slane %v2239_v5, 6 }
  0x93   : > { %v2243_v16 = vld [vmem:[%s7252_s15 + $0x67] sm:$0x1]  ;;  %v2244_v17 = vld [vmem:[%s7252_s15 + $0x77] sm:$0x1]  ;;  %v2019_v25 = vsel %vm370_vm4, %v2018_v4, %v2017_v20  ;;  %v2270_v28 = vsel %vm361_vm1, %v2269_v18, %v2237_v61  ;;  %v2273_v30 = vrot.slane %v2240_v6, 5  ;;  %v2275_v33 = vrot.slane %v2241_v10, 4 }
  0x94   : > { %v2245_v22 = vld [vmem:[%s7252_s15 + $0x87] sm:$0x1]  ;;  %v2246_v23 = vld [vmem:[%s7252_s15 + $0x97] sm:$0x1]  ;;  %6407 = vmatmul.mubr.msk.f32.vlgmr.msra.gmra.mrb[10].mxu0 %vm397_vm8, %v7325_v12  ;;  %v2021_v31 = vsel %vm373_vm5, %v2020_v9, %v2019_v25  ;;  %v2277_v34 = vrot.slane %v2242_v11, 3  ;;  %v2279_v35 = vrot.slane %v2243_v16, 2  ;;  %v2272_v40 = vsel %vm364_vm2, %v2271_v29, %v2270_v28 }
  0x95   : > { %v2247_v24 = vld [vmem:[%s7252_s15 + $0xa7] sm:$0x1]  ;;  %v2248_v26 = vld [vmem:[%s7252_s15 + $0xb7] sm:$0x1]  ;;  %v2023_v37 = vsel %vm376_vm6, %v2022_v15, %v2021_v31  ;;  %6420 = vmatprep.mubr.msk.f32.mxu0 %vm7041_vm0, %v7042_v1  ;;  %v2281_v41 = vrot.slane %v2244_v17, 1  ;;  %v2283_v42 = vrot.slane %v2246_v23, 7  ;;  %v2274_v44 = vsel %vm367_vm3, %v2273_v30, %v2272_v40 }
  0x96   : > { %v2249_v27 = vld [vmem:[%s7252_s15 + $0xc7] sm:$0x1]  ;;  %v2250_v32 = vld [vmem:[%s7252_s15 + $0xd7] sm:$0x1]  ;;  %v2025_v43 = vsel %vm379_vm7, %v2024_v21, %v2023_v37  ;;  %v2285_v45 = vrot.slane %v2247_v24, 6  ;;  %v2287_v46 = vrot.slane %v2248_v26, 5  ;;  %v2276_v50 = vsel %vm370_vm4, %v2275_v33, %v2274_v44 }
  0x97   : > { %v2251_v38 = vld [vmem:[%s7252_s15 + $0xe7] sm:$0x1]  ;;  %v2252_v39 = vld [vmem:[%s7252_s15 + $0xf7] sm:$0x1]  ;;  %v2508_v47 = vld [vmem:[%s7252_s15 + $0x8] sm:$0x1]  ;;  %v6673_v49 = vpack.c.bf16 %v2025_v43, %v2011_v19  ;;  %v2284_v51 = vsel %vm361_vm1, %v2283_v42, %v2245_v22  ;;  %v2278_v55 = vsel %vm373_vm5, %v2277_v34, %v2276_v50 }
  0x98   : > { %v2509_v48 = vld [vmem:[%s7252_s15 + $0x18] sm:$0x1]  ;;  %v2289_v52 = vrot.slane %v2249_v27, 4  ;;  %v2510_v53 = vld [vmem:[%s7252_s15 + $0x28] sm:$0x1]  ;;  %v2286_v56 = vsel %vm364_vm2, %v2285_v45, %v2284_v51  ;;  %v2291_v57 = vrot.slane %v2250_v32, 3  ;;  %v2280_v61 = vsel %vm376_vm6, %v2279_v35, %v2278_v55 }
  0x99   : > { %v2511_v54 = vld [vmem:[%s7252_s15 + $0x38] sm:$0x1]  ;;  %v2293_v58 = vrot.slane %v2251_v38, 2  ;;  %v2512_v59 = vld [vmem:[%s7252_s15 + $0x48] sm:$0x1]  ;;  %6674 = vmatpush3.bf16.msra.mxu0 %v6673_v49  ;;  %v2288_v62 = vsel %vm367_vm3, %v2287_v46, %v2286_v56  ;;  %v2295_v63 = vrot.slane %v2252_v39, 1  ;;  %v2282_v5 = vsel %vm379_vm7, %v2281_v41, %v2280_v61 }
  0x9a   : > { %v2513_v60 = vld [vmem:[%s7252_s15 + $0x58] sm:$0x1]  ;;  %v2514_v2 = vld [vmem:[%s7252_s15 + $0x68] sm:$0x1]  ;;  %v2540_v4 = vrot.slane %v2509_v48, 7  ;;  %6678 = vmatprep.subr.bf16.mxu0 %v7040_v0  ;;  %v2290_v6 = vsel %vm370_vm4, %v2289_v52, %v2288_v62  ;;  %v2542_v15 = vrot.slane %v2510_v53, 6 }
  0x9b   : > { %v2515_v3 = vld [vmem:[%s7252_s15 + $0x78] sm:$0x1]  ;;  %v2516_v7 = vld [vmem:[%s7252_s15 + $0x88] sm:$0x1]  ;;  %v2292_v10 = vsel %vm373_vm5, %v2291_v57, %v2290_v6  ;;  %v2544_v16 = vrot.slane %v2511_v54, 5  ;;  %v2546_v19 = vrot.slane %v2512_v59, 4 }
  0x9c   : > { %v2517_v8 = vld [vmem:[%s7252_s15 + $0x98] sm:$0x1]  ;;  %v2518_v9 = vld [vmem:[%s7252_s15 + $0xa8] sm:$0x1]  ;;  %v2541_v14 = vsel %vm361_vm1, %v2540_v4, %v2508_v47  ;;  %6421 = vmatmul.mubr.msk.f32.vlgmr.msra.gmra.mrb[12].mxu0 %vm397_vm8, %v7325_v12  ;;  %v2294_v17 = vsel %vm376_vm6, %v2293_v58, %v2292_v10  ;;  %v2548_v20 = vrot.slane %v2513_v60, 3  ;;  %v2550_v21 = vrot.slane %v2514_v2, 2 }
  0x9d   : > { %v2519_v11 = vld [vmem:[%s7252_s15 + $0xb8] sm:$0x1]  ;;  %v2520_v13 = vld [vmem:[%s7252_s15 + $0xc8] sm:$0x1]  ;;  %v2296_v22 = vsel %vm379_vm7, %v2295_v63, %v2294_v17  ;;  %6434 = vmatprep.mubr.msk.f32.mxu0 %vm7041_vm0, %v7042_v1  ;;  %v2543_v24 = vsel %vm364_vm2, %v2542_v15, %v2541_v14  ;;  %v2552_v25 = vrot.slane %v2515_v3, 1  ;;  %v2554_v26 = vrot.slane %v2517_v8, 7 }
  0x9e   : > { %v2521_v18 = vld [vmem:[%s7252_s15 + $0xd8] sm:$0x1]  ;;  %v2522_v23 = vld [vmem:[%s7252_s15 + $0xe8] sm:$0x1]  ;;  %v6679_v27 = vpack.c.bf16 %v2296_v22, %v2282_v5  ;;  %v2545_v29 = vsel %vm367_vm3, %v2544_v16, %v2543_v24  ;;  %v2556_v30 = vrot.slane %v2518_v9, 6  ;;  %v2558_v31 = vrot.slane %v2519_v11, 5 }
  0x9f   : > { %v2523_v28 = vld [vmem:[%s7252_s15 + $0xf8] sm:$0x1]  ;;  %v2780_v32 = vld [vmem:[%s7252_s15 + $0x19] sm:$0x1]  ;;  %v2547_v33 = vsel %vm370_vm4, %v2546_v19, %v2545_v29  ;;  %v2555_v34 = vsel %vm361_vm1, %v2554_v26, %v2516_v7  ;;  %v2560_v35 = vrot.slane %v2520_v13, 4  ;;  %v2562_v37 = vrot.slane %v2521_v18, 3 }
  0xa0   : > { %v2781_v38 = vld [vmem:[%s7252_s15 + $0x29] sm:$0x1]  ;;  %v2782_v39 = vld [vmem:[%s7252_s15 + $0x39] sm:$0x1]  ;;  %6680 = vmatpush3.bf16.msra.mxu0 %v6679_v27  ;;  %v2549_v40 = vsel %vm373_vm5, %v2548_v20, %v2547_v33  ;;  %v2557_v41 = vsel %vm364_vm2, %v2556_v30, %v2555_v34  ;;  %v2564_v42 = vrot.slane %v2522_v23, 2  ;;  %v2566_v48 = vrot.slane %v2523_v28, 1 }
  0xa1   : > { %v2779_v43 = vld [vmem:[%s7252_s15 + $0x9] sm:$0x1]  ;;  %v2784_v45 = vld [vmem:[%s7252_s15 + $0x59] sm:$0x1]  ;;  %6684 = vmatprep.subr.bf16.mxu0 %v7040_v0  ;;  %v2551_v46 = vsel %vm376_vm6, %v2550_v21, %v2549_v40  ;;  %v2559_v47 = vsel %vm367_vm3, %v2558_v31, %v2557_v41  ;;  %v2811_v59 = vrot.slane %v2780_v32, 7  ;;  %v2813_v60 = vrot.slane %v2781_v38, 6 }
  0xa2   : > { %v2783_v44 = vld [vmem:[%s7252_s15 + $0x49] sm:$0x1]  ;;  %v2786_v50 = vld [vmem:[%s7252_s15 + $0x79] sm:$0x1]  ;;  %v2553_v51 = vsel %vm379_vm7, %v2552_v25, %v2551_v46  ;;  %v2561_v52 = vsel %vm370_vm4, %v2560_v35, %v2559_v47  ;;  %v2815_v61 = vrot.slane %v2782_v39, 5  ;;  %v2819_v3 = vrot.slane %v2784_v45, 3 }
  0xa3   : > { %v2785_v49 = vld [vmem:[%s7252_s15 + $0x69] sm:$0x1]  ;;  %v2788_v54 = vld [vmem:[%s7252_s15 + $0x99] sm:$0x1]  ;;  %6435 = vmatmul.mubr.msk.f32.vlgmr.msra.gmra.mrb[14].mxu0 %vm397_vm8, %v7325_v12  ;;  %v2563_v57 = vsel %vm373_vm5, %v2562_v37, %v2561_v52  ;;  %v2817_v2 = vrot.slane %v2783_v44, 4  ;;  %v2812_v7 = vsel %vm361_vm1, %v2811_v59, %v2779_v43  ;;  %v2823_v8 = vrot.slane %v2786_v50, 1 }
  0xa4   : > { %v2787_v53 = vld [vmem:[%s7252_s15 + $0x89] sm:$0x1]  ;;  %v2790_v56 = vld [vmem:[%s7252_s15 + $0xb9] sm:$0x1]  ;;  %v2565_v62 = vsel %vm376_vm6, %v2564_v42, %v2563_v57  ;;  %6448 = vmatprep.mubr.msk.f32.mxu0 %vm7041_vm0, %v7042_v1  ;;  %v2821_v4 = vrot.slane %v2785_v49, 2  ;;  %v2825_v9 = vrot.slane %v2788_v54, 7  ;;  %v2814_v13 = vsel %vm364_vm2, %v2813_v60, %v2812_v7 }
  0xa5   : > { %v2789_v55 = vld [vmem:[%s7252_s15 + $0xa9] sm:$0x1]  ;;  %v2792_v63 = vld [vmem:[%s7252_s15 + $0xd9] sm:$0x1]  ;;  %v2567_v5 = vsel %vm379_vm7, %v2566_v48, %v2565_v62  ;;  %v2829_v15 = vrot.slane %v2790_v56, 5  ;;  %v2816_v16 = vsel %vm367_vm3, %v2815_v61, %v2814_v13  ;;  %vm602_vm9 = vcmask 253952  }
  0xa6   : > { %v2791_v58 = vld [vmem:[%s7252_s15 + $0xc9] sm:$0x1]  ;;  %v6685_v10 = vpack.c.bf16 %v2567_v5, %v2553_v51  ;;  %v2794_v11 = vld [vmem:[%s7252_s15 + $0xf9] sm:$0x1]  ;;  %v2827_v14 = vrot.slane %v2789_v55, 6  ;;  %v2826_v17 = vsel %vm361_vm1, %v2825_v9, %v2787_v53  ;;  %v2833_v19 = vrot.slane %v2792_v63, 3 }
  0xa7   : > { %v2793_v6 = vld [vmem:[%s7252_s15 + $0xe9] sm:$0x1]  ;;  %v2831_v18 = vrot.slane %v2791_v58, 4  ;;  %v3051_v20 = vld [vmem:[%s7252_s15 + $0x1a] sm:$0x1]  ;;  %v2818_v21 = vsel %vm370_vm4, %v2817_v2, %v2816_v16  ;;  %v2837_v29 = vrot.slane %v2794_v11, 1 }
  0xa8   : > { %6686 = vmatpush3.bf16.msra.mxu0 %v6685_v10  ;;  %v2828_v22 = vsel %vm364_vm2, %v2827_v14, %v2826_v17  ;;  %v2835_v23 = vrot.slane %v2793_v6, 2  ;;  %v3050_v24 = vld [vmem:[%s7252_s15 + $0xa] sm:$0x1]  ;;  %v3053_v26 = vld [vmem:[%s7252_s15 + $0x3a] sm:$0x1]  ;;  %v2820_v27 = vsel %vm373_vm5, %v2819_v3, %v2818_v21  ;;  %v3082_v43 = vrot.slane %v3051_v20, 7 }
  0xa9   : > { %v3052_v25 = vld [vmem:[%s7252_s15 + $0x2a] sm:$0x1]  ;;  %6690 = vmatprep.subr.bf16.mxu0 %v7040_v0  ;;  %v2830_v28 = vsel %vm367_vm3, %v2829_v15, %v2828_v22  ;;  %v3055_v31 = vld [vmem:[%s7252_s15 + $0x5a] sm:$0x1]  ;;  %v2822_v32 = vsel %vm376_vm6, %v2821_v4, %v2820_v27  ;;  %v3086_v48 = vrot.slane %v3053_v26, 5  ;;  %vm4775_vm10 = vcmask 261120  }
  0xaa   : > { %v3054_v30 = vld [vmem:[%s7252_s15 + $0x4a] sm:$0x1]  ;;  %v2832_v33 = vsel %vm370_vm4, %v2831_v18, %v2830_v28  ;;  %v3057_v35 = vld [vmem:[%s7252_s15 + $0x7a] sm:$0x1]  ;;  %v2824_v38 = vsel %vm379_vm7, %v2823_v8, %v2822_v32  ;;  %v3084_v44 = vrot.slane %v3052_v25, 6  ;;  %v3083_v53 = vsel %vm361_vm1, %v3082_v43, %v3050_v24 }
  0xab   : > { %v3056_v34 = vld [vmem:[%s7252_s15 + $0x6a] sm:$0x1]  ;;  %v3059_v37 = vld [vmem:[%s7252_s15 + $0x9a] sm:$0x1]  ;;  %6449 = vmatmul.mubr.msk.f32.vlgmr.msra.gmra.mrb[16].mxu0 %vm397_vm8, %v7325_v12  ;;  %v2834_v39 = vsel %vm373_vm5, %v2833_v19, %v2832_v33  ;;  %v3088_v49 = vrot.slane %v3054_v30, 4  ;;  %v3090_v54 = vrot.slane %v3055_v31, 3 }
  0xac   : > { %v3058_v40 = vld [vmem:[%s7252_s15 + $0x8a] sm:$0x1]  ;;  %v3061_v42 = vld [vmem:[%s7252_s15 + $0xba] sm:$0x1]  ;;  %v2836_v45 = vsel %vm376_vm6, %v2835_v23, %v2834_v39  ;;  %6462 = vmatprep.mubr.msk.f32.mxu0 %vm7041_vm0, %v7042_v1  ;;  %v3092_v55 = vrot.slane %v3056_v34, 2  ;;  %v3085_v57 = vsel %vm364_vm2, %v3084_v44, %v3083_v53  ;;  %v3096_v58 = vrot.slane %v3059_v37, 7 }
  0xad   : > { %v3060_v41 = vld [vmem:[%s7252_s15 + $0xaa] sm:$0x1]  ;;  %v3063_v47 = vld [vmem:[%s7252_s15 + $0xda] sm:$0x1]  ;;  %v2838_v50 = vsel %vm379_vm7, %v2837_v29, %v2836_v45  ;;  %v3322_v60 = vld [vmem:[%s7252_s15 + $0x1b] sm:$0x1]  ;;  %v3087_v62 = vsel %vm367_vm3, %v3086_v48, %v3085_v57 }
  0xae   : > { %v3062_v46 = vld [vmem:[%s7252_s15 + $0xca] sm:$0x1]  ;;  %v3065_v52 = vld [vmem:[%s7252_s15 + $0xfa] sm:$0x1]  ;;  %v6691_v56 = vpack.c.bf16 %v2838_v50, %v2824_v38  ;;  %v3098_v59 = vrot.slane %v3060_v41, 6  ;;  %v3094_v63 = vrot.slane %v3057_v35, 1  ;;  %v3089_v5 = vsel %vm370_vm4, %v3088_v49, %v3087_v62 }
  0xaf   : > { %v3064_v51 = vld [vmem:[%s7252_s15 + $0xea] sm:$0x1]  ;;  %v3323_v61 = vld [vmem:[%s7252_s15 + $0x2b] sm:$0x1]  ;;  %v3100_v2 = vrot.slane %v3061_v42, 5  ;;  %v3102_v3 = vrot.slane %v3062_v46, 4  ;;  %v3097_v6 = vsel %vm361_vm1, %v3096_v58, %v3058_v40  ;;  %v3091_v11 = vsel %vm373_vm5, %v3090_v54, %v3089_v5 }
  0xb0   : > { %v3324_v4 = vld [vmem:[%s7252_s15 + $0x3b] sm:$0x1]  ;;  %6692 = vmatpush3.bf16.msra.mxu0 %v6691_v56  ;;  %v3104_v7 = vrot.slane %v3063_v47, 3  ;;  %v3321_v8 = vld [vmem:[%s7252_s15 + $0xb] sm:$0x1]  ;;  %v3099_v13 = vsel %vm364_vm2, %v3098_v59, %v3097_v6  ;;  %v3106_v14 = vrot.slane %v3064_v51, 2  ;;  %v3093_v17 = vsel %vm376_vm6, %v3092_v55, %v3091_v11 }
  0xb1   : > { %v3325_v9 = vld [vmem:[%s7252_s15 + $0x4b] sm:$0x1]  ;;  %v3326_v10 = vld [vmem:[%s7252_s15 + $0x5b] sm:$0x1]  ;;  %6696 = vmatprep.subr.bf16.mxu0 %v7040_v0  ;;  %v3101_v18 = vsel %vm367_vm3, %v3100_v2, %v3099_v13  ;;  %v3108_v19 = vrot.slane %v3065_v52, 1  ;;  %v3095_v22 = vsel %vm379_vm7, %v3094_v63, %v3093_v17  ;;  %v3353_v27 = vrot.slane %v3322_v60, 7 }
  0xb2   : > { %v3327_v15 = vld [vmem:[%s7252_s15 + $0x6b] sm:$0x1]  ;;  %v3328_v16 = vld [vmem:[%s7252_s15 + $0x7b] sm:$0x1]  ;;  %v3103_v23 = vsel %vm370_vm4, %v3102_v3, %v3101_v18  ;;  %v3355_v28 = vrot.slane %v3323_v61, 6  ;;  %v3357_v31 = vrot.slane %v3324_v4, 5 }
  0xb3   : > { %v3330_v20 = vld [vmem:[%s7252_s15 + $0x9b] sm:$0x1]  ;;  %v3331_v21 = vld [vmem:[%s7252_s15 + $0xab] sm:$0x1]  ;;  %6463 = vmatmul.mubr.msk.f32.vlgmr.msra.gmra.mrb[18].mxu0 %vm397_vm8, %v7325_v12  ;;  %v3105_v29 = vsel %vm373_vm5, %v3104_v7, %v3103_v23  ;;  %v3359_v12 = vrot.slane %v3325_v9, 4  ;;  %v3361_v32 = vrot.slane %v3326_v10, 3  ;;  %v3354_v37 = vsel %vm361_vm1, %v3353_v27, %v3321_v8 }
  0xb4   : > { %v3329_v24 = vld [vmem:[%s7252_s15 + $0x8b] sm:$0x1]  ;;  %v3332_v25 = vld [vmem:[%s7252_s15 + $0xbb] sm:$0x1]  ;;  %6476 = vmatprep.mubr.msk.f32.mxu0 %vm7041_vm0, %v7042_v1  ;;  %v3107_v33 = vsel %vm376_vm6, %v3106_v14, %v3105_v29  ;;  %v3363_v38 = vrot.slane %v3327_v15, 2  ;;  %v3365_v39 = vrot.slane %v3328_v16, 1  ;;  %v3356_v41 = vsel %vm364_vm2, %v3355_v28, %v3354_v37 }
  0xb5   : > { %v3333_v26 = vld [vmem:[%s7252_s15 + $0xcb] sm:$0x1]  ;;  %v3334_v30 = vld [vmem:[%s7252_s15 + $0xdb] sm:$0x1]  ;;  %v3109_v40 = vsel %vm379_vm7, %v3108_v19, %v3107_v33  ;;  %v3367_v42 = vrot.slane %v3330_v20, 7  ;;  %v3369_v43 = vrot.slane %v3331_v21, 6  ;;  %v3358_v47 = vsel %vm367_vm3, %v3357_v31, %v3356_v41 }
  0xb6   : > { %v3335_v34 = vld [vmem:[%s7252_s15 + $0xeb] sm:$0x1]  ;;  %v3336_v35 = vld [vmem:[%s7252_s15 + $0xfb] sm:$0x1]  ;;  %v3592_v44 = vld [vmem:[%s7252_s15 + $0xc] sm:$0x1]  ;;  %v6697_v46 = vpack.c.bf16 %v3109_v40, %v3095_v22  ;;  %v3360_v52 = vsel %vm370_vm4, %v3359_v12, %v3358_v47 }
  0xb7   : > { %v3593_v45 = vld [vmem:[%s7252_s15 + $0x1c] sm:$0x1]  ;;  %v3371_v48 = vrot.slane %v3332_v25, 5  ;;  %v3373_v49 = vrot.slane %v3333_v26, 4  ;;  %v3594_v50 = vld [vmem:[%s7252_s15 + $0x2c] sm:$0x1]  ;;  %v3368_v53 = vsel %vm361_vm1, %v3367_v42, %v3329_v24  ;;  %v3362_v57 = vsel %vm373_vm5, %v3361_v32, %v3360_v52 }
  0xb8   : > { %v3595_v51 = vld [vmem:[%s7252_s15 + $0x3c] sm:$0x1]  ;;  %v3375_v54 = vrot.slane %v3334_v30, 3  ;;  %v3596_v55 = vld [vmem:[%s7252_s15 + $0x4c] sm:$0x1]  ;;  %6698 = vmatpush3.bf16.msra.mxu0 %v6697_v46  ;;  %v3370_v58 = vsel %vm364_vm2, %v3369_v43, %v3368_v53  ;;  %v3377_v59 = vrot.slane %v3335_v34, 2  ;;  %v3364_v63 = vsel %vm376_vm6, %v3363_v38, %v3362_v57 }
  0xb9   : > { %v3597_v56 = vld [vmem:[%s7252_s15 + $0x5c] sm:$0x1]  ;;  %v3598_v60 = vld [vmem:[%s7252_s15 + $0x6c] sm:$0x1]  ;;  %v3624_v62 = vrot.slane %v3593_v45, 7  ;;  %6702 = vmatprep.subr.bf16.mxu0 %v7040_v0  ;;  %v3372_v2 = vsel %vm367_vm3, %v3371_v48, %v3370_v58  ;;  %v3379_v3 = vrot.slane %v3336_v35, 1  ;;  %v3366_v6 = vsel %vm379_vm7, %v3365_v39, %v3364_v63 }
  0xba   : > { %v3599_v61 = vld [vmem:[%s7252_s15 + $0x7c] sm:$0x1]  ;;  %v3602_v5 = vld [vmem:[%s7252_s15 + $0xac] sm:$0x1]  ;;  %v3374_v7 = vsel %vm370_vm4, %v3373_v49, %v3372_v2  ;;  %v3626_v13 = vrot.slane %v3594_v50, 6  ;;  %v7712_v14 = vld [vmem:[%s8676_s1] sm:$0xff] }
  0xbb   : > { %v3601_v4 = vld [vmem:[%s7252_s15 + $0x9c] sm:$0x1]  ;;  %v3600_v8 = vld [vmem:[%s7252_s15 + $0x8c] sm:$0x1]  ;;  %v3625_v11 = vsel %vm361_vm1, %v3624_v62, %v3592_v44  ;;  %6477 = vmatmul.mubr.msk.f32.vlgmr.msra.gmra.mrb[20].mxu0 %vm397_vm8, %v7712_v14  ;;  %v3376_v15 = vsel %vm373_vm5, %v3375_v54, %v3374_v7  ;;  %v3628_v17 = vrot.slane %v3595_v51, 5  ;;  %v3630_v18 = vrot.slane %v3596_v55, 4 }
  0xbc   : > { %v3603_v9 = vld [vmem:[%s7252_s15 + $0xbc] sm:$0x1]  ;;  %v3604_v10 = vld [vmem:[%s7252_s15 + $0xcc] sm:$0x1]  ;;  %v3632_v19 = vrot.slane %v3597_v56, 3  ;;  %v3378_v20 = vsel %vm376_vm6, %v3377_v59, %v3376_v15  ;;  %6490 = vmatprep.mubr.msk.f32.mxu0 %vm7041_vm0, %v7042_v1  ;;  %v3627_v23 = vsel %vm364_vm2, %v3626_v13, %v3625_v11  ;;  %v3634_v24 = vrot.slane %v3598_v60, 2 }
  0xbd   : > { %v3605_v16 = vld [vmem:[%s7252_s15 + $0xdc] sm:$0x1]  ;;  %v3606_v21 = vld [vmem:[%s7252_s15 + $0xec] sm:$0x1]  ;;  %v3636_v25 = vrot.slane %v3599_v61, 1  ;;  %v3380_v26 = vsel %vm379_vm7, %v3379_v3, %v3378_v20  ;;  %v3629_v27 = vsel %vm367_vm3, %v3628_v17, %v3627_v23  ;;  %v3638_v28 = vrot.slane %v3601_v4, 7 }
  0xbe   : > { %v3607_v22 = vld [vmem:[%s7252_s15 + $0xfc] sm:$0x1]  ;;  %v3640_v29 = vrot.slane %v3602_v5, 6  ;;  %v3863_v30 = vld [vmem:[%s7252_s15 + $0xd] sm:$0x1]  ;;  %v6703_v12 = vpack.c.bf16 %v3380_v26, %v3366_v6  ;;  %v3631_v32 = vsel %vm370_vm4, %v3630_v18, %v3629_v27  ;;  %v3642_v33 = vrot.slane %v3603_v9, 5 }
  0xbf   : > { %v3864_v31 = vld [vmem:[%s7252_s15 + $0x1d] sm:$0x1]  ;;  %v3644_v34 = vrot.slane %v3604_v10, 4  ;;  %v3865_v35 = vld [vmem:[%s7252_s15 + $0x2d] sm:$0x1]  ;;  %v3633_v38 = vsel %vm373_vm5, %v3632_v19, %v3631_v32  ;;  %v3639_v39 = vsel %vm361_vm1, %v3638_v28, %v3600_v8  ;;  %v3646_v40 = vrot.slane %v3605_v16, 3 }
  0xc0   : > { %v3866_v37 = vld [vmem:[%s7252_s15 + $0x3d] sm:$0x1]  ;;  %v3867_v41 = vld [vmem:[%s7252_s15 + $0x4d] sm:$0x1]  ;;  %6704 = vmatpush3.bf16.msra.mxu0 %v6703_v12  ;;  %v3635_v43 = vsel %vm376_vm6, %v3634_v24, %v3633_v38  ;;  %v3641_v44 = vsel %vm364_vm2, %v3640_v29, %v3639_v39  ;;  %v3648_v45 = vrot.slane %v3606_v21, 2  ;;  %v3895_v48 = vrot.slane %v3864_v31, 7 }
  0xc1   : > { %v3868_v42 = vld [vmem:[%s7252_s15 + $0x5d] sm:$0x1]  ;;  %v3869_v46 = vld [vmem:[%s7252_s15 + $0x6d] sm:$0x1]  ;;  %6708 = vmatprep.subr.bf16.mxu0 %v7040_v0  ;;  %v3637_v49 = vsel %vm379_vm7, %v3636_v25, %v3635_v43  ;;  %v3643_v50 = vsel %vm367_vm3, %v3642_v33, %v3641_v44  ;;  %v3650_v51 = vrot.slane %v3607_v22, 1  ;;  %v3897_v59 = vrot.slane %v3865_v35, 6 }
  0xc2   : > { %v3870_v47 = vld [vmem:[%s7252_s15 + $0x7d] sm:$0x1]  ;;  %v3871_v52 = vld [vmem:[%s7252_s15 + $0x8d] sm:$0x1]  ;;  %v3645_v55 = vsel %vm370_vm4, %v3644_v34, %v3643_v50  ;;  %v3896_v58 = vsel %vm361_vm1, %v3895_v48, %v3863_v30  ;;  %v3899_v60 = vrot.slane %v3866_v37, 5  ;;  %v3901_v63 = vrot.slane %v3867_v41, 4 }
  0xc3   : > { %v3872_v53 = vld [vmem:[%s7252_s15 + $0x9d] sm:$0x1]  ;;  %v3873_v54 = vld [vmem:[%s7252_s15 + $0xad] sm:$0x1]  ;;  %6491 = vmatmul.mubr.msk.f32.vlgmr.msra.gmra.mrb[22].mxu0 %vm397_vm8, %v7712_v14  ;;  %v3647_v61 = vsel %vm373_vm5, %v3646_v40, %v3645_v55  ;;  %v3903_v2 = vrot.slane %v3868_v42, 3  ;;  %v3905_v3 = vrot.slane %v3869_v46, 2  ;;  %v3898_v7 = vsel %vm364_vm2, %v3897_v59, %v3896_v58 }
  0xc4   : > { %v3874_v56 = vld [vmem:[%s7252_s15 + $0xbd] sm:$0x1]  ;;  %v3875_v57 = vld [vmem:[%s7252_s15 + $0xcd] sm:$0x1]  ;;  %v3649_v4 = vsel %vm376_vm6, %v3648_v45, %v3647_v61  ;;  %6504 = vmatprep.mubr.msk.f32.mxu0 %vm7041_vm0, %v7042_v1  ;;  %v3907_v8 = vrot.slane %v3870_v47, 1  ;;  %v3909_v9 = vrot.slane %v3872_v53, 7  ;;  %v3900_v11 = vsel %vm367_vm3, %v3899_v60, %v3898_v7 }
  0xc5   : > { %v3876_v62 = vld [vmem:[%s7252_s15 + $0xdd] sm:$0x1]  ;;  %v3877_v5 = vld [vmem:[%s7252_s15 + $0xed] sm:$0x1]  ;;  %v3651_v10 = vsel %vm379_vm7, %v3650_v51, %v3649_v4  ;;  %v3911_v13 = vrot.slane %v3873_v54, 6  ;;  %v3913_v15 = vrot.slane %v3874_v56, 5  ;;  %v3902_v19 = vsel %vm370_vm4, %v3901_v63, %v3900_v11 }
  0xc6   : > { %v3878_v6 = vld [vmem:[%s7252_s15 + $0xfd] sm:$0x1]  ;;  %v4134_v16 = vld [vmem:[%s7252_s15 + $0xe] sm:$0x1]  ;;  %v4135_v17 = vld [vmem:[%s7252_s15 + $0x1e] sm:$0x1]  ;;  %v6709_v18 = vpack.c.bf16 %v3651_v10, %v3637_v49  ;;  %v3910_v20 = vsel %vm361_vm1, %v3909_v9, %v3871_v52  ;;  %v3904_v24 = vsel %vm373_vm5, %v3903_v2, %v3902_v19 }
  0xc7   : > { %v3915_v21 = vrot.slane %v3875_v57, 4  ;;  %v4136_v22 = vld [vmem:[%s7252_s15 + $0x2e] sm:$0x1]  ;;  %v4137_v23 = vld [vmem:[%s7252_s15 + $0x3e] sm:$0x1]  ;;  %v3912_v25 = vsel %vm364_vm2, %v3911_v13, %v3910_v20  ;;  %v3917_v26 = vrot.slane %v3876_v62, 3  ;;  %v3906_v30 = vsel %vm376_vm6, %v3905_v3, %v3904_v24 }
  0xc8   : > { %v3919_v27 = vrot.slane %v3877_v5, 2  ;;  %v4138_v28 = vld [vmem:[%s7252_s15 + $0x4e] sm:$0x1]  ;;  %v4139_v29 = vld [vmem:[%s7252_s15 + $0x5e] sm:$0x1]  ;;  %6710 = vmatpush3.bf16.msra.mxu0 %v6709_v18  ;;  %v3914_v31 = vsel %vm367_vm3, %v3913_v15, %v3912_v25  ;;  %v3921_v12 = vrot.slane %v3878_v6, 1  ;;  %v3908_v35 = vsel %vm379_vm7, %v3907_v8, %v3906_v30 }
  0xc9   : > { %v4140_v32 = vld [vmem:[%s7252_s15 + $0x6e] sm:$0x1]  ;;  %v4141_v33 = vld [vmem:[%s7252_s15 + $0x7e] sm:$0x1]  ;;  %v4166_v34 = vrot.slane %v4135_v17, 7  ;;  %6714 = vmatprep.subr.bf16.mxu0 %v7040_v0  ;;  %v3916_v37 = vsel %vm370_vm4, %v3915_v21, %v3914_v31  ;;  %v4168_v45 = vrot.slane %v4136_v22, 6 }
  0xca   : > { %v4142_v38 = vld [vmem:[%s7252_s15 + $0x8e] sm:$0x1]  ;;  %v4143_v39 = vld [vmem:[%s7252_s15 + $0x9e] sm:$0x1]  ;;  %v3918_v41 = vsel %vm373_vm5, %v3917_v26, %v3916_v37  ;;  %v4170_v46 = vrot.slane %v4137_v23, 5  ;;  %v4172_v49 = vrot.slane %v4138_v28, 4 }
  0xcb   : > { %v4144_v40 = vld [vmem:[%s7252_s15 + $0xae] sm:$0x1]  ;;  %v4145_v42 = vld [vmem:[%s7252_s15 + $0xbe] sm:$0x1]  ;;  %v4167_v44 = vsel %vm361_vm1, %v4166_v34, %v4134_v16  ;;  %6505 = vmatmul.mubr.msk.f32.vlgmr.msra.gmra.mrb[24].mxu0 %vm397_vm8, %v7712_v14  ;;  %v3920_v47 = vsel %vm376_vm6, %v3919_v27, %v3918_v41  ;;  %v4174_v50 = vrot.slane %v4139_v29, 3  ;;  %v4176_v51 = vrot.slane %v4140_v32, 2 }
  0xcc   : > { %v4146_v43 = vld [vmem:[%s7252_s15 + $0xce] sm:$0x1]  ;;  %v4147_v48 = vld [vmem:[%s7252_s15 + $0xde] sm:$0x1]  ;;  %v3922_v52 = vsel %vm379_vm7, %v3921_v12, %v3920_v47  ;;  %6518 = vmatprep.mubr.msk.f32.mxu0 %vm7041_vm0, %v7042_v1  ;;  %v4169_v54 = vsel %vm364_vm2, %v4168_v45, %v4167_v44  ;;  %v4178_v55 = vrot.slane %v4141_v33, 1  ;;  %v4180_v56 = vrot.slane %v4143_v39, 7 }
  0xcd   : > { %v4148_v53 = vld [vmem:[%s7252_s15 + $0xee] sm:$0x1]  ;;  %v6715_v57 = vpack.c.bf16 %v3922_v52, %v3908_v35  ;;  %v4149_v58 = vld [vmem:[%s7252_s15 + $0xfe] sm:$0x1]  ;;  %v4171_v59 = vsel %vm367_vm3, %v4170_v46, %v4169_v54  ;;  %v4182_v60 = vrot.slane %v4144_v40, 6  ;;  %v4184_v61 = vrot.slane %v4145_v42, 5 }
  0xce   : > { %v4173_v62 = vsel %vm370_vm4, %v4172_v49, %v4171_v59  ;;  %v4181_v63 = vsel %vm361_vm1, %v4180_v56, %v4142_v38  ;;  %v4186_v2 = vrot.slane %v4146_v43, 4  ;;  %v4188_v3 = vrot.slane %v4147_v48, 3  ;;  %v4405_v4 = vld [vmem:[%s7252_s15 + $0xf] sm:$0x1]  ;;  %v4406_v5 = vld [vmem:[%s7252_s15 + $0x1f] sm:$0x1] }
  0xcf   : > { %v4407_v6 = vld [vmem:[%s7252_s15 + $0x2f] sm:$0x1]  ;;  %6716 = vmatpush3.bf16.msra.mxu0 %v6715_v57  ;;  %v4175_v7 = vsel %vm373_vm5, %v4174_v50, %v4173_v62  ;;  %v4183_v8 = vsel %vm364_vm2, %v4182_v60, %v4181_v63  ;;  %v4190_v9 = vrot.slane %v4148_v53, 2  ;;  %v4408_v10 = vld [vmem:[%s7252_s15 + $0x3f] sm:$0x1]  ;;  %v4192_v16 = vrot.slane %v4149_v58, 1 }
  0xd0   : > { %v4409_v11 = vld [vmem:[%s7252_s15 + $0x4f] sm:$0x1]  ;;  %6720 = vmatprep.subr.bf16.mxu0 %v7040_v0  ;;  %v4177_v13 = vsel %vm376_vm6, %v4176_v51, %v4175_v7  ;;  %v4185_v15 = vsel %vm367_vm3, %v4184_v61, %v4183_v8  ;;  %v4410_v17 = vld [vmem:[%s7252_s15 + $0x5f] sm:$0x1]  ;;  %v4437_v23 = vrot.slane %v4406_v5, 7  ;;  %v4439_v24 = vrot.slane %v4407_v6, 6 }
  0xd1   : > { %v4411_v18 = vld [vmem:[%s7252_s15 + $0x6f] sm:$0x1]  ;;  %v4187_v19 = vsel %vm370_vm4, %v4186_v2, %v4185_v15  ;;  %v4412_v20 = vld [vmem:[%s7252_s15 + $0x7f] sm:$0x1]  ;;  %v4179_v25 = vsel %vm379_vm7, %v4178_v55, %v4177_v13  ;;  %v4441_v29 = vrot.slane %v4408_v10, 5  ;;  %v4443_v30 = vrot.slane %v4409_v11, 4 }
  0xd2   : > { %v4414_v21 = vld [vmem:[%s7252_s15 + $0x9f] sm:$0x1]  ;;  %v4415_v22 = vld [vmem:[%s7252_s15 + $0xaf] sm:$0x1]  ;;  %6519 = vmatmul.mubr.msk.f32.vlgmr.msra.gmra.mrb[26].mxu0 %vm397_vm8, %v7712_v14  ;;  %v4189_v26 = vsel %vm373_vm5, %v4188_v3, %v4187_v19  ;;  %v4438_v33 = vsel %vm361_vm1, %v4437_v23, %v4405_v4  ;;  %v4445_v34 = vrot.slane %v4410_v17, 3  ;;  %v4447_v35 = vrot.slane %v4411_v18, 2 }
  0xd3   : > { %v4416_v27 = vld [vmem:[%s7252_s15 + $0xbf] sm:$0x1]  ;;  %v4417_v28 = vld [vmem:[%s7252_s15 + $0xcf] sm:$0x1]  ;;  %v4191_v31 = vsel %vm376_vm6, %v4190_v9, %v4189_v26  ;;  %6532 = vmatprep.mubr.msk.f32.mxu0 %vm7041_vm0, %v7042_v1  ;;  %v4440_v39 = vsel %vm364_vm2, %v4439_v24, %v4438_v33  ;;  %v4451_v40 = vrot.slane %v4414_v21, 7  ;;  %v4453_v41 = vrot.slane %v4415_v22, 6 }
  0xd4   : > { %v4413_v12 = vld [vmem:[%s7252_s15 + $0x8f] sm:$0x1]  ;;  %v4418_v32 = vld [vmem:[%s7252_s15 + $0xdf] sm:$0x1]  ;;  %v4193_v37 = vsel %vm379_vm7, %v4192_v16, %v4191_v31  ;;  %v4442_v44 = vsel %vm367_vm3, %v4441_v29, %v4440_v39  ;;  %v4455_v45 = vrot.slane %v4416_v27, 5  ;;  %v4457_v46 = vrot.slane %v4417_v28, 4 }
  0xd5   : > { %v4419_v38 = vld [vmem:[%s7252_s15 + $0xef] sm:$0x1]  ;;  %v6721_v42 = vpack.c.bf16 %v4193_v37, %v4179_v25  ;;  %v4420_v43 = vld [vmem:[%s7252_s15 + $0xff] sm:$0x1]  ;;  %v4444_v47 = vsel %vm370_vm4, %v4443_v30, %v4442_v44  ;;  %v4449_v48 = vrot.slane %v4412_v20, 1  ;;  %v4452_v49 = vsel %vm361_vm1, %v4451_v40, %v4413_v12 }
  0xd6   : > { %v4459_v50 = vrot.slane %v4418_v32, 3  ;;  %v4446_v51 = vsel %vm373_vm5, %v4445_v34, %v4444_v47  ;;  %v4454_v52 = vsel %vm364_vm2, %v4453_v41, %v4452_v49  ;;  %v4461_v53 = vrot.slane %v4419_v38, 2 }
  0xd7   : > { %6722 = vmatpush3.bf16.msra.mxu0 %v6721_v42  ;;  %v4448_v54 = vsel %vm376_vm6, %v4447_v35, %v4446_v51  ;;  %v4456_v55 = vsel %vm367_vm3, %v4455_v45, %v4454_v52  ;;  %v4463_v56 = vrot.slane %v4420_v43, 1  ;;  %v7043_v33 = vmov 1966171168  }
  0xd8   : > { %6726 = vmatprep.subr.bf16.mxu0 %v7040_v0  ;;  %v4458_v57 = vsel %vm370_vm4, %v4457_v46, %v4456_v55  ;;  %v4450_v58 = vsel %vm379_vm7, %v4449_v48, %v4448_v54  ;;  %v547_v34 = vunpack.c.l.s4 %v7043_v33  ;;  %v549_v35 = vlaneseq }
  0xd9   : > { %v4460_v59 = vsel %vm373_vm5, %v4459_v50, %v4458_v57 }
  0xda   : > { %6533 = vmatmul.mubr.msk.f32.vlgmr.msra.gmra.mrb[28].mxu0 %vm397_vm8, %v7712_v14  ;;  %v4462_v60 = vsel %vm376_vm6, %v4461_v53, %v4460_v59  ;;  %v548_v37 = vunpack.c.0.s8 %v547_v34  ;;  %v550_v38 = vshrl.u32 %v549_v35, 7 }
  0xdb   : > { %6546 = vmatprep.mubr.msk.f32.mxu0 %vm7041_vm0, %v7042_v1  ;;  %v4464_v61 = vsel %vm379_vm7, %v4463_v56, %v4462_v60  ;;  %v7943_v56 = vld [vmem:[%s8677_s2] sm:$0xff] }
  0xdc   : > { %v6727_v62 = vpack.c.bf16 %v4464_v61, %v4450_v58  ;;  %v7924_v39 = vsub.s32 %v548_v37, %v550_v38 }
  0xde   : > { %6728 = vmatpush3.bf16.msra.mxu0 %v6727_v62 }
  0xe1   : > { %6547 = vmatmul.mubr.msk.f32.vlgmr.msra.gmra.mrb[30].mxu0 %vm397_vm8, %v7712_v14 }
  0xe2   : > { %6560 = vmatprep.mubr.msk.f32.mxu0 %vm397_vm8, %v7943_v56 }
 0x140   : > { %v467_v63 = vpop.f32.mrb[0].mxu0 }
 0x141   : > { %v6338_v2 = vpop.f32.mrb[1].mxu0  ;;  %6344 = vmatmul.mubr.msk.f32.vlgmr.msra.gmra.mrb[0].mxu1 %vm397_vm8, %v467_v63 }
 0x142   : > { %6647 = vmatpush3.bf16.msra.mxu1 %v7347_v36  ;;  %6357 = vmatprep.mubr.msk.f32.mxu1 %vm7041_vm0, %v7042_v1 }
 0x143   : > { %6651 = vmatprep.subr.bf16.mxu1 %v7040_v0 }
 0x149   : > { %v739_v3 = vpop.f32.mrb[2].mxu0 }
 0x14a   : > { %v6352_v4 = vpop.f32.mrb[3].mxu0  ;;  %6358 = vmatmul.mubr.msk.f32.vlgmr.msra.gmra.mrb[2].mxu1 %vm397_vm8, %v739_v3 }
 0x14b   : > { %6653 = vmatpush3.bf16.msra.mxu1 %v7347_v36  ;;  %6371 = vmatprep.mubr.msk.f32.mxu1 %vm7041_vm0, %v7042_v1 }
 0x14c   : > { %6657 = vmatprep.subr.bf16.mxu1 %v7040_v0 }
 0x151   : > { %v1010_v14 = vpop.f32.mrb[4].mxu0 }
 0x152   : > { %v6366_v5 = vpop.f32.mrb[5].mxu0  ;;  %6372 = vmatmul.mubr.msk.f32.vlgmr.msra.gmra.mrb[4].mxu1 %vm397_vm8, %v1010_v14 }
 0x153   : > { %6659 = vmatpush3.bf16.msra.mxu1 %v7347_v36  ;;  %6385 = vmatprep.mubr.msk.f32.mxu1 %vm7041_vm0, %v7042_v1 }
 0x154   : > { %6663 = vmatprep.subr.bf16.mxu1 %v7040_v0 }
 0x158   : > { %v1281_v6 = vpop.f32.mrb[6].mxu0 }
 0x159   : > { %v6380_v7 = vpop.f32.mrb[7].mxu0  ;;  %6386 = vmatmul.mubr.msk.f32.vlgmr.msra.gmra.mrb[6].mxu1 %vm397_vm8, %v1281_v6 }
 0x15a   : > { %6665 = vmatpush3.bf16.msra.mxu1 %v7347_v36  ;;  %6399 = vmatprep.mubr.msk.f32.mxu1 %vm7041_vm0, %v7042_v1 }
 0x15b   : > { %6669 = vmatprep.subr.bf16.mxu1 %v7040_v0 }
 0x15f   : > { %v1552_v8 = vpop.f32.mrb[8].mxu0 }
 0x160   : > { %v6394_v9 = vpop.f32.mrb[9].mxu0  ;;  %6400 = vmatmul.mubr.msk.f32.vlgmr.msra.gmra.mrb[8].mxu1 %vm397_vm8, %v1552_v8 }
 0x161   : > { %6671 = vmatpush3.bf16.msra.mxu1 %v7347_v36  ;;  %6413 = vmatprep.mubr.msk.f32.mxu1 %vm7041_vm0, %v7042_v1 }
 0x162   : > { %6675 = vmatprep.subr.bf16.mxu1 %v7040_v0 }
 0x167   : > { %v1823_v10 = vpop.f32.mrb[10].mxu0 }
 0x168   : > { %v6408_v11 = vpop.f32.mrb[11].mxu0  ;;  %6414 = vmatmul.mubr.msk.f32.vlgmr.msra.gmra.mrb[10].mxu1 %vm397_vm8, %v1823_v10 }
 0x169   : > { %6677 = vmatpush3.bf16.msra.mxu1 %v7347_v36  ;;  %6427 = vmatprep.mubr.msk.f32.mxu1 %vm7041_vm0, %v7042_v1 }
 0x16a   : > { %6681 = vmatprep.subr.bf16.mxu1 %v7040_v0 }
 0x16f   : > { %v2094_v13 = vpop.f32.mrb[12].mxu0 }
 0x170   : > { %v6422_v15 = vpop.f32.mrb[13].mxu0  ;;  %6428 = vmatmul.mubr.msk.f32.vlgmr.msra.gmra.mrb[12].mxu1 %vm397_vm8, %v2094_v13 }
 0x171   : > { %6683 = vmatpush3.bf16.msra.mxu1 %v7347_v36  ;;  %6441 = vmatprep.mubr.msk.f32.mxu1 %vm7041_vm0, %v7042_v1 }
 0x172   : > { %6687 = vmatprep.subr.bf16.mxu1 %v7040_v0 }
 0x176   : > { %v2365_v16 = vpop.f32.mrb[14].mxu0 }
 0x177   : > { %v6436_v17 = vpop.f32.mrb[15].mxu0  ;;  %6442 = vmatmul.mubr.msk.f32.vlgmr.msra.gmra.mrb[14].mxu1 %vm397_vm8, %v2365_v16 }
 0x178   : > { %6689 = vmatpush3.bf16.msra.mxu1 %v7347_v36  ;;  %6455 = vmatprep.mubr.msk.f32.mxu1 %vm7041_vm0, %v7042_v1 }
 0x179   : > { %6693 = vmatprep.subr.bf16.mxu1 %v7040_v0 }
 0x17e   : > { %v2636_v18 = vpop.f32.mrb[16].mxu0 }
 0x17f   : > { %v6450_v19 = vpop.f32.mrb[17].mxu0  ;;  %6456 = vmatmul.mubr.msk.f32.vlgmr.msra.gmra.mrb[16].mxu1 %vm397_vm8, %v2636_v18 }
 0x180   : > { %6695 = vmatpush3.bf16.msra.mxu1 %v7347_v36  ;;  %6469 = vmatprep.mubr.msk.f32.mxu1 %vm7041_vm0, %v7042_v1 }
 0x181   : > { %6699 = vmatprep.subr.bf16.mxu1 %v7040_v0 }
 0x186   : > { %v2907_v20 = vpop.f32.mrb[18].mxu0 }
 0x187   : > { %v6464_v21 = vpop.f32.mrb[19].mxu0  ;;  %6470 = vmatmul.mubr.msk.f32.vlgmr.msra.gmra.mrb[18].mxu1 %vm397_vm8, %v2907_v20 }
 0x188   : > { %6701 = vmatpush3.bf16.msra.mxu1 %v7347_v36  ;;  %6483 = vmatprep.mubr.msk.f32.mxu1 %vm7041_vm0, %v7042_v1 }
 0x189   : > { %6705 = vmatprep.subr.bf16.mxu1 %v7040_v0 }
 0x18e   : > { %v3178_v22 = vpop.f32.mrb[20].mxu0 }
 0x18f   : > { %v6478_v23 = vpop.f32.mrb[21].mxu0  ;;  %6484 = vmatmul.mubr.msk.f32.vlgmr.msra.gmra.mrb[20].mxu1 %vm397_vm8, %v3178_v22 }
 0x190   : > { %6707 = vmatpush3.bf16.msra.mxu1 %v7347_v36  ;;  %6497 = vmatprep.mubr.msk.f32.mxu1 %vm7041_vm0, %v7042_v1 }
 0x191   : > { %6711 = vmatprep.subr.bf16.mxu1 %v7040_v0 }
 0x196   : > { %v3449_v24 = vpop.f32.mrb[22].mxu0 }
 0x197   : > { %v6492_v25 = vpop.f32.mrb[23].mxu0  ;;  %6498 = vmatmul.mubr.msk.f32.vlgmr.msra.gmra.mrb[22].mxu1 %vm397_vm8, %v3449_v24 }
 0x198   : > { %6713 = vmatpush3.bf16.msra.mxu1 %v7347_v36  ;;  %6511 = vmatprep.mubr.msk.f32.mxu1 %vm7041_vm0, %v7042_v1 }
 0x199   : > { %6717 = vmatprep.subr.bf16.mxu1 %v7040_v0 }
 0x19e   : > { %v3720_v26 = vpop.f32.mrb[24].mxu0 }
 0x19f   : > { %v6506_v27 = vpop.f32.mrb[25].mxu0  ;;  %6512 = vmatmul.mubr.msk.f32.vlgmr.msra.gmra.mrb[24].mxu1 %vm397_vm8, %v3720_v26 }
 0x1a0   : > { %6719 = vmatpush3.bf16.msra.mxu1 %v7347_v36  ;;  %6525 = vmatprep.mubr.msk.f32.mxu1 %vm7041_vm0, %v7042_v1 }
 0x1a1   : > { %6723 = vmatprep.subr.bf16.mxu1 %v7040_v0 }
 0x1a5   : > { %v3991_v28 = vpop.f32.mrb[26].mxu0 }
 0x1a6   : > { %v6520_v29 = vpop.f32.mrb[27].mxu0  ;;  %6526 = vmatmul.mubr.msk.f32.vlgmr.msra.gmra.mrb[26].mxu1 %vm397_vm8, %v3991_v28 }
 0x1a7   : > { %6725 = vmatpush3.bf16.msra.mxu1 %v7347_v36  ;;  %6539 = vmatprep.mubr.msk.f32.mxu1 %vm7041_vm0, %v7042_v1 }
 0x1a8   : > { %6729 = vmatprep.subr.bf16.mxu1 %v7040_v0 }
 0x1ad   : > { %v4262_v30 = vpop.f32.mrb[28].mxu0 }
 0x1ae   : > { %v6534_v31 = vpop.f32.mrb[29].mxu0  ;;  %6540 = vmatmul.mubr.msk.f32.vlgmr.msra.gmra.mrb[28].mxu1 %vm397_vm8, %v4262_v30 }
 0x1af   : > { %6731 = vmatpush3.bf16.msra.mxu1 %v7347_v36  ;;  %6553 = vmatprep.mubr.msk.f32.mxu1 %vm7041_vm0, %v7042_v1 }
 0x1b4   : > { %v4533_v12 = vpop.f32.mrb[30].mxu0 }
 0x1b5   : > { %v6548_v32 = vpop.f32.mrb[31].mxu0  ;;  %6554 = vmatmul.mubr.msk.f32.vlgmr.msra.gmra.mrb[30].mxu1 %vm397_vm8, %v4533_v12 }
 0x1b6   : > { %6570 = vmatprep.mubr.msk.f32.mxu1 %vm397_vm8, %v7943_v56 }
 0x214   : > { %v540_v0 = vpop.f32.mrb[0].mxu1 }
 0x215   : > { %v545_v40 = vcombine.high %v540_v0, %v540_v0  ;;  %v552_v41 = vrot.slane %v540_v0, %v7924_v39  ;;  %v6345_v42 = vpop.f32.mrb[1].mxu1 }
 0x217   : > { %v559_v36 = vrot.slane %v545_v40, %v7924_v39  ;;  %v560_v1 = vcombine.high %v552_v41, %v552_v41  ;;  %v568_v43 = vrot.slane %v552_v41, %v7924_v39 }
 0x219   : > { %v561_v44 = vcombine.high %v559_v36, %v559_v36  ;;  %v575_v45 = vrot.slane %v559_v36, %v7924_v39  ;;  %v582_v46 = vrot.slane %v560_v1, %v7924_v39  ;;  %v590_v47 = vcombine.high %v568_v43, %v568_v43  ;;  %603 = vst.msk [vmem:[#allocation2] sm:$0x1] %vm602_vm9, %v568_v43 }
 0x21b   : > { %v589_v48 = vrot.slane %v561_v44, %v7924_v39  ;;  %v591_v49 = vcombine.high %v575_v45, %v575_v45  ;;  %v592_v50 = vcombine.high %v582_v46, %v582_v46  ;;  %604 = vst.msk [vmem:[#allocation2 + $0x10] sm:$0x1] %vm602_vm9, %v582_v46  ;;  %605 = vst.msk [vmem:[#allocation2 + $0x20] sm:$0x1] %vm602_vm9, %v590_v47 }
 0x21c   : > { %607 = vst.msk [vmem:[#allocation2 + $0x40] sm:$0x1] %vm602_vm9, %v575_v45 }
 0x21d   : > { %v593_v51 = vcombine.high %v589_v48, %v589_v48  ;;  %606 = vst.msk [vmem:[#allocation2 + $0x30] sm:$0x1] %vm602_vm9, %v592_v50  ;;  %608 = vst.msk [vmem:[#allocation2 + $0x50] sm:$0x1] %vm602_vm9, %v589_v48  ;;  %v812_v52 = vpop.f32.mrb[2].mxu1 }
 0x21e   : > { %609 = vst.msk [vmem:[#allocation2 + $0x60] sm:$0x1] %vm602_vm9, %v591_v49  ;;  %v817_v53 = vcombine.high %v812_v52, %v812_v52  ;;  %v824_v54 = vrot.slane %v812_v52, %v7924_v39  ;;  %v6359_v55 = vpop.f32.mrb[3].mxu1 }
 0x21f   : > { %610 = vst.msk [vmem:[#allocation2 + $0x70] sm:$0x1] %vm602_vm9, %v593_v51 }
 0x220   : > { %v831_v57 = vrot.slane %v817_v53, %v7924_v39  ;;  %v832_v58 = vcombine.high %v824_v54, %v824_v54  ;;  %v840_v59 = vrot.slane %v824_v54, %v7924_v39 }
 0x222   : > { %v833_v60 = vcombine.high %v831_v57, %v831_v57  ;;  %v847_v61 = vrot.slane %v831_v57, %v7924_v39  ;;  %v854_v62 = vrot.slane %v832_v58, %v7924_v39  ;;  %v862_v63 = vcombine.high %v840_v59, %v840_v59  ;;  %874 = vst.msk [vmem:[#allocation2 + $0x1] sm:$0x1] %vm602_vm9, %v840_v59 }
 0x224   : > { %v861_v2 = vrot.slane %v833_v60, %v7924_v39  ;;  %v863_v3 = vcombine.high %v847_v61, %v847_v61  ;;  %v864_v4 = vcombine.high %v854_v62, %v854_v62  ;;  %875 = vst.msk [vmem:[#allocation2 + $0x11] sm:$0x1] %vm602_vm9, %v854_v62  ;;  %876 = vst.msk [vmem:[#allocation2 + $0x21] sm:$0x1] %vm602_vm9, %v862_v63 }
 0x225   : > { %878 = vst.msk [vmem:[#allocation2 + $0x41] sm:$0x1] %vm602_vm9, %v847_v61  ;;  %v1083_v14 = vpop.f32.mrb[4].mxu1 }
 0x226   : > { %v865_v5 = vcombine.high %v861_v2, %v861_v2  ;;  %877 = vst.msk [vmem:[#allocation2 + $0x31] sm:$0x1] %vm602_vm9, %v864_v4  ;;  %879 = vst.msk [vmem:[#allocation2 + $0x51] sm:$0x1] %vm602_vm9, %v861_v2  ;;  %v1088_v6 = vcombine.high %v1083_v14, %v1083_v14  ;;  %v1095_v7 = vrot.slane %v1083_v14, %v7924_v39  ;;  %v6373_v8 = vpop.f32.mrb[5].mxu1 }
 0x227   : > { %880 = vst.msk [vmem:[#allocation2 + $0x61] sm:$0x1] %vm602_vm9, %v863_v3 }
 0x228   : > { %881 = vst.msk [vmem:[#allocation2 + $0x71] sm:$0x1] %vm602_vm9, %v865_v5  ;;  %v1102_v9 = vrot.slane %v1088_v6, %v7924_v39  ;;  %v1103_v10 = vcombine.high %v1095_v7, %v1095_v7  ;;  %v1111_v11 = vrot.slane %v1095_v7, %v7924_v39 }
 0x22a   : > { %v1104_v13 = vcombine.high %v1102_v9, %v1102_v9  ;;  %v1118_v15 = vrot.slane %v1102_v9, %v7924_v39  ;;  %v1125_v16 = vrot.slane %v1103_v10, %v7924_v39  ;;  %v1133_v17 = vcombine.high %v1111_v11, %v1111_v11  ;;  %1145 = vst.msk [vmem:[#allocation2 + $0x2] sm:$0x1] %vm602_vm9, %v1111_v11 }
 0x22c   : > { %v1132_v18 = vrot.slane %v1104_v13, %v7924_v39  ;;  %v1134_v19 = vcombine.high %v1118_v15, %v1118_v15  ;;  %v1135_v20 = vcombine.high %v1125_v16, %v1125_v16  ;;  %1146 = vst.msk [vmem:[#allocation2 + $0x12] sm:$0x1] %vm602_vm9, %v1125_v16  ;;  %1147 = vst.msk [vmem:[#allocation2 + $0x22] sm:$0x1] %vm602_vm9, %v1133_v17  ;;  %v1354_v21 = vpop.f32.mrb[6].mxu1 }
 0x22d   : > { %1149 = vst.msk [vmem:[#allocation2 + $0x42] sm:$0x1] %vm602_vm9, %v1118_v15  ;;  %v1359_v23 = vcombine.high %v1354_v21, %v1354_v21  ;;  %v1366_v24 = vrot.slane %v1354_v21, %v7924_v39  ;;  %v6387_v25 = vpop.f32.mrb[7].mxu1 }
 0x22e   : > { %v1136_v22 = vcombine.high %v1132_v18, %v1132_v18  ;;  %1148 = vst.msk [vmem:[#allocation2 + $0x32] sm:$0x1] %vm602_vm9, %v1135_v20  ;;  %1150 = vst.msk [vmem:[#allocation2 + $0x52] sm:$0x1] %vm602_vm9, %v1132_v18 }
 0x22f   : > { %1151 = vst.msk [vmem:[#allocation2 + $0x62] sm:$0x1] %vm602_vm9, %v1134_v19  ;;  %v1373_v26 = vrot.slane %v1359_v23, %v7924_v39  ;;  %v1374_v27 = vcombine.high %v1366_v24, %v1366_v24  ;;  %v1382_v28 = vrot.slane %v1366_v24, %v7924_v39 }
 0x230   : > { %1152 = vst.msk [vmem:[#allocation2 + $0x72] sm:$0x1] %vm602_vm9, %v1136_v22 }
 0x231   : > { %v1375_v29 = vcombine.high %v1373_v26, %v1373_v26  ;;  %v1389_v30 = vrot.slane %v1373_v26, %v7924_v39  ;;  %v1396_v31 = vrot.slane %v1374_v27, %v7924_v39  ;;  %v1404_v12 = vcombine.high %v1382_v28, %v1382_v28  ;;  %1416 = vst.msk [vmem:[#allocation2 + $0x3] sm:$0x1] %vm602_vm9, %v1382_v28 }
 0x233   : > { %v1403_v32 = vrot.slane %v1375_v29, %v7924_v39  ;;  %v1405_v33 = vcombine.high %v1389_v30, %v1389_v30  ;;  %v1406_v34 = vcombine.high %v1396_v31, %v1396_v31  ;;  %1417 = vst.msk [vmem:[#allocation2 + $0x13] sm:$0x1] %vm602_vm9, %v1396_v31  ;;  %1418 = vst.msk [vmem:[#allocation2 + $0x23] sm:$0x1] %vm602_vm9, %v1404_v12  ;;  %v1625_v37 = vpop.f32.mrb[8].mxu1 }
 0x234   : > { %1420 = vst.msk [vmem:[#allocation2 + $0x43] sm:$0x1] %vm602_vm9, %v1389_v30  ;;  %v1630_v38 = vcombine.high %v1625_v37, %v1625_v37  ;;  %v1637_v0 = vrot.slane %v1625_v37, %v7924_v39  ;;  %v6401_v40 = vpop.f32.mrb[9].mxu1 }
 0x235   : > { %v1407_v35 = vcombine.high %v1403_v32, %v1403_v32  ;;  %1419 = vst.msk [vmem:[#allocation2 + $0x33] sm:$0x1] %vm602_vm9, %v1406_v34  ;;  %1421 = vst.msk [vmem:[#allocation2 + $0x53] sm:$0x1] %vm602_vm9, %v1403_v32 }
 0x236   : > { %1422 = vst.msk [vmem:[#allocation2 + $0x63] sm:$0x1] %vm602_vm9, %v1405_v33  ;;  %v1644_v41 = vrot.slane %v1630_v38, %v7924_v39  ;;  %v1645_v42 = vcombine.high %v1637_v0, %v1637_v0  ;;  %v1653_v36 = vrot.slane %v1637_v0, %v7924_v39 }
 0x237   : > { %1423 = vst.msk [vmem:[#allocation2 + $0x73] sm:$0x1] %vm602_vm9, %v1407_v35 }
 0x238   : > { %v1646_v1 = vcombine.high %v1644_v41, %v1644_v41  ;;  %v1660_v43 = vrot.slane %v1644_v41, %v7924_v39  ;;  %v1667_v44 = vrot.slane %v1645_v42, %v7924_v39  ;;  %v1675_v45 = vcombine.high %v1653_v36, %v1653_v36  ;;  %1687 = vst.msk [vmem:[#allocation2 + $0x4] sm:$0x1] %vm602_vm9, %v1653_v36 }
 0x23a   : > { %v1674_v46 = vrot.slane %v1646_v1, %v7924_v39  ;;  %v1676_v47 = vcombine.high %v1660_v43, %v1660_v43  ;;  %v1677_v48 = vcombine.high %v1667_v44, %v1667_v44  ;;  %1688 = vst.msk [vmem:[#allocation2 + $0x14] sm:$0x1] %vm602_vm9, %v1667_v44  ;;  %1689 = vst.msk [vmem:[#allocation2 + $0x24] sm:$0x1] %vm602_vm9, %v1675_v45 }
 0x23b   : > { %1691 = vst.msk [vmem:[#allocation2 + $0x44] sm:$0x1] %vm602_vm9, %v1660_v43  ;;  %v1896_v49 = vpop.f32.mrb[10].mxu1 }
 0x23c   : > { %v1678_v50 = vcombine.high %v1674_v46, %v1674_v46  ;;  %1690 = vst.msk [vmem:[#allocation2 + $0x34] sm:$0x1] %vm602_vm9, %v1677_v48  ;;  %1692 = vst.msk [vmem:[#allocation2 + $0x54] sm:$0x1] %vm602_vm9, %v1674_v46  ;;  %v1901_v51 = vcombine.high %v1896_v49, %v1896_v49  ;;  %v1908_v52 = vrot.slane %v1896_v49, %v7924_v39  ;;  %v6415_v53 = vpop.f32.mrb[11].mxu1 }
 0x23d   : > { %1693 = vst.msk [vmem:[#allocation2 + $0x64] sm:$0x1] %vm602_vm9, %v1676_v47 }
 0x23e   : > { %1694 = vst.msk [vmem:[#allocation2 + $0x74] sm:$0x1] %vm602_vm9, %v1678_v50  ;;  %v1915_v54 = vrot.slane %v1901_v51, %v7924_v39  ;;  %v1916_v55 = vcombine.high %v1908_v52, %v1908_v52  ;;  %v1924_v57 = vrot.slane %v1908_v52, %v7924_v39 }
 0x240   : > { %v1917_v58 = vcombine.high %v1915_v54, %v1915_v54  ;;  %v1931_v59 = vrot.slane %v1915_v54, %v7924_v39  ;;  %v1938_v60 = vrot.slane %v1916_v55, %v7924_v39  ;;  %v1946_v61 = vcombine.high %v1924_v57, %v1924_v57  ;;  %1958 = vst.msk [vmem:[#allocation2 + $0x5] sm:$0x1] %vm602_vm9, %v1924_v57 }
 0x242   : > { %v1945_v62 = vrot.slane %v1917_v58, %v7924_v39  ;;  %v1947_v63 = vcombine.high %v1931_v59, %v1931_v59  ;;  %v1948_v2 = vcombine.high %v1938_v60, %v1938_v60  ;;  %1959 = vst.msk [vmem:[#allocation2 + $0x15] sm:$0x1] %vm602_vm9, %v1938_v60  ;;  %1960 = vst.msk [vmem:[#allocation2 + $0x25] sm:$0x1] %vm602_vm9, %v1946_v61 }
 0x243   : > { %1962 = vst.msk [vmem:[#allocation2 + $0x45] sm:$0x1] %vm602_vm9, %v1931_v59  ;;  %v2167_v3 = vpop.f32.mrb[12].mxu1 }
 0x244   : > { %v1949_v4 = vcombine.high %v1945_v62, %v1945_v62  ;;  %1961 = vst.msk [vmem:[#allocation2 + $0x35] sm:$0x1] %vm602_vm9, %v1948_v2  ;;  %1963 = vst.msk [vmem:[#allocation2 + $0x55] sm:$0x1] %vm602_vm9, %v1945_v62  ;;  %v2172_v14 = vcombine.high %v2167_v3, %v2167_v3  ;;  %v2179_v5 = vrot.slane %v2167_v3, %v7924_v39  ;;  %v6429_v6 = vpop.f32.mrb[13].mxu1 }
 0x245   : > { %1964 = vst.msk [vmem:[#allocation2 + $0x65] sm:$0x1] %vm602_vm9, %v1947_v63 }
 0x246   : > { %1965 = vst.msk [vmem:[#allocation2 + $0x75] sm:$0x1] %vm602_vm9, %v1949_v4  ;;  %v2186_v7 = vrot.slane %v2172_v14, %v7924_v39  ;;  %v2187_v8 = vcombine.high %v2179_v5, %v2179_v5  ;;  %v2195_v9 = vrot.slane %v2179_v5, %v7924_v39 }
 0x248   : > { %v2188_v10 = vcombine.high %v2186_v7, %v2186_v7  ;;  %v2202_v11 = vrot.slane %v2186_v7, %v7924_v39  ;;  %v2209_v13 = vrot.slane %v2187_v8, %v7924_v39  ;;  %v2217_v15 = vcombine.high %v2195_v9, %v2195_v9  ;;  %2229 = vst.msk [vmem:[#allocation2 + $0x6] sm:$0x1] %vm602_vm9, %v2195_v9 }
 0x24a   : > { %v2216_v16 = vrot.slane %v2188_v10, %v7924_v39  ;;  %v2218_v17 = vcombine.high %v2202_v11, %v2202_v11  ;;  %v2219_v18 = vcombine.high %v2209_v13, %v2209_v13  ;;  %2230 = vst.msk [vmem:[#allocation2 + $0x16] sm:$0x1] %vm602_vm9, %v2209_v13  ;;  %2231 = vst.msk [vmem:[#allocation2 + $0x26] sm:$0x1] %vm602_vm9, %v2217_v15  ;;  %v2438_v19 = vpop.f32.mrb[14].mxu1 }
 0x24b   : > { %2233 = vst.msk [vmem:[#allocation2 + $0x46] sm:$0x1] %vm602_vm9, %v2202_v11  ;;  %v2443_v20 = vcombine.high %v2438_v19, %v2438_v19  ;;  %v2450_v21 = vrot.slane %v2438_v19, %v7924_v39  ;;  %v6443_v22 = vpop.f32.mrb[15].mxu1 }
 0x24c   : > { %v2220_v23 = vcombine.high %v2216_v16, %v2216_v16  ;;  %2232 = vst.msk [vmem:[#allocation2 + $0x36] sm:$0x1] %vm602_vm9, %v2219_v18  ;;  %2234 = vst.msk [vmem:[#allocation2 + $0x56] sm:$0x1] %vm602_vm9, %v2216_v16 }
 0x24d   : > { %2235 = vst.msk [vmem:[#allocation2 + $0x66] sm:$0x1] %vm602_vm9, %v2218_v17  ;;  %v2457_v24 = vrot.slane %v2443_v20, %v7924_v39  ;;  %v2458_v25 = vcombine.high %v2450_v21, %v2450_v21  ;;  %v2466_v26 = vrot.slane %v2450_v21, %v7924_v39 }
 0x24e   : > { %2236 = vst.msk [vmem:[#allocation2 + $0x76] sm:$0x1] %vm602_vm9, %v2220_v23 }
 0x24f   : > { %v2459_v27 = vcombine.high %v2457_v24, %v2457_v24  ;;  %v2473_v28 = vrot.slane %v2457_v24, %v7924_v39  ;;  %v2480_v29 = vrot.slane %v2458_v25, %v7924_v39  ;;  %v2488_v30 = vcombine.high %v2466_v26, %v2466_v26  ;;  %2500 = vst.msk [vmem:[#allocation2 + $0x7] sm:$0x1] %vm602_vm9, %v2466_v26 }
 0x251   : > { %v2487_v31 = vrot.slane %v2459_v27, %v7924_v39  ;;  %v2489_v12 = vcombine.high %v2473_v28, %v2473_v28  ;;  %v2490_v32 = vcombine.high %v2480_v29, %v2480_v29  ;;  %2501 = vst.msk [vmem:[#allocation2 + $0x17] sm:$0x1] %vm602_vm9, %v2480_v29  ;;  %2502 = vst.msk [vmem:[#allocation2 + $0x27] sm:$0x1] %vm602_vm9, %v2488_v30 }
 0x252   : > { %2504 = vst.msk [vmem:[#allocation2 + $0x47] sm:$0x1] %vm602_vm9, %v2473_v28  ;;  %v2709_v33 = vpop.f32.mrb[16].mxu1 }
 0x253   : > { %v2491_v34 = vcombine.high %v2487_v31, %v2487_v31  ;;  %2503 = vst.msk [vmem:[#allocation2 + $0x37] sm:$0x1] %vm602_vm9, %v2490_v32  ;;  %2505 = vst.msk [vmem:[#allocation2 + $0x57] sm:$0x1] %vm602_vm9, %v2487_v31  ;;  %v2714_v35 = vcombine.high %v2709_v33, %v2709_v33  ;;  %v2721_v37 = vrot.slane %v2709_v33, %v7924_v39  ;;  %v6457_v38 = vpop.f32.mrb[17].mxu1 }
 0x254   : > { %2506 = vst.msk [vmem:[#allocation2 + $0x67] sm:$0x1] %vm602_vm9, %v2489_v12 }
 0x255   : > { %2507 = vst.msk [vmem:[#allocation2 + $0x77] sm:$0x1] %vm602_vm9, %v2491_v34  ;;  %v2728_v0 = vrot.slane %v2714_v35, %v7924_v39  ;;  %v2729_v40 = vcombine.high %v2721_v37, %v2721_v37  ;;  %v2737_v41 = vrot.slane %v2721_v37, %v7924_v39 }
 0x257   : > { %v2730_v42 = vcombine.high %v2728_v0, %v2728_v0  ;;  %v2744_v36 = vrot.slane %v2728_v0, %v7924_v39  ;;  %v2751_v1 = vrot.slane %v2729_v40, %v7924_v39  ;;  %v2759_v43 = vcombine.high %v2737_v41, %v2737_v41  ;;  %2771 = vst.msk [vmem:[#allocation2 + $0x8] sm:$0x1] %vm602_vm9, %v2737_v41 }
 0x259   : > { %v2758_v44 = vrot.slane %v2730_v42, %v7924_v39  ;;  %v2760_v45 = vcombine.high %v2744_v36, %v2744_v36  ;;  %v2761_v46 = vcombine.high %v2751_v1, %v2751_v1  ;;  %2772 = vst.msk [vmem:[#allocation2 + $0x18] sm:$0x1] %vm602_vm9, %v2751_v1  ;;  %2773 = vst.msk [vmem:[#allocation2 + $0x28] sm:$0x1] %vm602_vm9, %v2759_v43 }
 0x25a   : > { %2775 = vst.msk [vmem:[#allocation2 + $0x48] sm:$0x1] %vm602_vm9, %v2744_v36  ;;  %v2980_v47 = vpop.f32.mrb[18].mxu1 }
 0x25b   : > { %v2762_v48 = vcombine.high %v2758_v44, %v2758_v44  ;;  %2774 = vst.msk [vmem:[#allocation2 + $0x38] sm:$0x1] %vm602_vm9, %v2761_v46  ;;  %2776 = vst.msk [vmem:[#allocation2 + $0x58] sm:$0x1] %vm602_vm9, %v2758_v44  ;;  %v2985_v49 = vcombine.high %v2980_v47, %v2980_v47  ;;  %v2992_v50 = vrot.slane %v2980_v47, %v7924_v39  ;;  %v6471_v51 = vpop.f32.mrb[19].mxu1 }
 0x25c   : > { %2777 = vst.msk [vmem:[#allocation2 + $0x68] sm:$0x1] %vm602_vm9, %v2760_v45 }
 0x25d   : > { %2778 = vst.msk [vmem:[#allocation2 + $0x78] sm:$0x1] %vm602_vm9, %v2762_v48  ;;  %v2999_v52 = vrot.slane %v2985_v49, %v7924_v39  ;;  %v3000_v53 = vcombine.high %v2992_v50, %v2992_v50  ;;  %v3008_v54 = vrot.slane %v2992_v50, %v7924_v39 }
 0x25f   : > { %v3001_v55 = vcombine.high %v2999_v52, %v2999_v52  ;;  %v3015_v57 = vrot.slane %v2999_v52, %v7924_v39  ;;  %v3022_v58 = vrot.slane %v3000_v53, %v7924_v39  ;;  %v3030_v59 = vcombine.high %v3008_v54, %v3008_v54  ;;  %3042 = vst.msk [vmem:[#allocation2 + $0x9] sm:$0x1] %vm602_vm9, %v3008_v54 }
 0x261   : > { %v3029_v60 = vrot.slane %v3001_v55, %v7924_v39  ;;  %v3031_v61 = vcombine.high %v3015_v57, %v3015_v57  ;;  %v3032_v62 = vcombine.high %v3022_v58, %v3022_v58  ;;  %3043 = vst.msk [vmem:[#allocation2 + $0x19] sm:$0x1] %vm602_vm9, %v3022_v58  ;;  %3044 = vst.msk [vmem:[#allocation2 + $0x29] sm:$0x1] %vm602_vm9, %v3030_v59 }
 0x262   : > { %3046 = vst.msk [vmem:[#allocation2 + $0x49] sm:$0x1] %vm602_vm9, %v3015_v57  ;;  %v3251_v2 = vpop.f32.mrb[20].mxu1 }
 0x263   : > { %v3033_v63 = vcombine.high %v3029_v60, %v3029_v60  ;;  %3045 = vst.msk [vmem:[#allocation2 + $0x39] sm:$0x1] %vm602_vm9, %v3032_v62  ;;  %3047 = vst.msk [vmem:[#allocation2 + $0x59] sm:$0x1] %vm602_vm9, %v3029_v60  ;;  %v3256_v3 = vcombine.high %v3251_v2, %v3251_v2  ;;  %v3263_v4 = vrot.slane %v3251_v2, %v7924_v39  ;;  %v6485_v14 = vpop.f32.mrb[21].mxu1 }
 0x264   : > { %3048 = vst.msk [vmem:[#allocation2 + $0x69] sm:$0x1] %vm602_vm9, %v3031_v61 }
 0x265   : > { %3049 = vst.msk [vmem:[#allocation2 + $0x79] sm:$0x1] %vm602_vm9, %v3033_v63  ;;  %v3270_v5 = vrot.slane %v3256_v3, %v7924_v39  ;;  %v3271_v6 = vcombine.high %v3263_v4, %v3263_v4  ;;  %v3279_v7 = vrot.slane %v3263_v4, %v7924_v39 }
 0x267   : > { %v3272_v8 = vcombine.high %v3270_v5, %v3270_v5  ;;  %v3286_v9 = vrot.slane %v3270_v5, %v7924_v39  ;;  %v3293_v10 = vrot.slane %v3271_v6, %v7924_v39  ;;  %v3301_v11 = vcombine.high %v3279_v7, %v3279_v7  ;;  %3313 = vst.msk [vmem:[#allocation2 + $0xa] sm:$0x1] %vm602_vm9, %v3279_v7 }
 0x269   : > { %v3300_v13 = vrot.slane %v3272_v8, %v7924_v39  ;;  %v3302_v15 = vcombine.high %v3286_v9, %v3286_v9  ;;  %v3303_v16 = vcombine.high %v3293_v10, %v3293_v10  ;;  %3314 = vst.msk [vmem:[#allocation2 + $0x1a] sm:$0x1] %vm602_vm9, %v3293_v10  ;;  %3315 = vst.msk [vmem:[#allocation2 + $0x2a] sm:$0x1] %vm602_vm9, %v3301_v11 }
 0x26a   : > { %3317 = vst.msk [vmem:[#allocation2 + $0x4a] sm:$0x1] %vm602_vm9, %v3286_v9  ;;  %v3522_v17 = vpop.f32.mrb[22].mxu1 }
 0x26b   : > { %v3304_v18 = vcombine.high %v3300_v13, %v3300_v13  ;;  %3316 = vst.msk [vmem:[#allocation2 + $0x3a] sm:$0x1] %vm602_vm9, %v3303_v16  ;;  %3318 = vst.msk [vmem:[#allocation2 + $0x5a] sm:$0x1] %vm602_vm9, %v3300_v13  ;;  %v3527_v19 = vcombine.high %v3522_v17, %v3522_v17  ;;  %v3534_v20 = vrot.slane %v3522_v17, %v7924_v39  ;;  %v6499_v21 = vpop.f32.mrb[23].mxu1 }
 0x26c   : > { %3319 = vst.msk [vmem:[#allocation2 + $0x6a] sm:$0x1] %vm602_vm9, %v3302_v15 }
 0x26d   : > { %3320 = vst.msk [vmem:[#allocation2 + $0x7a] sm:$0x1] %vm602_vm9, %v3304_v18  ;;  %v3541_v22 = vrot.slane %v3527_v19, %v7924_v39  ;;  %v3542_v23 = vcombine.high %v3534_v20, %v3534_v20  ;;  %v3550_v24 = vrot.slane %v3534_v20, %v7924_v39 }
 0x26f   : > { %v3543_v25 = vcombine.high %v3541_v22, %v3541_v22  ;;  %v3557_v26 = vrot.slane %v3541_v22, %v7924_v39  ;;  %v3564_v27 = vrot.slane %v3542_v23, %v7924_v39  ;;  %v3572_v28 = vcombine.high %v3550_v24, %v3550_v24  ;;  %3584 = vst.msk [vmem:[#allocation2 + $0xb] sm:$0x1] %vm602_vm9, %v3550_v24 }
 0x271   : > { %v3571_v29 = vrot.slane %v3543_v25, %v7924_v39  ;;  %v3573_v30 = vcombine.high %v3557_v26, %v3557_v26  ;;  %v3574_v31 = vcombine.high %v3564_v27, %v3564_v27  ;;  %3585 = vst.msk [vmem:[#allocation2 + $0x1b] sm:$0x1] %vm602_vm9, %v3564_v27  ;;  %3586 = vst.msk [vmem:[#allocation2 + $0x2b] sm:$0x1] %vm602_vm9, %v3572_v28 }
 0x272   : > { %3588 = vst.msk [vmem:[#allocation2 + $0x4b] sm:$0x1] %vm602_vm9, %v3557_v26  ;;  %v3793_v12 = vpop.f32.mrb[24].mxu1 }
 0x273   : > { %v3575_v32 = vcombine.high %v3571_v29, %v3571_v29  ;;  %3587 = vst.msk [vmem:[#allocation2 + $0x3b] sm:$0x1] %vm602_vm9, %v3574_v31  ;;  %3589 = vst.msk [vmem:[#allocation2 + $0x5b] sm:$0x1] %vm602_vm9, %v3571_v29  ;;  %v3798_v33 = vcombine.high %v3793_v12, %v3793_v12  ;;  %v3805_v34 = vrot.slane %v3793_v12, %v7924_v39  ;;  %v6513_v35 = vpop.f32.mrb[25].mxu1  ;;  %v4676_v31 = vld [vmem:[#allocation2] sm:$0xff] }
 0x274   : > { %3590 = vst.msk [vmem:[#allocation2 + $0x6b] sm:$0x1] %vm602_vm9, %v3573_v30 }
 0x275   : > { %3591 = vst.msk [vmem:[#allocation2 + $0x7b] sm:$0x1] %vm602_vm9, %v3575_v32  ;;  %v3812_v37 = vrot.slane %v3798_v33, %v7924_v39  ;;  %v3813_v38 = vcombine.high %v3805_v34, %v3805_v34  ;;  %v3821_v0 = vrot.slane %v3805_v34, %v7924_v39  ;;  %v4840_v32 = vld [vmem:[#allocation2 + $0x10] sm:$0xff]  ;;  %v4992_v34 = vld [vmem:[#allocation2 + $0x20] sm:$0xff] }
 0x277   : > { %v3814_v40 = vcombine.high %v3812_v37, %v3812_v37  ;;  %v3828_v41 = vrot.slane %v3812_v37, %v7924_v39  ;;  %v3835_v42 = vrot.slane %v3813_v38, %v7924_v39  ;;  %v3843_v36 = vcombine.high %v3821_v0, %v3821_v0  ;;  %3855 = vst.msk [vmem:[#allocation2 + $0xc] sm:$0x1] %vm602_vm9, %v3821_v0  ;;  %v323_v0 = vld [vmem:[%s8677_s2 + $0x8] sm:$0xff] }
 0x279   : > { %v3842_v1 = vrot.slane %v3814_v40, %v7924_v39  ;;  %v3844_v43 = vcombine.high %v3828_v41, %v3828_v41  ;;  %v3845_v44 = vcombine.high %v3835_v42, %v3835_v42  ;;  %3856 = vst.msk [vmem:[#allocation2 + $0x1c] sm:$0x1] %vm602_vm9, %v3835_v42  ;;  %3857 = vst.msk [vmem:[#allocation2 + $0x2c] sm:$0x1] %vm602_vm9, %v3843_v36  ;;  %v4064_v45 = vpop.f32.mrb[26].mxu1  ;;  %v5144_v40 = vld [vmem:[#allocation2 + $0x30] sm:$0xff] }
 0x27a   : > { %3859 = vst.msk [vmem:[#allocation2 + $0x4c] sm:$0x1] %vm602_vm9, %v3828_v41  ;;  %v4069_v46 = vcombine.high %v4064_v45, %v4064_v45  ;;  %v4076_v47 = vrot.slane %v4064_v45, %v7924_v39  ;;  %v6527_v48 = vpop.f32.mrb[27].mxu1 }
 0x27b   : > { %v3846_v49 = vcombine.high %v3842_v1, %v3842_v1  ;;  %3858 = vst.msk [vmem:[#allocation2 + $0x3c] sm:$0x1] %vm602_vm9, %v3845_v44  ;;  %3860 = vst.msk [vmem:[#allocation2 + $0x5c] sm:$0x1] %vm602_vm9, %v3842_v1  ;;  %v324_v1 = vld [vmem:[%s8677_s2 + $0x10] sm:$0xff] }
 0x27c   : > { %3861 = vst.msk [vmem:[#allocation2 + $0x6c] sm:$0x1] %vm602_vm9, %v3844_v43  ;;  %v4083_v50 = vrot.slane %v4069_v46, %v7924_v39  ;;  %v4084_v51 = vcombine.high %v4076_v47, %v4076_v47  ;;  %v4092_v52 = vrot.slane %v4076_v47, %v7924_v39  ;;  %v5296_v43 = vld [vmem:[#allocation2 + $0x40] sm:$0xff]  ;;  %v325_v46 = vld [vmem:[%s8677_s2 + $0x18] sm:$0xff]  ;;  %v5448_v47 = vld [vmem:[#allocation2 + $0x50] sm:$0xff] }
 0x27d   : > { %3862 = vst.msk [vmem:[#allocation2 + $0x7c] sm:$0x1] %vm602_vm9, %v3846_v49 }
 0x27e   : > { %v4085_v53 = vcombine.high %v4083_v50, %v4083_v50  ;;  %v4099_v54 = vrot.slane %v4083_v50, %v7924_v39  ;;  %v4106_v55 = vrot.slane %v4084_v51, %v7924_v39  ;;  %v4114_v57 = vcombine.high %v4092_v52, %v4092_v52  ;;  %4126 = vst.msk [vmem:[#allocation2 + $0xd] sm:$0x1] %vm602_vm9, %v4092_v52  ;;  %v5600_v50 = vld [vmem:[#allocation2 + $0x60] sm:$0xff] }
 0x280   : > { %v4113_v58 = vrot.slane %v4085_v53, %v7924_v39  ;;  %v4115_v59 = vcombine.high %v4099_v54, %v4099_v54  ;;  %v4116_v60 = vcombine.high %v4106_v55, %v4106_v55  ;;  %4127 = vst.msk [vmem:[#allocation2 + $0x1d] sm:$0x1] %vm602_vm9, %v4106_v55  ;;  %4128 = vst.msk [vmem:[#allocation2 + $0x2d] sm:$0x1] %vm602_vm9, %v4114_v57  ;;  %v5752_v53 = vld [vmem:[#allocation2 + $0x70] sm:$0xff] }
 0x281   : > { %4130 = vst.msk [vmem:[#allocation2 + $0x4d] sm:$0x1] %vm602_vm9, %v4099_v54  ;;  %v4335_v61 = vpop.f32.mrb[28].mxu1 }
 0x282   : > { %v4117_v62 = vcombine.high %v4113_v58, %v4113_v58  ;;  %4129 = vst.msk [vmem:[#allocation2 + $0x3d] sm:$0x1] %vm602_vm9, %v4116_v60  ;;  %4131 = vst.msk [vmem:[#allocation2 + $0x5d] sm:$0x1] %vm602_vm9, %v4113_v58  ;;  %v4340_v63 = vcombine.high %v4335_v61, %v4335_v61  ;;  %v4347_v2 = vrot.slane %v4335_v61, %v7924_v39  ;;  %v6541_v3 = vpop.f32.mrb[29].mxu1 }
 0x283   : > { %4132 = vst.msk [vmem:[#allocation2 + $0x6d] sm:$0x1] %vm602_vm9, %v4115_v59 }
 0x284   : > { %4133 = vst.msk [vmem:[#allocation2 + $0x7d] sm:$0x1] %vm602_vm9, %v4117_v62  ;;  %v4354_v4 = vrot.slane %v4340_v63, %v7924_v39  ;;  %v4355_v14 = vcombine.high %v4347_v2, %v4347_v2  ;;  %v4363_v5 = vrot.slane %v4347_v2, %v7924_v39 }
 0x286   : > { %v4356_v6 = vcombine.high %v4354_v4, %v4354_v4  ;;  %v4370_v7 = vrot.slane %v4354_v4, %v7924_v39  ;;  %v4377_v8 = vrot.slane %v4355_v14, %v7924_v39  ;;  %v4385_v9 = vcombine.high %v4363_v5, %v4363_v5  ;;  %4397 = vst.msk [vmem:[#allocation2 + $0xe] sm:$0x1] %vm602_vm9, %v4363_v5 }
 0x288   : > { %v4384_v10 = vrot.slane %v4356_v6, %v7924_v39  ;;  %v4386_v11 = vcombine.high %v4370_v7, %v4370_v7  ;;  %v4387_v13 = vcombine.high %v4377_v8, %v4377_v8  ;;  %4398 = vst.msk [vmem:[#allocation2 + $0x1e] sm:$0x1] %vm602_vm9, %v4377_v8  ;;  %4399 = vst.msk [vmem:[#allocation2 + $0x2e] sm:$0x1] %vm602_vm9, %v4385_v9  ;;  %v4606_v15 = vpop.f32.mrb[30].mxu1 }
 0x289   : > { %4401 = vst.msk [vmem:[#allocation2 + $0x4e] sm:$0x1] %vm602_vm9, %v4370_v7  ;;  %v4611_v17 = vcombine.high %v4606_v15, %v4606_v15  ;;  %v4618_v18 = vrot.slane %v4606_v15, %v7924_v39  ;;  %v6555_v19 = vpop.f32.mrb[31].mxu1 }
 0x28a   : > { %v4388_v16 = vcombine.high %v4384_v10, %v4384_v10  ;;  %4400 = vst.msk [vmem:[#allocation2 + $0x3e] sm:$0x1] %vm602_vm9, %v4387_v13  ;;  %4402 = vst.msk [vmem:[#allocation2 + $0x5e] sm:$0x1] %vm602_vm9, %v4384_v10 }
 0x28b   : > { %4403 = vst.msk [vmem:[#allocation2 + $0x6e] sm:$0x1] %vm602_vm9, %v4386_v11  ;;  %v4625_v20 = vrot.slane %v4611_v17, %v7924_v39  ;;  %v4626_v21 = vcombine.high %v4618_v18, %v4618_v18  ;;  %v4634_v22 = vrot.slane %v4618_v18, %v7924_v39 }
 0x28c   : > { %4404 = vst.msk [vmem:[#allocation2 + $0x7e] sm:$0x1] %vm602_vm9, %v4388_v16 }
 0x28d   : > { %v4627_v23 = vcombine.high %v4625_v20, %v4625_v20  ;;  %v4641_v24 = vrot.slane %v4625_v20, %v7924_v39  ;;  %v4648_v25 = vrot.slane %v4626_v21, %v7924_v39  ;;  %v4656_v26 = vcombine.high %v4634_v22, %v4634_v22  ;;  %4668 = vst.msk [vmem:[#allocation2 + $0xf] sm:$0x1] %vm602_vm9, %v4634_v22 }
 0x28f   : > { %v4655_v27 = vrot.slane %v4627_v23, %v7924_v39  ;;  %v4657_v28 = vcombine.high %v4641_v24, %v4641_v24  ;;  %v4658_v29 = vcombine.high %v4648_v25, %v4648_v25  ;;  %4669 = vst.msk [vmem:[#allocation2 + $0x1f] sm:$0x1] %vm602_vm9, %v4648_v25  ;;  %4670 = vst.msk [vmem:[#allocation2 + $0x2f] sm:$0x1] %vm602_vm9, %v4656_v26 }
 0x290   : > { %4672 = vst.msk [vmem:[#allocation2 + $0x4f] sm:$0x1] %vm602_vm9, %v4641_v24 }
 0x291   : > { %v4659_v30 = vcombine.high %v4655_v27, %v4655_v27  ;;  %4671 = vst.msk [vmem:[#allocation2 + $0x3f] sm:$0x1] %vm602_vm9, %v4658_v29  ;;  %4673 = vst.msk [vmem:[#allocation2 + $0x5f] sm:$0x1] %vm602_vm9, %v4655_v27 }
 0x292   : > { %4674 = vst.msk [vmem:[#allocation2 + $0x6f] sm:$0x1] %vm602_vm9, %v4657_v28 }
 0x293   : > { %4675 = vst.msk [vmem:[#allocation2 + $0x7f] sm:$0x1] %vm602_vm9, %v4659_v30 }
 0x294   : > { %v4677_v12 = vld [vmem:[#allocation2 + $0x8] sm:$0xff] }
 0x295   : > { %v6732_v39 = vpack.c.bf16 %v4677_v12, %v4676_v31 }
 0x296   : > { %v4841_v33 = vld [vmem:[#allocation2 + $0x18] sm:$0xff]  ;;  %v4993_v35 = vld [vmem:[#allocation2 + $0x28] sm:$0xff] }
 0x297   : > { %6733 = vmatprep.subr.bf16.mxu0 %v6732_v39  ;;  %v6736_v37 = vpack.c.bf16 %v4841_v33, %v4840_v32  ;;  %v6740_v38 = vpack.c.bf16 %v4993_v35, %v4992_v34  ;;  %v5297_v42 = vld [vmem:[#allocation2 + $0x48] sm:$0xff] }
 0x298   : > { %6735 = vmatpush3.bf16.msra.mxu0 %v6732_v39  ;;  %v5145_v41 = vld [vmem:[#allocation2 + $0x38] sm:$0xff]  ;;  %v6748_v45 = vpack.c.bf16 %v5297_v42, %v5296_v43 }
 0x299   : > { %6737 = vmatprep.subr.bf16.mxu1 %v6736_v37  ;;  %6741 = vmatprep.subr.bf16.mxu0 %v6740_v38  ;;  %v6744_v36 = vpack.c.bf16 %v5145_v41, %v5144_v40  ;;  %v5449_v44 = vld [vmem:[#allocation2 + $0x58] sm:$0xff]  ;;  %v5601_v49 = vld [vmem:[#allocation2 + $0x68] sm:$0xff] }
 0x29a   : > { %6739 = vmatpush3.bf16.msra.mxu1 %v6736_v37  ;;  %v6752_v48 = vpack.c.bf16 %v5449_v44, %v5448_v47  ;;  %v5753_v51 = vld [vmem:[#allocation2 + $0x78] sm:$0xff]  ;;  %v6756_v52 = vpack.c.bf16 %v5601_v49, %v5600_v50 }
 0x29b   : > { %6561 = vmatmul.mubr.msk.f32.vlgmr.msra.gmra.mrb[32].mxu0 %vm397_vm8, %v323_v0  ;;  %6745 = vmatprep.subr.bf16.mxu1 %v6744_v36  ;;  %v6760_v54 = vpack.c.bf16 %v5753_v51, %v5752_v53 }
 0x29c   : > { %6743 = vmatpush3.bf16.msra.mxu0 %v6740_v38  ;;  %6563 = vmatprep.mubr.msk.f32.mxu0 %vm397_vm8, %v324_v1 }
 0x29d   : > { %6571 = vmatmul.mubr.msk.f32.vlgmr.msra.gmra.mrb[32].mxu1 %vm397_vm8, %v323_v0  ;;  %6749 = vmatprep.subr.bf16.mxu0 %v6748_v45 }
 0x29e   : > { %6747 = vmatpush3.bf16.msra.mxu1 %v6744_v36  ;;  %6573 = vmatprep.mubr.msk.f32.mxu1 %vm397_vm8, %v324_v1 }
 0x29f   : > { %6564 = vmatmul.mubr.msk.f32.gmra.mrb[34].mxu0 %vm397_vm8, %v325_v46  ;;  %6753 = vmatprep.subr.bf16.mxu1 %v6752_v48 }
 0x2a0   : > { %6580 = vmatprep.mubr.msk.f32.mxu0 %vm397_vm8, %v7943_v56 }
 0x2a1   : > { %6574 = vmatmul.mubr.msk.f32.gmra.mrb[34].mxu1 %vm397_vm8, %v325_v46 }
 0x2a2   : > { %6590 = vmatprep.mubr.msk.f32.mxu1 %vm397_vm8, %v7943_v56 }
 0x2a3   : > { %6581 = vmatmul.mubr.msk.f32.vlgmr.msra.gmra.mrb[36].mxu0 %vm397_vm8, %v323_v0 }
 0x2a4   : > { %6751 = vmatpush3.bf16.msra.mxu0 %v6748_v45  ;;  %6583 = vmatprep.mubr.msk.f32.mxu0 %vm397_vm8, %v324_v1 }
 0x2a5   : > { %6757 = vmatprep.subr.bf16.mxu0 %v6756_v52  ;;  %6591 = vmatmul.mubr.msk.f32.vlgmr.msra.gmra.mrb[36].mxu1 %vm397_vm8, %v323_v0 }
 0x2a6   : > { %6755 = vmatpush3.bf16.msra.mxu1 %v6752_v48  ;;  %6593 = vmatprep.mubr.msk.f32.mxu1 %vm397_vm8, %v324_v1 }
 0x2a7   : > { %6761 = vmatprep.subr.bf16.mxu1 %v6760_v54  ;;  %6584 = vmatmul.mubr.msk.f32.gmra.mrb[38].mxu0 %vm397_vm8, %v325_v46 }
 0x2a8   : > { %6600 = vmatprep.mubr.msk.f32.mxu0 %vm397_vm8, %v7943_v56 }
 0x2a9   : > { %6594 = vmatmul.mubr.msk.f32.gmra.mrb[38].mxu1 %vm397_vm8, %v325_v46 }
 0x2aa   : > { %6610 = vmatprep.mubr.msk.f32.mxu1 %vm397_vm8, %v7943_v56 }
 0x2ab   : > { %6601 = vmatmul.mubr.msk.f32.vlgmr.msra.gmra.mrb[40].mxu0 %vm397_vm8, %v323_v0 }
 0x2ac   : > { %6759 = vmatpush3.bf16.msra.mxu0 %v6756_v52  ;;  %6603 = vmatprep.mubr.msk.f32.mxu0 %vm397_vm8, %v324_v1 }
 0x2ad   : > { %6611 = vmatmul.mubr.msk.f32.vlgmr.msra.gmra.mrb[40].mxu1 %vm397_vm8, %v323_v0 }
 0x2ae   : > { %6763 = vmatpush3.bf16.msra.mxu1 %v6760_v54  ;;  %6613 = vmatprep.mubr.msk.f32.mxu1 %vm397_vm8, %v324_v1 }
 0x2af   : > { %6604 = vmatmul.mubr.msk.f32.gmra.mrb[42].mxu0 %vm397_vm8, %v325_v46 }
 0x2b0   : > { %6620 = vmatprep.mubr.msk.f32.mxu0 %vm397_vm8, %v7943_v56 }
 0x2b1   : > { %6614 = vmatmul.mubr.msk.f32.gmra.mrb[42].mxu1 %vm397_vm8, %v325_v46 }
 0x2b2   : > { %6630 = vmatprep.mubr.msk.f32.mxu1 %vm397_vm8, %v7943_v56 }
 0x2b3   : > { %6621 = vmatmul.mubr.msk.f32.vlgmr.msra.gmra.mrb[44].mxu0 %vm397_vm8, %v323_v0 }
 0x2b4   : > { %6623 = vmatprep.mubr.msk.f32.mxu0 %vm397_vm8, %v324_v1 }
 0x2b5   : > { %6631 = vmatmul.mubr.msk.f32.vlgmr.msra.gmra.mrb[44].mxu1 %vm397_vm8, %v323_v0 }
 0x2b6   : > { %6633 = vmatprep.mubr.msk.f32.mxu1 %vm397_vm8, %v324_v1 }
 0x2b7   : > { %6624 = vmatmul.mubr.msk.f32.gmra.mrb[46].mxu0 %vm397_vm8, %v325_v46 }
 0x2b9   : > { %6634 = vmatmul.mubr.msk.f32.gmra.mrb[46].mxu1 %vm397_vm8, %v325_v46 }
 0x36e   : > { %v6562_v55 = vpop.f32.mrb[32].mxu0 }
 0x36f   : > { %v4777_v57 = vsel %vm4775_vm10, %v6562_v55, 0.0  ;;  %v4756_v58 = vpop.f32.mrb[33].mxu0 }
 0x370   : > { %v4776_v59 = vsel %vm4775_vm10, %v4756_v58, 0.0  ;;  %v8208_v4 = vpop.f32.mrb[32].mxu1 }
 0x371   : > { %v4778_v56 = vadd.f32 %v4777_v57, %v4776_v59  ;;  %v4928_v14 = vsel %vm4775_vm10, %v8208_v4, 0.0  ;;  %v8212_v5 = vpop.f32.mrb[33].mxu1 }
 0x372   : > { %v6565_v60 = vpop.f32.mrb[34].mxu0  ;;  %v4927_v6 = vsel %vm4775_vm10, %v8212_v5, 0.0 }
 0x373   : > { %v4766_v61 = vpop.f32.mrb[35].mxu0  ;;  %v4781_v2 = vsel %vm4775_vm10, %v6565_v60, 0.0  ;;  %v4929_v7 = vadd.f32 %v4928_v14, %v4927_v6 }
 0x374   : > { %v4779_v62 = vsel %vm4775_vm10, %v4766_v61, 0.0  ;;  %v8216_v8 = vpop.f32.mrb[34].mxu1 }
 0x375   : > { %v4780_v63 = vadd.f32 %v4779_v62, %v4778_v56  ;;  %v8218_v9 = vpop.f32.mrb[35].mxu1  ;;  %v4932_v13 = vsel %vm4775_vm10, %v8216_v8, 0.0 }
 0x376   : > { %v4930_v10 = vsel %vm4775_vm10, %v8218_v9, 0.0  ;;  %v8244_v0 = vpop.f32.mrb[36].mxu0 }
 0x377   : > { %v4782_v3 = vadd.f32 %v4781_v2, %v4780_v63  ;;  %v4931_v11 = vadd.f32 %v4930_v10, %v4929_v7  ;;  %v5080_v40 = vsel %vm4775_vm10, %v8244_v0, 0.0  ;;  %v8248_v41 = vpop.f32.mrb[37].mxu0 }
 0x378   : > { %v5079_v42 = vsel %vm4775_vm10, %v8248_v41, 0.0 }
 0x379   : > { %4783 = vadd.xlane.f32.xlu0 %v4782_v3  ;;  %v4933_v15 = vadd.f32 %v4932_v13, %v4931_v11  ;;  %v5081_v36 = vadd.f32 %v5080_v40, %v5079_v42 }
 0x37a   : > { %v8252_v1 = vpop.f32.mrb[38].mxu0 }
 0x37b   : > { %4934 = vadd.xlane.f32.xlu1 %v4933_v15  ;;  %v8254_v43 = vpop.f32.mrb[39].mxu0  ;;  %v5084_v46 = vsel %vm4775_vm10, %v8252_v1, 0.0 }
 0x37c   : > { %v5082_v44 = vsel %vm4775_vm10, %v8254_v43, 0.0 }
 0x37d   : > { %v5083_v45 = vadd.f32 %v5082_v44, %v5081_v36 }
 0x37f   : > { %v5085_v47 = vadd.f32 %v5084_v46, %v5083_v45 }
 0x406   : > { %v4784_v16 = vpop.xlane.xlu0 %4783 }
 0x407   : > { %v4785_v17 = vrot.slane %v4784_v16, 4 }
 0x408   : > { %v4935_v48 = vpop.xlane.xlu1 %4934 }
 0x409   : > { %v4786_v18 = vadd.f32 %v4785_v17, %v4784_v16  ;;  %v4936_v49 = vrot.slane %v4935_v48, 4 }
 0x40b   : > { %v4787_v19 = vrot.slane %v4786_v18, 2  ;;  %v4937_v50 = vadd.f32 %v4936_v49, %v4935_v48 }
 0x40d   : > { %v4788_v20 = vadd.f32 %v4787_v19, %v4786_v18  ;;  %v4938_v51 = vrot.slane %v4937_v50, 2 }
 0x40f   : > { %v4789_v21 = vrot.slane %v4788_v20, 1 }
 0x411   : > { %v4790_v22 = vadd.f32 %v4789_v21, %v4788_v20  ;;  %v4827_v21 = vld [vmem:[%s7260_s9] sm:$0xff] }
 0x413   : > { %6764 = vpush %v4790_v22 }
 0x444   : > { %s6765_s29 = spop %6764 }
 0x445   : > { %v4792_v23 = vstv %s6765_s29 }
 0x446   : > { %v4794_v24 = vmul.f32 0.0009765625, %v4792_v23  ;;  %v4828_v23 = vld [vmem:[%s7260_s9 + $0x8] sm:$0xff] }
 0x448   : > { %v8224_v25 = vsub.f32 %v4756_v58, %v4794_v24  ;;  %v8226_v26 = vsub.f32 %v6562_v55, %v4794_v24  ;;  %v8228_v27 = vsub.f32 %v4766_v61, %v4794_v24  ;;  %v8230_v28 = vsub.f32 %v6565_v60, %v4794_v24  ;;  %v4829_v24 = vld [vmem:[%s7260_s9 + $0x10] sm:$0xff] }
 0x449   : > { %v4939_v55 = vadd.f32 %v4938_v51, %v4937_v50 }
 0x44a   : > { %v4799_v29 = vmul.f32 %v8224_v25, %v8224_v25  ;;  %v4800_v30 = vmul.f32 %v8226_v26, %v8226_v26  ;;  %v4801_v31 = vmul.f32 %v8228_v27, %v8228_v27  ;;  %v4802_v12 = vmul.f32 %v8230_v28, %v8230_v28 }
 0x44b   : > { %v4940_v59 = vrot.slane %v4939_v55, 1 }
 0x44c   : > { %v4803_v39 = vsel %vm4775_vm10, %v4799_v29, 0.0  ;;  %v4804_v32 = vsel %vm4775_vm10, %v4800_v30, 0.0  ;;  %v4806_v34 = vsel %vm4775_vm10, %v4801_v31, 0.0  ;;  %v4808_v37 = vsel %vm4775_vm10, %v4802_v12, 0.0  ;;  %v4830_v29 = vld [vmem:[%s7260_s9 + $0x18] sm:$0xff] }
 0x44d   : > { %v4805_v33 = vadd.f32 %v4804_v32, %v4803_v39  ;;  %v4941_v61 = vadd.f32 %v4940_v59, %v4939_v55 }
 0x44f   : > { %v4807_v35 = vadd.f32 %v4806_v34, %v4805_v33 }
 0x451   : > { %v4809_v38 = vadd.f32 %v4808_v37, %v4807_v35 }
 0x453   : > { %4810 = vadd.xlane.f32.xlu0 %v4809_v38 }
 0x457   : > { %5086 = vadd.xlane.f32.xlu0 %v5085_v47 }
 0x4e0   : > { %v4811_v52 = vpop.xlane.xlu0 %4810 }
 0x4e1   : > { %v4812_v53 = vrot.slane %v4811_v52, 4 }
 0x4e3   : > { %v4813_v54 = vadd.f32 %v4812_v53, %v4811_v52 }
 0x4e4   : > { %v5087_v46 = vpop.xlane.xlu0 %5086 }
 0x4e5   : > { %v4814_v57 = vrot.slane %v4813_v54, 2  ;;  %v5088_v47 = vrot.slane %v5087_v46, 4 }
 0x4e7   : > { %v4815_v58 = vadd.f32 %v4814_v57, %v4813_v54  ;;  %v5089_v48 = vadd.f32 %v5088_v47, %v5087_v46 }
 0x4e9   : > { %v4816_v56 = vrot.slane %v4815_v58, 1  ;;  %v5090_v49 = vrot.slane %v5089_v48, 2 }
 0x4eb   : > { %v4817_v60 = vadd.f32 %v4816_v56, %v4815_v58  ;;  %v5091_v53 = vadd.f32 %v5090_v49, %v5089_v48 }
 0x4ed   : > { %6766 = vpush %v4817_v60  ;;  %v5092_v57 = vrot.slane %v5091_v53, 1 }
 0x4ee   : > { %6768 = vpush %v4941_v61 }
 0x4ef   : > { %v5093_v56 = vadd.f32 %v5092_v57, %v5091_v53 }
 0x51e   : > { %s6767_s14 = spop %6766 }
 0x51f   : > { %v4819_v62 = vstv %s6767_s14  ;;  %s6769_s10 = spop %6768 }
 0x520   : > { %v4820_v63 = vmul.f32 0.0009765625, %v4819_v62  ;;  %v4943_v2 = vstv %s6769_s10 }
 0x521   : > { %v4944_v3 = vmul.f32 0.0009765625, %v4943_v2 }
 0x522   : > { %v4821_v14 = vadd.f32 1e-05, %v4820_v63 }
 0x523   : > { %v8261_v6 = vsub.f32 %v8212_v5, %v4944_v3  ;;  %v8264_v7 = vsub.f32 %v8208_v4, %v4944_v3  ;;  %v8267_v10 = vsub.f32 %v8218_v9, %v4944_v3  ;;  %v8270_v11 = vsub.f32 %v8216_v8, %v4944_v3 }
 0x524   : > { %6871 = vrsqrt.f32 %v4821_v14 }
 0x525   : > { %v4949_v13 = vmul.f32 %v8261_v6, %v8261_v6  ;;  %v4950_v5 = vmul.f32 %v8264_v7, %v8264_v7  ;;  %v4951_v4 = vmul.f32 %v8267_v10, %v8267_v10  ;;  %v4952_v9 = vmul.f32 %v8270_v11, %v8270_v11 }
 0x527   : > { %v4953_v15 = vsel %vm4775_vm10, %v4949_v13, 0.0  ;;  %v4954_v8 = vsel %vm4775_vm10, %v4950_v5, 0.0  ;;  %v4956_v17 = vsel %vm4775_vm10, %v4951_v4, 0.0  ;;  %v4958_v19 = vsel %vm4775_vm10, %v4952_v9, 0.0 }
 0x528   : > { %v4955_v16 = vadd.f32 %v4954_v8, %v4953_v15 }
 0x52a   : > { %v4957_v18 = vadd.f32 %v4956_v17, %v4955_v16 }
 0x52c   : > { %v4959_v20 = vadd.f32 %v4958_v19, %v4957_v18  ;;  %v6100_v19 = vld [vmem:[%s7260_s9 + $0x20] sm:$0xff] }
 0x52e   : > { %v6872_v22 = vpop.eup %6871  ;;  %4960 = vadd.xlane.f32.xlu1 %v4959_v20 }
 0x52f   : > { %v4823_v30 = vmul.f32 %v6872_v22, %v8224_v25  ;;  %v4824_v31 = vmul.f32 %v6872_v22, %v8226_v26  ;;  %v4825_v12 = vmul.f32 %v6872_v22, %v8228_v27  ;;  %v4826_v39 = vmul.f32 %v6872_v22, %v8230_v28  ;;  %v8303_v25 = vpop.f32.mrb[36].mxu1  ;;  %v6102_v22 = vld [vmem:[%s7260_s9 + $0x30] sm:$0xff] }
 0x530   : > { %v5232_v26 = vsel %vm4775_vm10, %v8303_v25, 0.0  ;;  %v8307_v27 = vpop.f32.mrb[37].mxu1 }
 0x531   : > { %v4831_v32 = vadd.f32 %v4827_v21, %v4823_v30  ;;  %v4832_v33 = vadd.f32 %v4828_v23, %v4824_v31  ;;  %v4833_v34 = vadd.f32 %v4829_v24, %v4825_v12  ;;  %v4834_v35 = vadd.f32 %v4830_v29, %v4826_v39  ;;  %v8311_v38 = vpop.f32.mrb[38].mxu1  ;;  %v6101_v21 = vld [vmem:[%s7260_s9 + $0x28] sm:$0xff]  ;;  %v6103_v23 = vld [vmem:[%s7260_s9 + $0x38] sm:$0xff] }
 0x532   : > { %v5231_v28 = vsel %vm4775_vm10, %v8307_v27, 0.0  ;;  %v8313_v40 = vpop.f32.mrb[39].mxu1  ;;  %v5236_v44 = vsel %vm4775_vm10, %v8311_v38, 0.0 }
 0x533   : > { %4835 = vst.msk [vmem:[%s8293_s12] sm:$0xff] %vm4775_vm10, %v4831_v32  ;;  %4836 = vst.msk [vmem:[%s8293_s12 + $0x8] sm:$0xff] %vm4775_vm10, %v4832_v33  ;;  %v5233_v37 = vadd.f32 %v5232_v26, %v5231_v28  ;;  %v5234_v42 = vsel %vm4775_vm10, %v8313_v40, 0.0 }
 0x534   : > { %4837 = vst.msk [vmem:[%s8293_s12 + $0x10] sm:$0xff] %vm4775_vm10, %v4833_v34  ;;  %4838 = vst.msk [vmem:[%s8293_s12 + $0x18] sm:$0xff] %vm4775_vm10, %v4834_v35  ;;  %v8359_v34 = vpop.f32.mrb[40].mxu0 }
 0x535   : > { %v5235_v36 = vadd.f32 %v5234_v42, %v5233_v37 }
 0x537   : > { %v5237_v45 = vadd.f32 %v5236_v44, %v5235_v36 }
 0x539   : > { %5238 = vadd.xlane.f32.xlu0 %v5237_v45 }
 0x5bb   : > { %v4961_v50 = vpop.xlane.xlu1 %4960 }
 0x5bc   : > { %v4962_v51 = vrot.slane %v4961_v50, 4 }
 0x5be   : > { %v4963_v52 = vadd.f32 %v4962_v51, %v4961_v50 }
 0x5c0   : > { %v4964_v54 = vrot.slane %v4963_v52, 2 }
 0x5c2   : > { %v4965_v55 = vadd.f32 %v4964_v54, %v4963_v52 }
 0x5c4   : > { %v4966_v58 = vrot.slane %v4965_v55, 1 }
 0x5c6   : > { %v4967_v59 = vadd.f32 %v4966_v58, %v4965_v55  ;;  %v5239_v44 = vpop.xlane.xlu0 %5238 }
 0x5c7   : > { %v5240_v45 = vrot.slane %v5239_v44, 4 }
 0x5c8   : > { %6770 = vpush %v4967_v59 }
 0x5c9   : > { %6772 = vpush %v5093_v56  ;;  %v5241_v46 = vadd.f32 %v5240_v45, %v5239_v44 }
 0x5cb   : > { %v5242_v47 = vrot.slane %v5241_v46, 2 }
 0x5cd   : > { %v5243_v51 = vadd.f32 %v5242_v47, %v5241_v46 }
 0x5cf   : > { %v5244_v54 = vrot.slane %v5243_v51, 1 }
 0x5d1   : > { %v5245_v58 = vadd.f32 %v5244_v54, %v5243_v51 }
 0x5f9   : > { %s6771_s13 = spop %6770 }
 0x5fa   : > { %v4969_v60 = vstv %s6771_s13  ;;  %s6773_s11 = spop %6772  ;;  %s6187_s13 = sshll.u32 %s7026_s21, 12 }
 0x5fb   : > { %v4970_v61 = vmul.f32 0.0009765625, %v4969_v60  ;;  %v5095_v62 = vstv %s6773_s11  ;;  %s5920_s11 = sshll.u32 %s8293_s12, 4  ;;  %s5904_s21 = scalar_lea.sflag [#allocation5], %s7245_s24  ;;  %s8618_s11 = int_to_ptr.vmem [resolvable:$true] %s5920_s11 }
 0x5fc   : > { %v5096_v63 = vmul.f32 0.0009765625, %v5095_v62 }
 0x5fd   : > { %v4971_v2 = vadd.f32 1e-05, %v4970_v61 }
 0x5fe   : > { %v8320_v3 = vsub.f32 %v8248_v41, %v5096_v63  ;;  %v8323_v14 = vsub.f32 %v8244_v0, %v5096_v63  ;;  %v8326_v13 = vsub.f32 %v8254_v43, %v5096_v63  ;;  %v8329_v5 = vsub.f32 %v8252_v1, %v5096_v63 }
 0x5ff   : > { %6873 = vrsqrt.f32 %v4971_v2 }
 0x600   : > { %v5101_v4 = vmul.f32 %v8320_v3, %v8320_v3  ;;  %v5102_v41 = vmul.f32 %v8323_v14, %v8323_v14  ;;  %v5103_v0 = vmul.f32 %v8326_v13, %v8326_v13  ;;  %v5104_v43 = vmul.f32 %v8329_v5, %v8329_v5 }
 0x602   : > { %v5105_v9 = vsel %vm4775_vm10, %v5101_v4, 0.0  ;;  %v5106_v1 = vsel %vm4775_vm10, %v5102_v41, 0.0  ;;  %v5108_v8 = vsel %vm4775_vm10, %v5103_v0, 0.0  ;;  %v5110_v17 = vsel %vm4775_vm10, %v5104_v43, 0.0 }
 0x603   : > { %v5107_v15 = vadd.f32 %v5106_v1, %v5105_v9 }
 0x605   : > { %v5109_v16 = vadd.f32 %v5108_v8, %v5107_v15 }
 0x607   : > { %v5111_v18 = vadd.f32 %v5110_v17, %v5109_v16  ;;  %v6112_v17 = vld [vmem:[%s7260_s9 + $0x40] sm:$0xff] }
 0x609   : > { %v6874_v20 = vpop.eup %6873  ;;  %5112 = vadd.xlane.f32.xlu1 %v5111_v18 }
 0x60a   : > { %v4973_v24 = vmul.f32 %v6874_v20, %v8261_v6  ;;  %v4974_v29 = vmul.f32 %v6874_v20, %v8264_v7  ;;  %v4975_v30 = vmul.f32 %v6874_v20, %v8267_v10  ;;  %v4976_v31 = vmul.f32 %v6874_v20, %v8270_v11  ;;  %v8363_v7 = vpop.f32.mrb[41].mxu0  ;;  %v6114_v20 = vld [vmem:[%s7260_s9 + $0x50] sm:$0xff] }
 0x60b   : > { %v5384_v6 = vsel %vm4775_vm10, %v8359_v34, 0.0  ;;  %v5383_v10 = vsel %vm4775_vm10, %v8363_v7, 0.0  ;;  %v8367_v35 = vpop.f32.mrb[42].mxu0 }
 0x60c   : > { %v4982_v12 = vadd.f32 %v6100_v19, %v4973_v24  ;;  %v4983_v39 = vadd.f32 %v6101_v21, %v4974_v29  ;;  %v4984_v32 = vadd.f32 %v6102_v22, %v4975_v30  ;;  %v4985_v33 = vadd.f32 %v6103_v23, %v4976_v31  ;;  %v8369_v26 = vpop.f32.mrb[43].mxu0  ;;  %v6113_v19 = vld [vmem:[%s7260_s9 + $0x48] sm:$0xff]  ;;  %v6115_v21 = vld [vmem:[%s7260_s9 + $0x58] sm:$0xff] }
 0x60d   : > { %v5385_v11 = vadd.f32 %v5384_v6, %v5383_v10  ;;  %v5386_v28 = vsel %vm4775_vm10, %v8369_v26, 0.0  ;;  %v5388_v42 = vsel %vm4775_vm10, %v8367_v35, 0.0 }
 0x60e   : > { %6104 = vst.msk [vmem:[%s8293_s12 + $0x20] sm:$0xff] %vm4775_vm10, %v4982_v12  ;;  %6105 = vst.msk [vmem:[%s8293_s12 + $0x28] sm:$0xff] %vm4775_vm10, %v4983_v39 }
 0x60f   : > { %6106 = vst.msk [vmem:[%s8293_s12 + $0x30] sm:$0xff] %vm4775_vm10, %v4984_v32  ;;  %6107 = vst.msk [vmem:[%s8293_s12 + $0x38] sm:$0xff] %vm4775_vm10, %v4985_v33  ;;  %v5387_v37 = vadd.f32 %v5386_v28, %v5385_v11  ;;  %v8415_v32 = vpop.f32.mrb[40].mxu1 }
 0x611   : > { %v5389_v36 = vadd.f32 %v5388_v42, %v5387_v37 }
 0x613   : > { %5390 = vadd.xlane.f32.xlu0 %v5389_v36 }
 0x696   : > { %v5113_v48 = vpop.xlane.xlu1 %5112 }
 0x697   : > { %v5114_v49 = vrot.slane %v5113_v48, 4 }
 0x699   : > { %v5115_v50 = vadd.f32 %v5114_v49, %v5113_v48 }
 0x69b   : > { %v5116_v52 = vrot.slane %v5115_v50, 2 }
 0x69d   : > { %v5117_v53 = vadd.f32 %v5116_v52, %v5115_v50 }
 0x69f   : > { %v5118_v55 = vrot.slane %v5117_v53, 1 }
 0x6a0   : > { %v5391_v42 = vpop.xlane.xlu0 %5390 }
 0x6a1   : > { %v5119_v57 = vadd.f32 %v5118_v55, %v5117_v53  ;;  %v5392_v36 = vrot.slane %v5391_v42, 4 }
 0x6a3   : > { %6774 = vpush %v5119_v57  ;;  %v5393_v44 = vadd.f32 %v5392_v36, %v5391_v42 }
 0x6a4   : > { %6776 = vpush %v5245_v58 }
 0x6a5   : > { %v5394_v45 = vrot.slane %v5393_v44, 2 }
 0x6a7   : > { %v5395_v49 = vadd.f32 %v5394_v45, %v5393_v44 }
 0x6a9   : > { %v5396_v52 = vrot.slane %v5395_v49, 1 }
 0x6ab   : > { %v5397_v55 = vadd.f32 %v5396_v52, %v5395_v49 }
 0x6d4   : > { %s6775_s25 = spop %6774 }
 0x6d5   : > { %v5121_v59 = vstv %s6775_s25  ;;  %s6777_s16 = spop %6776 }
 0x6d6   : > { %v5122_v56 = vmul.f32 0.0009765625, %v5121_v59  ;;  %v5247_v60 = vstv %s6777_s16 }
 0x6d7   : > { %v5248_v61 = vmul.f32 0.0009765625, %v5247_v60 }
 0x6d8   : > { %v5123_v62 = vadd.f32 1e-05, %v5122_v56 }
 0x6d9   : > { %v8376_v63 = vsub.f32 %v8307_v27, %v5248_v61  ;;  %v8379_v2 = vsub.f32 %v8303_v25, %v5248_v61  ;;  %v8382_v4 = vsub.f32 %v8313_v40, %v5248_v61  ;;  %v8385_v41 = vsub.f32 %v8311_v38, %v5248_v61 }
 0x6da   : > { %6875 = vrsqrt.f32 %v5123_v62 }
 0x6db   : > { %v5253_v0 = vmul.f32 %v8376_v63, %v8376_v63  ;;  %v5254_v27 = vmul.f32 %v8379_v2, %v8379_v2  ;;  %v5255_v25 = vmul.f32 %v8382_v4, %v8382_v4  ;;  %v5256_v40 = vmul.f32 %v8385_v41, %v8385_v41 }
 0x6dd   : > { %v5257_v43 = vsel %vm4775_vm10, %v5253_v0, 0.0  ;;  %v5258_v38 = vsel %vm4775_vm10, %v5254_v27, 0.0  ;;  %v5260_v1 = vsel %vm4775_vm10, %v5255_v25, 0.0  ;;  %v5262_v8 = vsel %vm4775_vm10, %v5256_v40, 0.0 }
 0x6de   : > { %v5259_v9 = vadd.f32 %v5258_v38, %v5257_v43 }
 0x6e0   : > { %v5261_v15 = vadd.f32 %v5260_v1, %v5259_v9 }
 0x6e2   : > { %v5263_v16 = vadd.f32 %v5262_v8, %v5261_v15  ;;  %v6124_v8 = vld [vmem:[%s7260_s9 + $0x60] sm:$0xff] }
 0x6e4   : > { %v6876_v18 = vpop.eup %6875  ;;  %5264 = vadd.xlane.f32.xlu1 %v5263_v16 }
 0x6e5   : > { %v5125_v22 = vmul.f32 %v6876_v18, %v8320_v3  ;;  %v5126_v23 = vmul.f32 %v6876_v18, %v8323_v14  ;;  %v5127_v24 = vmul.f32 %v6876_v18, %v8326_v13  ;;  %v5128_v29 = vmul.f32 %v6876_v18, %v8329_v5  ;;  %v8419_v14 = vpop.f32.mrb[41].mxu1  ;;  %v6126_v18 = vld [vmem:[%s7260_s9 + $0x70] sm:$0xff] }
 0x6e6   : > { %v5536_v3 = vsel %vm4775_vm10, %v8415_v32, 0.0  ;;  %v5535_v13 = vsel %vm4775_vm10, %v8419_v14, 0.0  ;;  %v8423_v33 = vpop.f32.mrb[42].mxu1 }
 0x6e7   : > { %v5134_v30 = vadd.f32 %v6112_v17, %v5125_v22  ;;  %v5135_v31 = vadd.f32 %v6113_v19, %v5126_v23  ;;  %v5136_v12 = vadd.f32 %v6114_v20, %v5127_v24  ;;  %v5137_v39 = vadd.f32 %v6115_v21, %v5128_v29  ;;  %v8425_v6 = vpop.f32.mrb[43].mxu1  ;;  %v6125_v17 = vld [vmem:[%s7260_s9 + $0x68] sm:$0xff]  ;;  %v6127_v19 = vld [vmem:[%s7260_s9 + $0x78] sm:$0xff] }
 0x6e8   : > { %v5537_v5 = vadd.f32 %v5536_v3, %v5535_v13  ;;  %v5538_v10 = vsel %vm4775_vm10, %v8425_v6, 0.0  ;;  %v5540_v28 = vsel %vm4775_vm10, %v8423_v33, 0.0 }
 0x6e9   : > { %6116 = vst.msk [vmem:[%s8293_s12 + $0x40] sm:$0xff] %vm4775_vm10, %v5134_v30  ;;  %6117 = vst.msk [vmem:[%s8293_s12 + $0x48] sm:$0xff] %vm4775_vm10, %v5135_v31 }
 0x6ea   : > { %6118 = vst.msk [vmem:[%s8293_s12 + $0x50] sm:$0xff] %vm4775_vm10, %v5136_v12  ;;  %6119 = vst.msk [vmem:[%s8293_s12 + $0x58] sm:$0xff] %vm4775_vm10, %v5137_v39  ;;  %v5539_v11 = vadd.f32 %v5538_v10, %v5537_v5  ;;  %v8471_v12 = vpop.f32.mrb[44].mxu0 }
 0x6ec   : > { %v5541_v37 = vadd.f32 %v5540_v28, %v5539_v11 }
 0x6ee   : > { %5542 = vadd.xlane.f32.xlu0 %v5541_v37 }
 0x771   : > { %v5265_v46 = vpop.xlane.xlu1 %5264 }
 0x772   : > { %v5266_v47 = vrot.slane %v5265_v46, 4 }
 0x774   : > { %v5267_v48 = vadd.f32 %v5266_v47, %v5265_v46 }
 0x776   : > { %v5268_v50 = vrot.slane %v5267_v48, 2 }
 0x778   : > { %v5269_v51 = vadd.f32 %v5268_v50, %v5267_v48 }
 0x77a   : > { %v5270_v53 = vrot.slane %v5269_v51, 1 }
 0x77b   : > { %v5543_v28 = vpop.xlane.xlu0 %5542 }
 0x77c   : > { %v5271_v54 = vadd.f32 %v5270_v53, %v5269_v51  ;;  %v5544_v37 = vrot.slane %v5543_v28, 4 }
 0x77e   : > { %6778 = vpush %v5271_v54  ;;  %v5545_v42 = vadd.f32 %v5544_v37, %v5543_v28 }
 0x77f   : > { %6780 = vpush %v5397_v55 }
 0x780   : > { %v5546_v36 = vrot.slane %v5545_v42, 2 }
 0x782   : > { %v5547_v47 = vadd.f32 %v5546_v36, %v5545_v42 }
 0x784   : > { %v5548_v50 = vrot.slane %v5547_v47, 1 }
 0x786   : > { %v5549_v53 = vadd.f32 %v5548_v50, %v5547_v47 }
 0x7af   : > { %s6779_s17 = spop %6778 }
 0x7b0   : > { %v5273_v57 = vstv %s6779_s17  ;;  %s6781_s15 = spop %6780  ;;  %s8616_s17 = scalar_lea.hbm %s8680_s5, %s6187_s13 }
 0x7b1   : > { %v5274_v58 = vmul.f32 0.0009765625, %v5273_v57  ;;  %v5399_v59 = vstv %s6781_s15  ;;  %s7044_s15 = smov [#allocation8]  }
 0x7b2   : > { %v5400_v56 = vmul.f32 0.0009765625, %v5399_v59 }
 0x7b3   : > { %v5275_v60 = vadd.f32 1e-05, %v5274_v58 }
 0x7b4   : > { %v8432_v61 = vsub.f32 %v8363_v7, %v5400_v56  ;;  %v8435_v62 = vsub.f32 %v8359_v34, %v5400_v56  ;;  %v8438_v0 = vsub.f32 %v8369_v26, %v5400_v56  ;;  %v8441_v27 = vsub.f32 %v8367_v35, %v5400_v56 }
 0x7b5   : > { %6877 = vrsqrt.f32 %v5275_v60 }
 0x7b6   : > { %v5405_v25 = vmul.f32 %v8432_v61, %v8432_v61  ;;  %v5406_v7 = vmul.f32 %v8435_v62, %v8435_v62  ;;  %v5407_v34 = vmul.f32 %v8438_v0, %v8438_v0  ;;  %v5408_v26 = vmul.f32 %v8441_v27, %v8441_v27 }
 0x7b8   : > { %v5409_v40 = vsel %vm4775_vm10, %v5405_v25, 0.0  ;;  %v5410_v35 = vsel %vm4775_vm10, %v5406_v7, 0.0  ;;  %v5412_v38 = vsel %vm4775_vm10, %v5407_v34, 0.0  ;;  %v5414_v1 = vsel %vm4775_vm10, %v5408_v26, 0.0 }
 0x7b9   : > { %v5411_v43 = vadd.f32 %v5410_v35, %v5409_v40 }
 0x7bb   : > { %v5413_v9 = vadd.f32 %v5412_v38, %v5411_v43 }
 0x7bd   : > { %v5415_v15 = vadd.f32 %v5414_v1, %v5413_v9  ;;  %v6136_v1 = vld [vmem:[%s7260_s9 + $0x80] sm:$0xff] }
 0x7bf   : > { %v6878_v16 = vpop.eup %6877  ;;  %5416 = vadd.xlane.f32.xlu1 %v5415_v15 }
 0x7c0   : > { %v5277_v20 = vmul.f32 %v6878_v16, %v8376_v63  ;;  %v5278_v21 = vmul.f32 %v6878_v16, %v8379_v2  ;;  %v5279_v22 = vmul.f32 %v6878_v16, %v8382_v4  ;;  %v5280_v23 = vmul.f32 %v6878_v16, %v8385_v41  ;;  %v8475_v2 = vpop.f32.mrb[45].mxu0  ;;  %v6138_v16 = vld [vmem:[%s7260_s9 + $0x90] sm:$0xff] }
 0x7c1   : > { %v5688_v63 = vsel %vm4775_vm10, %v8471_v12, 0.0  ;;  %v5687_v4 = vsel %vm4775_vm10, %v8475_v2, 0.0  ;;  %v8479_v39 = vpop.f32.mrb[46].mxu0 }
 0x7c2   : > { %v5286_v24 = vadd.f32 %v6124_v8, %v5277_v20  ;;  %v5287_v29 = vadd.f32 %v6125_v17, %v5278_v21  ;;  %v5288_v30 = vadd.f32 %v6126_v18, %v5279_v22  ;;  %v5289_v31 = vadd.f32 %v6127_v19, %v5280_v23  ;;  %v8481_v3 = vpop.f32.mrb[47].mxu0  ;;  %v6137_v8 = vld [vmem:[%s7260_s9 + $0x88] sm:$0xff]  ;;  %v6139_v17 = vld [vmem:[%s7260_s9 + $0x98] sm:$0xff] }
 0x7c3   : > { %v5689_v41 = vadd.f32 %v5688_v63, %v5687_v4  ;;  %v5690_v13 = vsel %vm4775_vm10, %v8481_v3, 0.0  ;;  %v5692_v10 = vsel %vm4775_vm10, %v8479_v39, 0.0 }
 0x7c4   : > { %6128 = vst.msk [vmem:[%s8293_s12 + $0x60] sm:$0xff] %vm4775_vm10, %v5286_v24  ;;  %6129 = vst.msk [vmem:[%s8293_s12 + $0x68] sm:$0xff] %vm4775_vm10, %v5287_v29 }
 0x7c5   : > { %6130 = vst.msk [vmem:[%s8293_s12 + $0x70] sm:$0xff] %vm4775_vm10, %v5288_v30  ;;  %6131 = vst.msk [vmem:[%s8293_s12 + $0x78] sm:$0xff] %vm4775_vm10, %v5289_v31  ;;  %v5691_v5 = vadd.f32 %v5690_v13, %v5689_v41  ;;  %v8527_v30 = vpop.f32.mrb[44].mxu1 }
 0x7c7   : > { %v5693_v11 = vadd.f32 %v5692_v10, %v5691_v5 }
 0x7c9   : > { %5694 = vadd.xlane.f32.xlu0 %v5693_v11 }
 0x84c   : > { %v5417_v44 = vpop.xlane.xlu1 %5416 }
 0x84d   : > { %v5418_v45 = vrot.slane %v5417_v44, 4 }
 0x84f   : > { %v5419_v46 = vadd.f32 %v5418_v45, %v5417_v44 }
 0x851   : > { %v5420_v48 = vrot.slane %v5419_v46, 2 }
 0x853   : > { %v5421_v49 = vadd.f32 %v5420_v48, %v5419_v46 }
 0x855   : > { %v5422_v51 = vrot.slane %v5421_v49, 1 }
 0x856   : > { %v5695_v10 = vpop.xlane.xlu0 %5694 }
 0x857   : > { %v5423_v52 = vadd.f32 %v5422_v51, %v5421_v49  ;;  %v5696_v11 = vrot.slane %v5695_v10, 4 }
 0x859   : > { %6782 = vpush %v5423_v52  ;;  %v5697_v28 = vadd.f32 %v5696_v11, %v5695_v10 }
 0x85a   : > { %6784 = vpush %v5549_v53 }
 0x85b   : > { %v5698_v37 = vrot.slane %v5697_v28, 2 }
 0x85d   : > { %v5699_v45 = vadd.f32 %v5698_v37, %v5697_v28 }
 0x85f   : > { %v5700_v48 = vrot.slane %v5699_v45, 1 }
 0x861   : > { %v5701_v51 = vadd.f32 %v5700_v48, %v5699_v45 }
 0x88a   : > { %s6783_s0 = spop %6782 }
 0x88b   : > { %v5425_v54 = vstv %s6783_s0  ;;  %s6785_s30 = spop %6784  ;;  %s6952_s0 = sshll.u32 %s7044_s15, 4  ;;  %s6953_s0 = int_to_ptr.vmem [resolvable:$false] %s6952_s0 }
 0x88c   : > { %v5426_v55 = vmul.f32 0.0009765625, %v5425_v54  ;;  %v5551_v57 = vstv %s6785_s30  ;;  %s6954_s30 = scalar_lea.vmem %s6953_s0, 8192  ;;  %p6955_p7 = scmp.lt.s32.totalorder %s8618_s11, %s6953_s0 }
 0x88d   : > { %v5552_v58 = vmul.f32 0.0009765625, %v5551_v57 }
 0x88e   : > { %v5427_v59 = vadd.f32 1e-05, %v5426_v55 }
 0x88f   : > { %v8488_v56 = vsub.f32 %v8419_v14, %v5552_v58  ;;  %v8491_v60 = vsub.f32 %v8415_v32, %v5552_v58  ;;  %v8494_v25 = vsub.f32 %v8425_v6, %v5552_v58  ;;  %v8497_v7 = vsub.f32 %v8423_v33, %v5552_v58 }
 0x890   : > { %6879 = vrsqrt.f32 %v5427_v59 }
 0x891   : > { %v5557_v34 = vmul.f32 %v8488_v56, %v8488_v56  ;;  %v5558_v14 = vmul.f32 %v8491_v60, %v8491_v60  ;;  %v5559_v32 = vmul.f32 %v8494_v25, %v8494_v25  ;;  %v5560_v6 = vmul.f32 %v8497_v7, %v8497_v7 }
 0x893   : > { %v5561_v26 = vsel %vm4775_vm10, %v5557_v34, 0.0  ;;  %v5562_v33 = vsel %vm4775_vm10, %v5558_v14, 0.0  ;;  %v5564_v35 = vsel %vm4775_vm10, %v5559_v32, 0.0  ;;  %v5566_v38 = vsel %vm4775_vm10, %v5560_v6, 0.0 }
 0x894   : > { %v5563_v40 = vadd.f32 %v5562_v33, %v5561_v26 }
 0x896   : > { %v5565_v43 = vadd.f32 %v5564_v35, %v5563_v40 }
 0x898   : > { %v5567_v9 = vadd.f32 %v5566_v38, %v5565_v43  ;;  %v6148_v38 = vld [vmem:[%s7260_s9 + $0xa0] sm:$0xff] }
 0x89a   : > { %v6880_v15 = vpop.eup %6879  ;;  %5568 = vadd.xlane.f32.xlu1 %v5567_v9 }
 0x89b   : > { %v5429_v18 = vmul.f32 %v6880_v15, %v8432_v61  ;;  %v5430_v19 = vmul.f32 %v6880_v15, %v8435_v62  ;;  %v5431_v20 = vmul.f32 %v6880_v15, %v8438_v0  ;;  %v5432_v21 = vmul.f32 %v6880_v15, %v8441_v27  ;;  %v8531_v62 = vpop.f32.mrb[45].mxu1  ;;  %v6150_v15 = vld [vmem:[%s7260_s9 + $0xb0] sm:$0xff] }
 0x89c   : > { %v5840_v61 = vsel %vm4775_vm10, %v8527_v30, 0.0  ;;  %v5839_v0 = vsel %vm4775_vm10, %v8531_v62, 0.0  ;;  %v8535_v31 = vpop.f32.mrb[46].mxu1 }
 0x89d   : > { %v5438_v22 = vadd.f32 %v6136_v1, %v5429_v18  ;;  %v5439_v23 = vadd.f32 %v6137_v8, %v5430_v19  ;;  %v5440_v24 = vadd.f32 %v6138_v16, %v5431_v20  ;;  %v5441_v29 = vadd.f32 %v6139_v17, %v5432_v21  ;;  %v8537_v63 = vpop.f32.mrb[47].mxu1  ;;  %v6149_v1 = vld [vmem:[%s7260_s9 + $0xa8] sm:$0xff]  ;;  %v6151_v8 = vld [vmem:[%s7260_s9 + $0xb8] sm:$0xff] }
 0x89e   : > { %v5841_v27 = vadd.f32 %v5840_v61, %v5839_v0  ;;  %v5842_v4 = vsel %vm4775_vm10, %v8537_v63, 0.0  ;;  %v5844_v13 = vsel %vm4775_vm10, %v8535_v31, 0.0 }
 0x89f   : > { %6140 = vst.msk [vmem:[%s8293_s12 + $0x80] sm:$0xff] %vm4775_vm10, %v5438_v22  ;;  %6141 = vst.msk [vmem:[%s8293_s12 + $0x88] sm:$0xff] %vm4775_vm10, %v5439_v23 }
 0x8a0   : > { %6142 = vst.msk [vmem:[%s8293_s12 + $0x90] sm:$0xff] %vm4775_vm10, %v5440_v24  ;;  %6143 = vst.msk [vmem:[%s8293_s12 + $0x98] sm:$0xff] %vm4775_vm10, %v5441_v29  ;;  %v5843_v41 = vadd.f32 %v5842_v4, %v5841_v27 }
 0x8a2   : > { %v5845_v5 = vadd.f32 %v5844_v13, %v5843_v41 }
 0x8a4   : > { %5846 = vadd.xlane.f32.xlu0 %v5845_v5 }
 0x927   : > { %v5569_v42 = vpop.xlane.xlu1 %5568 }
 0x928   : > { %v5570_v36 = vrot.slane %v5569_v42, 4 }
 0x92a   : > { %v5571_v44 = vadd.f32 %v5570_v36, %v5569_v42 }
 0x92c   : > { %v5572_v46 = vrot.slane %v5571_v44, 2 }
 0x92e   : > { %v5573_v47 = vadd.f32 %v5572_v46, %v5571_v44 }
 0x930   : > { %v5574_v49 = vrot.slane %v5573_v47, 1 }
 0x931   : > { %v5847_v24 = vpop.xlane.xlu0 %5846 }
 0x932   : > { %v5575_v50 = vadd.f32 %v5574_v49, %v5573_v47 }
 0x934   : > { %6786 = vpush %v5575_v50 }
 0x935   : > { %6788 = vpush %v5701_v51 }
 0x965   : > { %s6787_s28 = spop %6786 }
 0x966   : > { %v5577_v52 = vstv %s6787_s28  ;;  %s6789_s27 = spop %6788 }
 0x967   : > { %v5578_v53 = vmul.f32 0.0009765625, %v5577_v52  ;;  %v5703_v54 = vstv %s6789_s27 }
 0x968   : > { %v5704_v55 = vmul.f32 0.0009765625, %v5703_v54 }
 0x969   : > { %v5579_v57 = vadd.f32 1e-05, %v5578_v53 }
 0x96a   : > { %v8544_v58 = vsub.f32 %v8475_v2, %v5704_v55  ;;  %v8547_v59 = vsub.f32 %v8471_v12, %v5704_v55  ;;  %v8550_v34 = vsub.f32 %v8481_v3, %v5704_v55  ;;  %v8553_v14 = vsub.f32 %v8479_v39, %v5704_v55 }
 0x96b   : > { %6881 = vrsqrt.f32 %v5579_v57 }
 0x96c   : > { %v5709_v32 = vmul.f32 %v8544_v58, %v8544_v58  ;;  %v5710_v2 = vmul.f32 %v8547_v59, %v8547_v59  ;;  %v5711_v12 = vmul.f32 %v8550_v34, %v8550_v34  ;;  %v5712_v3 = vmul.f32 %v8553_v14, %v8553_v14 }
 0x96e   : > { %v5713_v6 = vsel %vm4775_vm10, %v5709_v32, 0.0  ;;  %v5714_v39 = vsel %vm4775_vm10, %v5710_v2, 0.0  ;;  %v5716_v33 = vsel %vm4775_vm10, %v5711_v12, 0.0  ;;  %v5718_v35 = vsel %vm4775_vm10, %v5712_v3, 0.0  ;;  %v6161_v32 = vld [vmem:[%s7260_s9 + $0xc8] sm:$0xff]  ;;  %v6162_v2 = vld [vmem:[%s7260_s9 + $0xd0] sm:$0xff] }
 0x96f   : > { %v5715_v26 = vadd.f32 %v5714_v39, %v5713_v6  ;;  %v6163_v12 = vld [vmem:[%s7260_s9 + $0xd8] sm:$0xff] }
 0x971   : > { %v5717_v40 = vadd.f32 %v5716_v33, %v5715_v26 }
 0x973   : > { %v5719_v43 = vadd.f32 %v5718_v35, %v5717_v40 }
 0x975   : > { %v6882_v9 = vpop.eup %6881  ;;  %5720 = vadd.xlane.f32.xlu1 %v5719_v43 }
 0x976   : > { %v5581_v16 = vmul.f32 %v6882_v9, %v8488_v56  ;;  %v5582_v17 = vmul.f32 %v6882_v9, %v8491_v60  ;;  %v5583_v18 = vmul.f32 %v6882_v9, %v8494_v25  ;;  %v5584_v19 = vmul.f32 %v6882_v9, %v8497_v7 }
 0x977   : > { %v5848_v56 = vrot.slane %v5847_v24, 4 }
 0x978   : > { %v5590_v20 = vadd.f32 %v6148_v38, %v5581_v16  ;;  %v5591_v21 = vadd.f32 %v6149_v1, %v5582_v17  ;;  %v5592_v22 = vadd.f32 %v6150_v15, %v5583_v18  ;;  %v5593_v23 = vadd.f32 %v6151_v8, %v5584_v19  ;;  %v6172_v17 = vld [vmem:[%s7260_s9 + $0xe0] sm:$0xff]  ;;  %v6173_v19 = vld [vmem:[%s7260_s9 + $0xe8] sm:$0xff] }
 0x979   : > { %v5849_v29 = vadd.f32 %v5848_v56, %v5847_v24 }
 0x97a   : > { %6152 = vst.msk [vmem:[%s8293_s12 + $0xa0] sm:$0xff] %vm4775_vm10, %v5590_v20  ;;  %6153 = vst.msk [vmem:[%s8293_s12 + $0xa8] sm:$0xff] %vm4775_vm10, %v5591_v21  ;;  %v6174_v20 = vld [vmem:[%s7260_s9 + $0xf0] sm:$0xff]  ;;  %v6175_v21 = vld [vmem:[%s7260_s9 + $0xf8] sm:$0xff] }
 0x97b   : > { %6154 = vst.msk [vmem:[%s8293_s12 + $0xb0] sm:$0xff] %vm4775_vm10, %v5592_v22  ;;  %6155 = vst.msk [vmem:[%s8293_s12 + $0xb8] sm:$0xff] %vm4775_vm10, %v5593_v23  ;;  %v5850_v60 = vrot.slane %v5849_v29, 2 }
 0x97d   : > { %v5851_v7 = vadd.f32 %v5850_v60, %v5849_v29 }
 0x97f   : > { %v5852_v41 = vrot.slane %v5851_v7, 1 }
 0x981   : > { %v5853_v10 = vadd.f32 %v5852_v41, %v5851_v7 }
 0xa02   : > { %v5721_v61 = vpop.xlane.xlu1 %5720 }
 0xa03   : > { %v5722_v25 = vrot.slane %v5721_v61, 4 }
 0xa05   : > { %v5723_v0 = vadd.f32 %v5722_v25, %v5721_v61 }
 0xa07   : > { %v5724_v27 = vrot.slane %v5723_v0, 2 }
 0xa09   : > { %v5725_v4 = vadd.f32 %v5724_v27, %v5723_v0 }
 0xa0b   : > { %v5726_v13 = vrot.slane %v5725_v4, 1 }
 0xa0d   : > { %v5727_v5 = vadd.f32 %v5726_v13, %v5725_v4 }
 0xa0f   : > { %6790 = vpush %v5727_v5 }
 0xa10   : > { %6792 = vpush %v5853_v10 }
 0xa40   : > { %s6791_s29 = spop %6790 }
 0xa41   : > { %v5729_v11 = vstv %s6791_s29  ;;  %s6793_s14 = spop %6792 }
 0xa42   : > { %v5730_v28 = vmul.f32 0.0009765625, %v5729_v11  ;;  %v5855_v37 = vstv %s6793_s14 }
 0xa43   : > { %v5856_v42 = vmul.f32 0.0009765625, %v5855_v37 }
 0xa44   : > { %v5731_v36 = vadd.f32 1e-05, %v5730_v28 }
 0xa45   : > { %v5857_v44 = vsub.f32 %v8531_v62, %v5856_v42  ;;  %v5858_v45 = vsub.f32 %v8527_v30, %v5856_v42  ;;  %v5859_v46 = vsub.f32 %v8537_v63, %v5856_v42  ;;  %v5860_v47 = vsub.f32 %v8535_v31, %v5856_v42  ;;  %v6160_v31 = vld [vmem:[%s7260_s9 + $0xc0] sm:$0xff]  ;;  %s6948_s9 = scalar_lea.vmem %s8618_s11, 4096 }
 0xa46   : > { %6883 = vrsqrt.f32 %v5731_v36  ;;  %p6949_p0 = scmp.ne.s32.totalorder %s8618_s11, %s6948_s9  ;;  %p6956_p10 = scmp.lt.s32.totalorder %s6954_s30, %s6948_s9 }
 0xa47   : > { %v5861_v48 = vmul.f32 %v5857_v44, %v5857_v44  ;;  %v5862_v49 = vmul.f32 %v5858_v45, %v5858_v45  ;;  %v5863_v50 = vmul.f32 %v5859_v46, %v5859_v46  ;;  %v5864_v51 = vmul.f32 %v5860_v47, %v5860_v47 }
 0xa48   : > { %p6950_p12 = pnand %p6949_p0, %p8695_p3  ;;  %p6957_p9 = por %p6956_p10, %p6955_p7 }
 0xa49   : > { %v5865_v52 = vsel %vm4775_vm10, %v5861_v48, 0.0  ;;  %v5866_v53 = vsel %vm4775_vm10, %v5862_v49, 0.0  ;;  %v5868_v54 = vsel %vm4775_vm10, %v5863_v50, 0.0  ;;  %v5870_v63 = vsel %vm4775_vm10, %v5864_v51, 0.0 }
 0xa4a   : > { %v5867_v62 = vadd.f32 %v5866_v53, %v5865_v52  ;;  %p6951_p13 = pneg %p6950_p12 }
 0xa4c   : > { %v5869_v30 = vadd.f32 %v5868_v54, %v5867_v62  ;;  %p6958_p11 = pnand %p6957_p9, %p6951_p13 }
 0xa4e   : > { %v5871_v55 = vadd.f32 %v5870_v63, %v5869_v30 }
 0xa50   : > { %v6884_v57 = vpop.eup %6883  ;;  %5872 = vadd.xlane.f32.xlu1 %v5871_v55 }
 0xa51   : > { %v5733_v3 = vmul.f32 %v6884_v57, %v8544_v58  ;;  %v5734_v6 = vmul.f32 %v6884_v57, %v8547_v59  ;;  %v5735_v39 = vmul.f32 %v6884_v57, %v8550_v34  ;;  %v5736_v26 = vmul.f32 %v6884_v57, %v8553_v14 }
 0xa53   : > { %v5742_v33 = vadd.f32 %v6160_v31, %v5733_v3  ;;  %v5743_v40 = vadd.f32 %v6161_v32, %v5734_v6  ;;  %v5744_v35 = vadd.f32 %v6162_v2, %v5735_v39  ;;  %v5745_v43 = vadd.f32 %v6163_v12, %v5736_v26 }
 0xa55   : > { %6164 = vst.msk [vmem:[%s8293_s12 + $0xc0] sm:$0xff] %vm4775_vm10, %v5742_v33  ;;  %6165 = vst.msk [vmem:[%s8293_s12 + $0xc8] sm:$0xff] %vm4775_vm10, %v5743_v40 }
 0xa56   : > { %6166 = vst.msk [vmem:[%s8293_s12 + $0xd0] sm:$0xff] %vm4775_vm10, %v5744_v35  ;;  %6167 = vst.msk [vmem:[%s8293_s12 + $0xd8] sm:$0xff] %vm4775_vm10, %v5745_v43 }
 0xadd   : > { %v5873_v58 = vpop.xlane.xlu1 %5872 }
 0xade   : > { %v5874_v59 = vrot.slane %v5873_v58, 4 }
 0xae0   : > { %v5875_v34 = vadd.f32 %v5874_v59, %v5873_v58 }
 0xae2   : > { %v5876_v14 = vrot.slane %v5875_v34, 2 }
 0xae4   : > { %v5877_v38 = vadd.f32 %v5876_v14, %v5875_v34 }
 0xae6   : > { %v5878_v9 = vrot.slane %v5877_v38, 1 }
 0xae8   : > { %v5879_v1 = vadd.f32 %v5878_v9, %v5877_v38 }
 0xaea   : > { %6794 = vpush %v5879_v1 }
 0xb1b   : > { %s6795_s10 = spop %6794 }
 0xb1c   : > { %v5881_v15 = vstv %s6795_s10 }
 0xb1d   : > { %v5882_v8 = vmul.f32 0.0009765625, %v5881_v15 }
 0xb1f   : > { %v5883_v16 = vadd.f32 1e-05, %v5882_v8 }
 0xb21   : > { %6885 = vrsqrt.f32 %v5883_v16 }
 0xb2b   : > { %v6886_v18 = vpop.eup %6885 }
 0xb2c   : > { %v5885_v22 = vmul.f32 %v6886_v18, %v5857_v44  ;;  %v5886_v23 = vmul.f32 %v6886_v18, %v5858_v45  ;;  %v5887_v24 = vmul.f32 %v6886_v18, %v5859_v46  ;;  %v5888_v56 = vmul.f32 %v6886_v18, %v5860_v47 }
 0xb2e   : > { %v5894_v29 = vadd.f32 %v6172_v17, %v5885_v22  ;;  %v5895_v60 = vadd.f32 %v6173_v19, %v5886_v23  ;;  %v5896_v61 = vadd.f32 %v6174_v20, %v5887_v24  ;;  %v5897_v25 = vadd.f32 %v6175_v21, %v5888_v56 }
 0xb30   : > { %6176 = vst.msk [vmem:[%s8293_s12 + $0xe0] sm:$0xff] %vm4775_vm10, %v5894_v29  ;;  %6177 = vst.msk [vmem:[%s8293_s12 + $0xe8] sm:$0xff] %vm4775_vm10, %v5895_v60 }
 0xb31   : > { %6178 = vst.msk [vmem:[%s8293_s12 + $0xf0] sm:$0xff] %vm4775_vm10, %v5896_v61  ;;  %6179 = vst.msk [vmem:[%s8293_s12 + $0xf8] sm:$0xff] %vm4775_vm10, %v5897_v25 }
 0xb32   : > { %6961 = shalt.err (!%p6958_p11)
}
 0xb33   : > { %s6962_s12 = scalar_lea.hbm %s8616_s17, 4096  ;;  %s6966_s29 = scalar_lea.hbm %s8680_s5, 8192 }
 0xb34   : > { %p6963_p1 = scmp.ne.s32.totalorder %s8616_s17, %s6962_s12  ;;  %p6967_p5 = scmp.lt.u32.totalorder %s8616_s17, %s8680_s5 }
 0xb35   : > { %p6968_p4 = scmp.lt.u32.totalorder %s6966_s29, %s6962_s12  ;;  %p6970_p0 = scmp.lt.u32.totalorder %s6962_s12, %s8616_s17 }
 0xb36   : > { %p6964_p6 = pnand %p6963_p1, %p8695_p3 }
 0xb37   : > { %p6969_p8 = por %p6968_p4, %p6967_p5 }
 0xb38   : > { %p6965_p2 = pneg %p6964_p6 }
 0xb39   : > { %p6971_p12 = por %p6970_p0, %p6969_p8 }
 0xb3b   : > { %p6972_p13 = pnand %p6971_p12, %p6965_p2 }
 0xb3d   : > { %6975 = shalt.err (!%p6972_p13)
}
 0xb3e   : > { %s7045_s13 = smov 128   ;;  %s7046_s25 = smov 8  }
 0xb3f   : > { %6800 = dma.vmem_to_hbm [thread:$0]  (%p8695_p3), %s8618_s11, 4096, %s8616_s17, %s5904_s21, %s7045_s13, %s7045_s13, %s7046_s25  }
 0xb40 PF: > { %s5935_s16 = sand.u32 1, %s7014_s18   ;;  %p8696_p7 = scmp.ne.s32.totalorder %s8688_s8, 0 }
 0xb41   : > { %p8697_p10 = scmp.ge.s32.totalorder %s7034_s23, 2  ;;  %s5936_s9 = scalar_lea.sflag [#allocation5], %s5935_s16 }
 0xb43   : > { %p6810_p9 = pnand %p8697_p10, %p8696_p7 }
 0xb45   : > { %7009 = dma.done.wait (!%p6810_p9), %s5936_s9, 4096  }
 0xb46   : > { %7011 = vsyncadd (!%p6810_p9), %s5936_s9, 4294963200  ;;  %s24_s23 = sadd.s32 1, %s7034_s23   ;;  %s8698_s18 = smov %s7018_s19 }
 0xb47   : > { %p21_p11 = scmp.ge.s32.totalorder %s24_s23, 4   ;;  %s8699_s19 = smov %s7022_s20 }
 0xb48   : > { %s8700_s20 = smov %s7133_s7  ;;  %s8701_s21 = smov %s7030_s22 }
 0xb49   : > { %s8702_s22 = smov %s8704_s26  ;;  %23 = sbr.rel (!%p21_p11) target bundleno = 10 (0xa), region = 122 }
 0xb50   :  { %5941 = vsyncpa [#allocation4], 1 }
 0xb51   :  { %5943 = vsyncpa [#allocation4 + $0x1], 1 }
 0xb52   :  { %5944 = vsyncpa [#allocation7], 1 }
 0xb53   :  { %5946 = vsyncpa [#allocation7 + $0x1], 1 }
 0xb54   :  { %5947 = vsyncpa [#allocation5], 1 }
 0xb55   :  { %5949 = vsyncpa [#allocation5 + $0x1], 1 }

</bundles_post_ra>
